<compile_context>
chip_gen: v7x
topology: tpu7x:2x2x1
jax: 0.10.0
libtpu: 0.0.40
codegen_flags: <defaults>
</compile_context>

<pallas_src>
import functools
import math

import jax
import jax.numpy as jnp
from jax import lax
from jax.experimental import pallas as pl
from jax.experimental.pallas import tpu as pltpu

_LANE = 128
_SUBLANE = 8
_TBLK = 16          # time steps per grid iteration (amortizes ~0.35us/step grid overhead)
_MTILE = 128        # row tile for the output projection kernel
_NEG_BIG = -1e30    # masks padded vocab columns before log_softmax


def _round_up(n, m):
    return (n + m - 1) // m * m


# ---------------------------------------------------------------------------
# GRU recurrence kernels (torch.nn.GRU semantics, gate order [r, z, n]).
# gates_ref already contains x_t @ W_ih + b_ih for all three gates; per step we
# only do one (B, Hp) x (Hp, 3Hp) matmul for the hidden-to-hidden path.
# ---------------------------------------------------------------------------
def _gru_step(gx, h, whh, bhh, hp):
    gh = jnp.dot(h, whh, preferred_element_type=jnp.float32) + bhh
    r = jax.nn.sigmoid(gx[:, :hp] + gh[:, :hp])
    z = jax.nn.sigmoid(gx[:, hp:2 * hp] + gh[:, hp:2 * hp])
    n = jnp.tanh(gx[:, 2 * hp:] + r * gh[:, 2 * hp:])
    return (1.0 - z) * n + z * h


def _gru_last_kernel(gates_ref, whh_ref, bhh_ref, h0_ref, hout_ref, h_sc,
                     *, t_blk, t_total, hp):
    """Encoder: run the recurrence, emit only the final hidden state."""
    tb = pl.program_id(1)

    @pl.when(tb == 0)
    def _():
        h_sc[...] = h0_ref[...]

    whh = whh_ref[...]          # hoisted loads (resident weights)
    bhh = bhh_ref[...]
    mask_tail = (t_total % t_blk) != 0   # static

    def step(i, h):
        h_new = _gru_step(gates_ref[i], h, whh, bhh, hp)
        if mask_tail:
            t_global = tb * t_blk + i
            h_new = jnp.where(t_global < t_total, h_new, h)
        return h_new

    h_sc[...] = lax.fori_loop(0, t_blk, step, h_sc[...], unroll=True)

    @pl.when(tb == pl.num_programs(1) - 1)
    def _():
        hout_ref[...] = h_sc[...]


def _gru_all_kernel(gates_ref, whh_ref, bhh_ref, h0_ref, hall_ref, h_sc,
                    *, t_blk, hp):
    """Decoder: run the recurrence, emit every hidden state (projection done later)."""
    tb = pl.program_id(1)

    @pl.when(tb == 0)
    def _():
        h_sc[...] = h0_ref[...]

    whh = whh_ref[...]
    bhh = bhh_ref[...]

    def step(i, h):
        h_new = _gru_step(gates_ref[i], h, whh, bhh, hp)
        hall_ref[i] = h_new
        return h_new

    h_sc[...] = lax.fori_loop(0, t_blk, step, h_sc[...], unroll=True)


def _gru_scan(gates_tm, h0, whh, bhh, *, emit_all):
    """gates_tm: (T, Bp, 3Hp) precomputed input gates; h0: (Bp, Hp)."""
    t_total, bp, g3 = gates_tm.shape
    hp = h0.shape[1]

    t_blk = min(_TBLK, t_total)
    t_pad = _round_up(t_total, t_blk)
    if t_pad != t_total:
        gates_tm = jnp.pad(gates_tm, ((0, t_pad - t_total), (0, 0), (0, 0)))
    n_t = t_pad // t_blk

    b_tile = bp if bp <= 128 else 128
    n_b = bp // b_tile

    # Weights/biases use constant index maps -> resident across the time axis.
    # (pipeline_mode=pl.Buffered(1) could drop their double-buffering on v7x.)
    in_specs = [
        pl.BlockSpec((t_blk, b_tile, g3), lambda b, t: (t, b, 0)),   # precomputed gates
        pl.BlockSpec((hp, g3), lambda b, t: (0, 0)),                 # W_hh
        pl.BlockSpec((1, g3), lambda b, t: (0, 0)),                  # b_hh
        pl.BlockSpec((b_tile, hp), lambda b, t: (b, 0)),             # h0
    ]
    compiler_params = pltpu.CompilerParams(
        dimension_semantics=("parallel", "arbitrary"),
        vmem_limit_bytes=32 * 1024 * 1024)
    scratch = [pltpu.VMEM((b_tile, hp), jnp.float32)]

    if emit_all:
        kernel = functools.partial(_gru_all_kernel, t_blk=t_blk, hp=hp)
        h_all = pl.pallas_call(
            kernel,
            out_shape=jax.ShapeDtypeStruct((t_pad, bp, hp), jnp.float32),
            grid_spec=pltpu.PrefetchScalarGridSpec(
                num_scalar_prefetch=0,
                grid=(n_b, n_t),
                in_specs=in_specs,
                out_specs=pl.BlockSpec((t_blk, b_tile, hp), lambda b, t: (t, b, 0)),
                scratch_shapes=scratch),
            compiler_params=compiler_params,
        )(gates_tm, whh, bhh, h0)
        return h_all[:t_total]
    else:
        kernel = functools.partial(_gru_last_kernel, t_blk=t_blk, t_total=t_total, hp=hp)
        return pl.pallas_call(
            kernel,
            out_shape=jax.ShapeDtypeStruct((bp, hp), jnp.float32),
            grid_spec=pltpu.PrefetchScalarGridSpec(
                num_scalar_prefetch=0,
                grid=(n_b, n_t),
                in_specs=in_specs,
                out_specs=pl.BlockSpec((b_tile, hp), lambda b, t: (b, 0)),
                scratch_shapes=scratch),
            compiler_params=compiler_params,
        )(gates_tm, whh, bhh, h0)


# ---------------------------------------------------------------------------
# Output projection + log_softmax as a tiled matmul over M = Bp*Ty rows.
# ---------------------------------------------------------------------------
def _proj_logsoftmax_kernel(h_ref, w_ref, b_ref, out_ref, *, v_actual):
    logits = jnp.dot(h_ref[...], w_ref[...],
                     preferred_element_type=jnp.float32) + b_ref[...]     # (TM, Vp)
    vp = logits.shape[-1]
    if v_actual < vp:   # mask padded vocab columns (static check)
        col = lax.broadcasted_iota(jnp.int32, logits.shape, 1)
        logits = jnp.where(col < v_actual, logits, _NEG_BIG)
    m = jnp.max(logits, axis=-1, keepdims=True)
    shifted = logits - m
    lse = jnp.log(jnp.sum(jnp.exp(shifted), axis=-1, keepdims=True))
    out_ref[...] = shifted - lse


def _output_log_softmax(h_rows, w, b, *, v_actual):
    m, hp = h_rows.shape
    vp = w.shape[1]
    m_pad = _round_up(m, _MTILE)
    if m_pad != m:
        h_rows = jnp.pad(h_rows, ((0, m_pad - m), (0, 0)))
    kernel = functools.partial(_proj_logsoftmax_kernel, v_actual=v_actual)
    out = pl.pallas_call(
        kernel,
        out_shape=jax.ShapeDtypeStruct((m_pad, vp), jnp.float32),
        grid_spec=pltpu.PrefetchScalarGridSpec(
            num_scalar_prefetch=0,
            grid=(m_pad // _MTILE,),
            in_specs=[
                pl.BlockSpec((_MTILE, hp), lambda i: (i, 0)),
                pl.BlockSpec((hp, vp), lambda i: (0, 0)),
                pl.BlockSpec((1, vp), lambda i: (0, 0)),
            ],
            out_specs=pl.BlockSpec((_MTILE, vp), lambda i: (i, 0))),
        compiler_params=pltpu.CompilerParams(
            dimension_semantics=("parallel",),
            vmem_limit_bytes=32 * 1024 * 1024),
    )(h_rows, w, b)
    return out[:m]


# ---------------------------------------------------------------------------
# Parameter init (uniform(-1/sqrt(H), 1/sqrt(H)) like torch defaults).
# Gate weights are stored fused: (H, 3H) with column blocks [r | z | n].
# ---------------------------------------------------------------------------
def init_params(key, vocab_size, hidden_size):
    ks = jax.random.split(key, 12)
    s = 1.0 / math.sqrt(hidden_size)

    def u(k, shape):
        return jax.random.uniform(k, shape, jnp.float32, -s, s)

    return {
        "enc_embed": u(ks[0], (vocab_size, hidden_size)),
        "enc_wih": u(ks[1], (hidden_size, 3 * hidden_size)),
        "enc_whh": u(ks[2], (hidden_size, 3 * hidden_size)),
        "enc_bih": u(ks[3], (1, 3 * hidden_size)),
        "enc_bhh": u(ks[4], (1, 3 * hidden_size)),
        "dec_embed": u(ks[5], (vocab_size, hidden_size)),
        "dec_wih": u(ks[6], (hidden_size, 3 * hidden_size)),
        "dec_whh": u(ks[7], (hidden_size, 3 * hidden_size)),
        "dec_bih": u(ks[8], (1, 3 * hidden_size)),
        "dec_bhh": u(ks[9], (1, 3 * hidden_size)),
        "out_w": u(ks[10], (hidden_size, vocab_size)),
        "out_b": u(ks[11], (1, vocab_size)),
    }


# ---------------------------------------------------------------------------
# PlainSeq2Seq.forward equivalent.
#   x, y: int32 token ids (B, Tx) / (B, Ty) (batch_first like PyTorch)
#   returns (log_probs (B, Ty, V), None)
# ---------------------------------------------------------------------------
@jax.jit
def plain_seq2seq_forward(params, x, x_lengths, y, y_lengths):
    del x_lengths, y_lengths  # TODO(synk): packed-sequence length masking not implemented
    B, _tx = x.shape
    t_y = y.shape[1]
    H = params["enc_embed"].shape[1]
    V = params["out_w"].shape[1]

    bp = _round_up(B, _SUBLANE) if B <= 128 else _round_up(B, 128)
    hp = _round_up(H, _LANE)
    vp = _round_up(V, _LANE)

    # ---- zero-pad params to (8,128)-friendly shapes (math stays exact) ----
    def pad2(a, r, c):
        return jnp.pad(a, ((0, r - a.shape[0]), (0, c - a.shape[1])))

    def pad_gate_w(w):          # (H, 3H) -> (hp, 3hp), each gate block padded separately
        w3 = w.reshape(H, 3, H)
        w3 = jnp.pad(w3, ((0, hp - H), (0, 0), (0, hp - H)))
        return w3.reshape(hp, 3 * hp)

    def pad_gate_b(bvec):       # (1, 3H) -> (1, 3hp)
        b3 = bvec.reshape(1, 3, H)
        b3 = jnp.pad(b3, ((0, 0), (0, 0), (0, hp - H)))
        return b3.reshape(1, 3 * hp)

    enc_embed = pad2(params["enc_embed"], params["enc_embed"].shape[0], hp)
    dec_embed = pad2(params["dec_embed"], params["dec_embed"].shape[0], hp)
    enc_wih, enc_whh = pad_gate_w(params["enc_wih"]), pad_gate_w(params["enc_whh"])
    dec_wih, dec_whh = pad_gate_w(params["dec_wih"]), pad_gate_w(params["dec_whh"])
    enc_bih, enc_bhh = pad_gate_b(params["enc_bih"]), pad_gate_b(params["enc_bhh"])
    dec_bih, dec_bhh = pad_gate_b(params["dec_bih"]), pad_gate_b(params["dec_bhh"])
    out_w = pad2(params["out_w"], hp, vp)
    out_b = pad2(params["out_b"], 1, vp)

    xp = jnp.pad(x, ((0, bp - B), (0, 0)))
    ypd = jnp.pad(y, ((0, bp - B), (0, 0)))

    # ---- encoder: hoisted input projection (one big matmul) + Pallas recurrence ----
    x_emb_tm = jnp.take(enc_embed, xp.T, axis=0)                       # (Tx, bp, hp)
    enc_gates = jnp.einsum('tbh,hg->tbg', x_emb_tm, enc_wih) + enc_bih  # (Tx, bp, 3hp)
    h0 = jnp.zeros((bp, hp), jnp.float32)
    enc_hid = _gru_scan(enc_gates, h0, enc_whh, enc_bhh, emit_all=False)  # (bp, hp)

    # ---- decoder recurrence (emits all hidden states) ----
    y_emb_tm = jnp.take(dec_embed, ypd.T, axis=0)                      # (Ty, bp, hp)
    dec_gates = jnp.einsum('tbh,hg->tbg', y_emb_tm, dec_wih) + dec_bih
    h_all = _gru_scan(dec_gates, enc_hid, dec_whh, dec_bhh, emit_all=True)  # (Ty, bp, hp)

    # ---- fused output projection + log_softmax over M = bp*Ty rows ----
    h_rows = jnp.transpose(h_all, (1, 0, 2)).reshape(bp * t_y, hp)     # batch-major rows
    logp = _output_log_softmax(h_rows, out_w, out_b, v_actual=V)       # (bp*Ty, vp)
    output = logp[:, :V].reshape(bp, t_y, V)[:B]                       # (B, Ty, V)
    return output, None


# ---------------------------------------------------------------------------
# Pure-JAX reference (lax.scan GRU) for correctness checking.
# ---------------------------------------------------------------------------
def _reference_forward(params, x, y):
    H = params["enc_embed"].shape[1]

    def gru_scan(emb_seq, h0, wih, whh, bih, bhh):
        def step(h, x_t):
            gx = x_t @ wih + bih
            gh = h @ whh + bhh
            r = jax.nn.sigmoid(gx[:, :H] + gh[:, :H])
            z = jax.nn.sigmoid(gx[:, H:2 * H] + gh[:, H:2 * H])
            n = jnp.tanh(gx[:, 2 * H:] + r * gh[:, 2 * H:])
            h_new = (1.0 - z) * n + z * h
            return h_new, h_new
        return lax.scan(step, h0, emb_seq)

    B = x.shape[0]
    x_emb = jnp.take(params["enc_embed"], x.T, axis=0)
    h0 = jnp.zeros((B, H), jnp.float32)
    enc_h, _ = gru_scan(x_emb, h0, params["enc_wih"], params["enc_whh"],
                        params["enc_bih"], params["enc_bhh"])
    y_emb = jnp.take(params["dec_embed"], y.T, axis=0)
    _, h_all = gru_scan(y_emb, enc_h, params["dec_wih"], params["dec_whh"],
                        params["dec_bih"], params["dec_bhh"])
    logits = jnp.einsum('tbh,hv->tbv', h_all, params["out_w"]) + params["out_b"]
    logp = jax.nn.log_softmax(logits, axis=-1)
    return jnp.transpose(logp, (1, 0, 2))


if __name__ == "__main__":
    B, T_X, T_Y = 2, 8, 8
    VOCAB, HIDDEN = 64, 32

    key = jax.random.PRNGKey(0)
    k_params, k_x, k_y = jax.random.split(key, 3)

    params = init_params(k_params, VOCAB, HIDDEN)
    x = jax.random.randint(k_x, (B, T_X), 0, VOCAB, dtype=jnp.int32)
    y = jax.random.randint(k_y, (B, T_Y), 0, VOCAB, dtype=jnp.int32)
    x_lengths = jnp.full((B,), T_X, jnp.int32)
    y_lengths = jnp.full((B,), T_Y, jnp.int32)

    output, attn = plain_seq2seq_forward(params, x, x_lengths, y, y_lengths)
    output = jax.block_until_ready(output)

    assert output.shape == (B, T_Y, VOCAB)
    assert attn is None
    # log_softmax sanity: probabilities sum to ~1 per (batch, time) position
    probs_sum = jnp.sum(jnp.exp(output), axis=-1)
    assert bool(jnp.all(jnp.abs(probs_sum - 1.0) < 1e-3))
    # cross-check against a pure-JAX lax.scan reference (loose tol: matmul precision)
    ref = _reference_forward(params, x, y)
    max_err = float(jnp.max(jnp.abs(output - ref)))
    assert max_err < 5e-2, f"mismatch vs reference: {max_err}"

    print("KERNEL_OK")
</pallas_src>

<mosaic_0001>
module attributes {stable_mosaic.version = 11 : i64} {
  func.func @_gru_last_kernel(%arg0: i32, %arg1: i32, %arg2: memref<8x8x384xf32, #tpu.memory_space<vmem>>, %arg3: memref<128x384xf32, #tpu.memory_space<vmem>>, %arg4: memref<1x384xf32, #tpu.memory_space<vmem>>, %arg5: memref<8x128xf32, #tpu.memory_space<vmem>>, %arg6: memref<8x128xf32, #tpu.memory_space<vmem>>, %arg7: memref<8x128xf32, #tpu.memory_space<vmem>>) attributes {dimension_semantics = [#tpu.dimension_semantics<parallel>, #tpu.dimension_semantics<arbitrary>], iteration_bounds = array<i64: 1, 1>, scalar_prefetch = 0 : i64, scratch_operands = 1 : i64, tpu.core_type = #tpu.core_type<tc>, window_params = [{transform_indices = @transform_0, window_bounds = array<i64: 8, 8, 384>}, {pipeline_mode = #tpu.pipeline_mode<synchronous>, transform_indices = @transform_1, window_bounds = array<i64: 128, 384>}, {pipeline_mode = #tpu.pipeline_mode<synchronous>, transform_indices = @transform_2, window_bounds = array<i64: 1, 384>}, {transform_indices = @transform_3, window_bounds = array<i64: 8, 128>}, {transform_indices = @transform_4, window_bounds = array<i64: 8, 128>}]} {
    %c0_i32 = arith.constant 0 : i32
    %0 = arith.cmpi eq, %arg1, %c0_i32 : i32
    %1 = arith.extui %0 : i1 to i32
    %c0_i32_0 = arith.constant 0 : i32
    %2 = arith.cmpi ne, %1, %c0_i32_0 : i32
    scf.if %2 {
      %c0_58 = arith.constant 0 : index
      %c0_59 = arith.constant 0 : index
      %266 = vector.load %arg5[%c0_58, %c0_59] : memref<8x128xf32, #tpu.memory_space<vmem>>, vector<8x128xf32>
      %c0_60 = arith.constant 0 : index
      %c0_61 = arith.constant 0 : index
      %267 = vector.load %arg7[%c0_60, %c0_61] : memref<8x128xf32, #tpu.memory_space<vmem>>, vector<8x128xf32>
      tpu.vector_store %arg7[%c0_60, %c0_61], %266 {strides = array<i32>} : memref<8x128xf32, #tpu.memory_space<vmem>>, vector<8x128xf32>,
    } else {
    }
    %c0 = arith.constant 0 : index
    %c0_1 = arith.constant 0 : index
    %3 = vector.load %arg3[%c0, %c0_1] : memref<128x384xf32, #tpu.memory_space<vmem>>, vector<128x384xf32>
    %c0_2 = arith.constant 0 : index
    %c0_3 = arith.constant 0 : index
    %4 = vector.load %arg4[%c0_2, %c0_3] : memref<1x384xf32, #tpu.memory_space<vmem>>, vector<1x384xf32>
    %c0_4 = arith.constant 0 : index
    %c0_5 = arith.constant 0 : index
    %5 = vector.load %arg7[%c0_4, %c0_5] : memref<8x128xf32, #tpu.memory_space<vmem>>, vector<8x128xf32>
    %c0_i32_6 = arith.constant 0 : i32
    %6 = arith.index_cast %c0_i32_6 : i32 to index
    %c0_7 = arith.constant 0 : index
    %c0_8 = arith.constant 0 : index
    %7 = vector.load %arg2[%6, %c0_7, %c0_8] : memref<8x8x384xf32, #tpu.memory_space<vmem>>, vector<1x8x384xf32>
    %8 = vector.shape_cast %7 : vector<1x8x384xf32> to vector<8x384xf32>
    %cst = arith.constant dense<0.000000e+00> : vector<8x384xf32>
    %9 = tpu.matmul %5, %3, %cst {dimension_numbers = #tpu.dot_dimension_numbers<[1], [0], [0], [1], [0, 0, 1, 1], [], []>} : vector<8x128xf32>, vector<128x384xf32>, vector<8x384xf32> -> vector<8x384xf32>
    %10 = vector.broadcast %4 : vector<1x384xf32> to vector<8x384xf32>
    %11 = arith.addf %9, %10 : vector<8x384xf32>
    %12 = vector.extract_strided_slice %8 {offsets = [0, 0], sizes = [8, 128], strides = [1, 1]} : vector<8x384xf32> to vector<8x128xf32>
    %13 = vector.extract_strided_slice %11 {offsets = [0, 0], sizes = [8, 128], strides = [1, 1]} : vector<8x384xf32> to vector<8x128xf32>
    %14 = arith.addf %12, %13 : vector<8x128xf32>
    %15 = arith.negf %14 : vector<8x128xf32>
    %16 = math.exp %15 : vector<8x128xf32>
    %cst_9 = arith.constant 1.000000e+00 : f32
    %17 = vector.broadcast %cst_9 : f32 to vector<8x128xf32>
    %18 = arith.addf %17, %16 : vector<8x128xf32>
    %19 = arith.divf %17, %18 : vector<8x128xf32>
    %20 = vector.extract_strided_slice %8 {offsets = [0, 128], sizes = [8, 128], strides = [1, 1]} : vector<8x384xf32> to vector<8x128xf32>
    %21 = vector.extract_strided_slice %11 {offsets = [0, 128], sizes = [8, 128], strides = [1, 1]} : vector<8x384xf32> to vector<8x128xf32>
    %22 = arith.addf %20, %21 : vector<8x128xf32>
    %23 = arith.negf %22 : vector<8x128xf32>
    %24 = math.exp %23 : vector<8x128xf32>
    %cst_10 = arith.constant 1.000000e+00 : f32
    %25 = vector.broadcast %cst_10 : f32 to vector<8x128xf32>
    %26 = arith.addf %25, %24 : vector<8x128xf32>
    %27 = arith.divf %25, %26 : vector<8x128xf32>
    %28 = vector.extract_strided_slice %8 {offsets = [0, 256], sizes = [8, 128], strides = [1, 1]} : vector<8x384xf32> to vector<8x128xf32>
    %29 = vector.extract_strided_slice %11 {offsets = [0, 256], sizes = [8, 128], strides = [1, 1]} : vector<8x384xf32> to vector<8x128xf32>
    %30 = arith.mulf %19, %29 : vector<8x128xf32>
    %31 = arith.addf %28, %30 : vector<8x128xf32>
    %32 = math.tanh %31 : vector<8x128xf32>
    %cst_11 = arith.constant 1.000000e+00 : f32
    %33 = vector.broadcast %cst_11 : f32 to vector<8x128xf32>
    %34 = arith.subf %33, %27 : vector<8x128xf32>
    %35 = arith.mulf %34, %32 : vector<8x128xf32>
    %36 = arith.mulf %27, %5 : vector<8x128xf32>
    %37 = arith.addf %35, %36 : vector<8x128xf32>
    %c1_i32 = arith.constant 1 : i32
    %38 = arith.index_cast %c1_i32 : i32 to index
    %c0_12 = arith.constant 0 : index
    %c0_13 = arith.constant 0 : index
    %39 = vector.load %arg2[%38, %c0_12, %c0_13] : memref<8x8x384xf32, #tpu.memory_space<vmem>>, vector<1x8x384xf32>
    %40 = vector.shape_cast %39 : vector<1x8x384xf32> to vector<8x384xf32>
    %cst_14 = arith.constant dense<0.000000e+00> : vector<8x384xf32>
    %41 = tpu.matmul %37, %3, %cst_14 {dimension_numbers = #tpu.dot_dimension_numbers<[1], [0], [0], [1], [0, 0, 1, 1], [], []>} : vector<8x128xf32>, vector<128x384xf32>, vector<8x384xf32> -> vector<8x384xf32>
    %42 = vector.broadcast %4 : vector<1x384xf32> to vector<8x384xf32>
    %43 = arith.addf %41, %42 : vector<8x384xf32>
    %44 = vector.extract_strided_slice %40 {offsets = [0, 0], sizes = [8, 128], strides = [1, 1]} : vector<8x384xf32> to vector<8x128xf32>
    %45 = vector.extract_strided_slice %43 {offsets = [0, 0], sizes = [8, 128], strides = [1, 1]} : vector<8x384xf32> to vector<8x128xf32>
    %46 = arith.addf %44, %45 : vector<8x128xf32>
    %47 = arith.negf %46 : vector<8x128xf32>
    %48 = math.exp %47 : vector<8x128xf32>
    %cst_15 = arith.constant 1.000000e+00 : f32
    %49 = vector.broadcast %cst_15 : f32 to vector<8x128xf32>
    %50 = arith.addf %49, %48 : vector<8x128xf32>
    %51 = arith.divf %49, %50 : vector<8x128xf32>
    %52 = vector.extract_strided_slice %40 {offsets = [0, 128], sizes = [8, 128], strides = [1, 1]} : vector<8x384xf32> to vector<8x128xf32>
    %53 = vector.extract_strided_slice %43 {offsets = [0, 128], sizes = [8, 128], strides = [1, 1]} : vector<8x384xf32> to vector<8x128xf32>
    %54 = arith.addf %52, %53 : vector<8x128xf32>
    %55 = arith.negf %54 : vector<8x128xf32>
    %56 = math.exp %55 : vector<8x128xf32>
    %cst_16 = arith.constant 1.000000e+00 : f32
    %57 = vector.broadcast %cst_16 : f32 to vector<8x128xf32>
    %58 = arith.addf %57, %56 : vector<8x128xf32>
    %59 = arith.divf %57, %58 : vector<8x128xf32>
    %60 = vector.extract_strided_slice %40 {offsets = [0, 256], sizes = [8, 128], strides = [1, 1]} : vector<8x384xf32> to vector<8x128xf32>
    %61 = vector.extract_strided_slice %43 {offsets = [0, 256], sizes = [8, 128], strides = [1, 1]} : vector<8x384xf32> to vector<8x128xf32>
    %62 = arith.mulf %51, %61 : vector<8x128xf32>
    %63 = arith.addf %60, %62 : vector<8x128xf32>
    %64 = math.tanh %63 : vector<8x128xf32>
    %cst_17 = arith.constant 1.000000e+00 : f32
    %65 = vector.broadcast %cst_17 : f32 to vector<8x128xf32>
    %66 = arith.subf %65, %59 : vector<8x128xf32>
    %67 = arith.mulf %66, %64 : vector<8x128xf32>
    %68 = arith.mulf %59, %37 : vector<8x128xf32>
    %69 = arith.addf %67, %68 : vector<8x128xf32>
    %c2_i32 = arith.constant 2 : i32
    %70 = arith.index_cast %c2_i32 : i32 to index
    %c0_18 = arith.constant 0 : index
    %c0_19 = arith.constant 0 : index
    %71 = vector.load %arg2[%70, %c0_18, %c0_19] : memref<8x8x384xf32, #tpu.memory_space<vmem>>, vector<1x8x384xf32>
    %72 = vector.shape_cast %71 : vector<1x8x384xf32> to vector<8x384xf32>
    %cst_20 = arith.constant dense<0.000000e+00> : vector<8x384xf32>
    %73 = tpu.matmul %69, %3, %cst_20 {dimension_numbers = #tpu.dot_dimension_numbers<[1], [0], [0], [1], [0, 0, 1, 1], [], []>} : vector<8x128xf32>, vector<128x384xf32>, vector<8x384xf32> -> vector<8x384xf32>
    %74 = vector.broadcast %4 : vector<1x384xf32> to vector<8x384xf32>
    %75 = arith.addf %73, %74 : vector<8x384xf32>
    %76 = vector.extract_strided_slice %72 {offsets = [0, 0], sizes = [8, 128], strides = [1, 1]} : vector<8x384xf32> to vector<8x128xf32>
    %77 = vector.extract_strided_slice %75 {offsets = [0, 0], sizes = [8, 128], strides = [1, 1]} : vector<8x384xf32> to vector<8x128xf32>
    %78 = arith.addf %76, %77 : vector<8x128xf32>
    %79 = arith.negf %78 : vector<8x128xf32>
    %80 = math.exp %79 : vector<8x128xf32>
    %cst_21 = arith.constant 1.000000e+00 : f32
    %81 = vector.broadcast %cst_21 : f32 to vector<8x128xf32>
    %82 = arith.addf %81, %80 : vector<8x128xf32>
    %83 = arith.divf %81, %82 : vector<8x128xf32>
    %84 = vector.extract_strided_slice %72 {offsets = [0, 128], sizes = [8, 128], strides = [1, 1]} : vector<8x384xf32> to vector<8x128xf32>
    %85 = vector.extract_strided_slice %75 {offsets = [0, 128], sizes = [8, 128], strides = [1, 1]} : vector<8x384xf32> to vector<8x128xf32>
    %86 = arith.addf %84, %85 : vector<8x128xf32>
    %87 = arith.negf %86 : vector<8x128xf32>
    %88 = math.exp %87 : vector<8x128xf32>
    %cst_22 = arith.constant 1.000000e+00 : f32
    %89 = vector.broadcast %cst_22 : f32 to vector<8x128xf32>
    %90 = arith.addf %89, %88 : vector<8x128xf32>
    %91 = arith.divf %89, %90 : vector<8x128xf32>
    %92 = vector.extract_strided_slice %72 {offsets = [0, 256], sizes = [8, 128], strides = [1, 1]} : vector<8x384xf32> to vector<8x128xf32>
    %93 = vector.extract_strided_slice %75 {offsets = [0, 256], sizes = [8, 128], strides = [1, 1]} : vector<8x384xf32> to vector<8x128xf32>
    %94 = arith.mulf %83, %93 : vector<8x128xf32>
    %95 = arith.addf %92, %94 : vector<8x128xf32>
    %96 = math.tanh %95 : vector<8x128xf32>
    %cst_23 = arith.constant 1.000000e+00 : f32
    %97 = vector.broadcast %cst_23 : f32 to vector<8x128xf32>
    %98 = arith.subf %97, %91 : vector<8x128xf32>
    %99 = arith.mulf %98, %96 : vector<8x128xf32>
    %100 = arith.mulf %91, %69 : vector<8x128xf32>
    %101 = arith.addf %99, %100 : vector<8x128xf32>
    %c3_i32 = arith.constant 3 : i32
    %102 = arith.index_cast %c3_i32 : i32 to index
    %c0_24 = arith.constant 0 : index
    %c0_25 = arith.constant 0 : index
    %103 = vector.load %arg2[%102, %c0_24, %c0_25] : memref<8x8x384xf32, #tpu.memory_space<vmem>>, vector<1x8x384xf32>
    %104 = vector.shape_cast %103 : vector<1x8x384xf32> to vector<8x384xf32>
    %cst_26 = arith.constant dense<0.000000e+00> : vector<8x384xf32>
    %105 = tpu.matmul %101, %3, %cst_26 {dimension_numbers = #tpu.dot_dimension_numbers<[1], [0], [0], [1], [0, 0, 1, 1], [], []>} : vector<8x128xf32>, vector<128x384xf32>, vector<8x384xf32> -> vector<8x384xf32>
    %106 = vector.broadcast %4 : vector<1x384xf32> to vector<8x384xf32>
    %107 = arith.addf %105, %106 : vector<8x384xf32>
    %108 = vector.extract_strided_slice %104 {offsets = [0, 0], sizes = [8, 128], strides = [1, 1]} : vector<8x384xf32> to vector<8x128xf32>
    %109 = vector.extract_strided_slice %107 {offsets = [0, 0], sizes = [8, 128], strides = [1, 1]} : vector<8x384xf32> to vector<8x128xf32>
    %110 = arith.addf %108, %109 : vector<8x128xf32>
    %111 = arith.negf %110 : vector<8x128xf32>
    %112 = math.exp %111 : vector<8x128xf32>
    %cst_27 = arith.constant 1.000000e+00 : f32
    %113 = vector.broadcast %cst_27 : f32 to vector<8x128xf32>
    %114 = arith.addf %113, %112 : vector<8x128xf32>
    %115 = arith.divf %113, %114 : vector<8x128xf32>
    %116 = vector.extract_strided_slice %104 {offsets = [0, 128], sizes = [8, 128], strides = [1, 1]} : vector<8x384xf32> to vector<8x128xf32>
    %117 = vector.extract_strided_slice %107 {offsets = [0, 128], sizes = [8, 128], strides = [1, 1]} : vector<8x384xf32> to vector<8x128xf32>
    %118 = arith.addf %116, %117 : vector<8x128xf32>
    %119 = arith.negf %118 : vector<8x128xf32>
    %120 = math.exp %119 : vector<8x128xf32>
    %cst_28 = arith.constant 1.000000e+00 : f32
    %121 = vector.broadcast %cst_28 : f32 to vector<8x128xf32>
    %122 = arith.addf %121, %120 : vector<8x128xf32>
    %123 = arith.divf %121, %122 : vector<8x128xf32>
    %124 = vector.extract_strided_slice %104 {offsets = [0, 256], sizes = [8, 128], strides = [1, 1]} : vector<8x384xf32> to vector<8x128xf32>
    %125 = vector.extract_strided_slice %107 {offsets = [0, 256], sizes = [8, 128], strides = [1, 1]} : vector<8x384xf32> to vector<8x128xf32>
    %126 = arith.mulf %115, %125 : vector<8x128xf32>
    %127 = arith.addf %124, %126 : vector<8x128xf32>
    %128 = math.tanh %127 : vector<8x128xf32>
    %cst_29 = arith.constant 1.000000e+00 : f32
    %129 = vector.broadcast %cst_29 : f32 to vector<8x128xf32>
    %130 = arith.subf %129, %123 : vector<8x128xf32>
    %131 = arith.mulf %130, %128 : vector<8x128xf32>
    %132 = arith.mulf %123, %101 : vector<8x128xf32>
    %133 = arith.addf %131, %132 : vector<8x128xf32>
    %c4_i32 = arith.constant 4 : i32
    %134 = arith.index_cast %c4_i32 : i32 to index
    %c0_30 = arith.constant 0 : index
    %c0_31 = arith.constant 0 : index
    %135 = vector.load %arg2[%134, %c0_30, %c0_31] : memref<8x8x384xf32, #tpu.memory_space<vmem>>, vector<1x8x384xf32>
    %136 = vector.shape_cast %135 : vector<1x8x384xf32> to vector<8x384xf32>
    %cst_32 = arith.constant dense<0.000000e+00> : vector<8x384xf32>
    %137 = tpu.matmul %133, %3, %cst_32 {dimension_numbers = #tpu.dot_dimension_numbers<[1], [0], [0], [1], [0, 0, 1, 1], [], []>} : vector<8x128xf32>, vector<128x384xf32>, vector<8x384xf32> -> vector<8x384xf32>
    %138 = vector.broadcast %4 : vector<1x384xf32> to vector<8x384xf32>
    %139 = arith.addf %137, %138 : vector<8x384xf32>
    %140 = vector.extract_strided_slice %136 {offsets = [0, 0], sizes = [8, 128], strides = [1, 1]} : vector<8x384xf32> to vector<8x128xf32>
    %141 = vector.extract_strided_slice %139 {offsets = [0, 0], sizes = [8, 128], strides = [1, 1]} : vector<8x384xf32> to vector<8x128xf32>
    %142 = arith.addf %140, %141 : vector<8x128xf32>
    %143 = arith.negf %142 : vector<8x128xf32>
    %144 = math.exp %143 : vector<8x128xf32>
    %cst_33 = arith.constant 1.000000e+00 : f32
    %145 = vector.broadcast %cst_33 : f32 to vector<8x128xf32>
    %146 = arith.addf %145, %144 : vector<8x128xf32>
    %147 = arith.divf %145, %146 : vector<8x128xf32>
    %148 = vector.extract_strided_slice %136 {offsets = [0, 128], sizes = [8, 128], strides = [1, 1]} : vector<8x384xf32> to vector<8x128xf32>
    %149 = vector.extract_strided_slice %139 {offsets = [0, 128], sizes = [8, 128], strides = [1, 1]} : vector<8x384xf32> to vector<8x128xf32>
    %150 = arith.addf %148, %149 : vector<8x128xf32>
    %151 = arith.negf %150 : vector<8x128xf32>
    %152 = math.exp %151 : vector<8x128xf32>
    %cst_34 = arith.constant 1.000000e+00 : f32
    %153 = vector.broadcast %cst_34 : f32 to vector<8x128xf32>
    %154 = arith.addf %153, %152 : vector<8x128xf32>
    %155 = arith.divf %153, %154 : vector<8x128xf32>
    %156 = vector.extract_strided_slice %136 {offsets = [0, 256], sizes = [8, 128], strides = [1, 1]} : vector<8x384xf32> to vector<8x128xf32>
    %157 = vector.extract_strided_slice %139 {offsets = [0, 256], sizes = [8, 128], strides = [1, 1]} : vector<8x384xf32> to vector<8x128xf32>
    %158 = arith.mulf %147, %157 : vector<8x128xf32>
    %159 = arith.addf %156, %158 : vector<8x128xf32>
    %160 = math.tanh %159 : vector<8x128xf32>
    %cst_35 = arith.constant 1.000000e+00 : f32
    %161 = vector.broadcast %cst_35 : f32 to vector<8x128xf32>
    %162 = arith.subf %161, %155 : vector<8x128xf32>
    %163 = arith.mulf %162, %160 : vector<8x128xf32>
    %164 = arith.mulf %155, %133 : vector<8x128xf32>
    %165 = arith.addf %163, %164 : vector<8x128xf32>
    %c5_i32 = arith.constant 5 : i32
    %166 = arith.index_cast %c5_i32 : i32 to index
    %c0_36 = arith.constant 0 : index
    %c0_37 = arith.constant 0 : index
    %167 = vector.load %arg2[%166, %c0_36, %c0_37] : memref<8x8x384xf32, #tpu.memory_space<vmem>>, vector<1x8x384xf32>
    %168 = vector.shape_cast %167 : vector<1x8x384xf32> to vector<8x384xf32>
    %cst_38 = arith.constant dense<0.000000e+00> : vector<8x384xf32>
    %169 = tpu.matmul %165, %3, %cst_38 {dimension_numbers = #tpu.dot_dimension_numbers<[1], [0], [0], [1], [0, 0, 1, 1], [], []>} : vector<8x128xf32>, vector<128x384xf32>, vector<8x384xf32> -> vector<8x384xf32>
    %170 = vector.broadcast %4 : vector<1x384xf32> to vector<8x384xf32>
    %171 = arith.addf %169, %170 : vector<8x384xf32>
    %172 = vector.extract_strided_slice %168 {offsets = [0, 0], sizes = [8, 128], strides = [1, 1]} : vector<8x384xf32> to vector<8x128xf32>
    %173 = vector.extract_strided_slice %171 {offsets = [0, 0], sizes = [8, 128], strides = [1, 1]} : vector<8x384xf32> to vector<8x128xf32>
    %174 = arith.addf %172, %173 : vector<8x128xf32>
    %175 = arith.negf %174 : vector<8x128xf32>
    %176 = math.exp %175 : vector<8x128xf32>
    %cst_39 = arith.constant 1.000000e+00 : f32
    %177 = vector.broadcast %cst_39 : f32 to vector<8x128xf32>
    %178 = arith.addf %177, %176 : vector<8x128xf32>
    %179 = arith.divf %177, %178 : vector<8x128xf32>
    %180 = vector.extract_strided_slice %168 {offsets = [0, 128], sizes = [8, 128], strides = [1, 1]} : vector<8x384xf32> to vector<8x128xf32>
    %181 = vector.extract_strided_slice %171 {offsets = [0, 128], sizes = [8, 128], strides = [1, 1]} : vector<8x384xf32> to vector<8x128xf32>
    %182 = arith.addf %180, %181 : vector<8x128xf32>
    %183 = arith.negf %182 : vector<8x128xf32>
    %184 = math.exp %183 : vector<8x128xf32>
    %cst_40 = arith.constant 1.000000e+00 : f32
    %185 = vector.broadcast %cst_40 : f32 to vector<8x128xf32>
    %186 = arith.addf %185, %184 : vector<8x128xf32>
    %187 = arith.divf %185, %186 : vector<8x128xf32>
    %188 = vector.extract_strided_slice %168 {offsets = [0, 256], sizes = [8, 128], strides = [1, 1]} : vector<8x384xf32> to vector<8x128xf32>
    %189 = vector.extract_strided_slice %171 {offsets = [0, 256], sizes = [8, 128], strides = [1, 1]} : vector<8x384xf32> to vector<8x128xf32>
    %190 = arith.mulf %179, %189 : vector<8x128xf32>
    %191 = arith.addf %188, %190 : vector<8x128xf32>
    %192 = math.tanh %191 : vector<8x128xf32>
    %cst_41 = arith.constant 1.000000e+00 : f32
    %193 = vector.broadcast %cst_41 : f32 to vector<8x128xf32>
    %194 = arith.subf %193, %187 : vector<8x128xf32>
    %195 = arith.mulf %194, %192 : vector<8x128xf32>
    %196 = arith.mulf %187, %165 : vector<8x128xf32>
    %197 = arith.addf %195, %196 : vector<8x128xf32>
    %c6_i32 = arith.constant 6 : i32
    %198 = arith.index_cast %c6_i32 : i32 to index
    %c0_42 = arith.constant 0 : index
    %c0_43 = arith.constant 0 : index
    %199 = vector.load %arg2[%198, %c0_42, %c0_43] : memref<8x8x384xf32, #tpu.memory_space<vmem>>, vector<1x8x384xf32>
    %200 = vector.shape_cast %199 : vector<1x8x384xf32> to vector<8x384xf32>
    %cst_44 = arith.constant dense<0.000000e+00> : vector<8x384xf32>
    %201 = tpu.matmul %197, %3, %cst_44 {dimension_numbers = #tpu.dot_dimension_numbers<[1], [0], [0], [1], [0, 0, 1, 1], [], []>} : vector<8x128xf32>, vector<128x384xf32>, vector<8x384xf32> -> vector<8x384xf32>
    %202 = vector.broadcast %4 : vector<1x384xf32> to vector<8x384xf32>
    %203 = arith.addf %201, %202 : vector<8x384xf32>
    %204 = vector.extract_strided_slice %200 {offsets = [0, 0], sizes = [8, 128], strides = [1, 1]} : vector<8x384xf32> to vector<8x128xf32>
    %205 = vector.extract_strided_slice %203 {offsets = [0, 0], sizes = [8, 128], strides = [1, 1]} : vector<8x384xf32> to vector<8x128xf32>
    %206 = arith.addf %204, %205 : vector<8x128xf32>
    %207 = arith.negf %206 : vector<8x128xf32>
    %208 = math.exp %207 : vector<8x128xf32>
    %cst_45 = arith.constant 1.000000e+00 : f32
    %209 = vector.broadcast %cst_45 : f32 to vector<8x128xf32>
    %210 = arith.addf %209, %208 : vector<8x128xf32>
    %211 = arith.divf %209, %210 : vector<8x128xf32>
    %212 = vector.extract_strided_slice %200 {offsets = [0, 128], sizes = [8, 128], strides = [1, 1]} : vector<8x384xf32> to vector<8x128xf32>
    %213 = vector.extract_strided_slice %203 {offsets = [0, 128], sizes = [8, 128], strides = [1, 1]} : vector<8x384xf32> to vector<8x128xf32>
    %214 = arith.addf %212, %213 : vector<8x128xf32>
    %215 = arith.negf %214 : vector<8x128xf32>
    %216 = math.exp %215 : vector<8x128xf32>
    %cst_46 = arith.constant 1.000000e+00 : f32
    %217 = vector.broadcast %cst_46 : f32 to vector<8x128xf32>
    %218 = arith.addf %217, %216 : vector<8x128xf32>
    %219 = arith.divf %217, %218 : vector<8x128xf32>
    %220 = vector.extract_strided_slice %200 {offsets = [0, 256], sizes = [8, 128], strides = [1, 1]} : vector<8x384xf32> to vector<8x128xf32>
    %221 = vector.extract_strided_slice %203 {offsets = [0, 256], sizes = [8, 128], strides = [1, 1]} : vector<8x384xf32> to vector<8x128xf32>
    %222 = arith.mulf %211, %221 : vector<8x128xf32>
    %223 = arith.addf %220, %222 : vector<8x128xf32>
    %224 = math.tanh %223 : vector<8x128xf32>
    %cst_47 = arith.constant 1.000000e+00 : f32
    %225 = vector.broadcast %cst_47 : f32 to vector<8x128xf32>
    %226 = arith.subf %225, %219 : vector<8x128xf32>
    %227 = arith.mulf %226, %224 : vector<8x128xf32>
    %228 = arith.mulf %219, %197 : vector<8x128xf32>
    %229 = arith.addf %227, %228 : vector<8x128xf32>
    %c7_i32 = arith.constant 7 : i32
    %230 = arith.index_cast %c7_i32 : i32 to index
    %c0_48 = arith.constant 0 : index
    %c0_49 = arith.constant 0 : index
    %231 = vector.load %arg2[%230, %c0_48, %c0_49] : memref<8x8x384xf32, #tpu.memory_space<vmem>>, vector<1x8x384xf32>
    %232 = vector.shape_cast %231 : vector<1x8x384xf32> to vector<8x384xf32>
    %cst_50 = arith.constant dense<0.000000e+00> : vector<8x384xf32>
    %233 = tpu.matmul %229, %3, %cst_50 {dimension_numbers = #tpu.dot_dimension_numbers<[1], [0], [0], [1], [0, 0, 1, 1], [], []>} : vector<8x128xf32>, vector<128x384xf32>, vector<8x384xf32> -> vector<8x384xf32>
    %234 = vector.broadcast %4 : vector<1x384xf32> to vector<8x384xf32>
    %235 = arith.addf %233, %234 : vector<8x384xf32>
    %236 = vector.extract_strided_slice %232 {offsets = [0, 0], sizes = [8, 128], strides = [1, 1]} : vector<8x384xf32> to vector<8x128xf32>
    %237 = vector.extract_strided_slice %235 {offsets = [0, 0], sizes = [8, 128], strides = [1, 1]} : vector<8x384xf32> to vector<8x128xf32>
    %238 = arith.addf %236, %237 : vector<8x128xf32>
    %239 = arith.negf %238 : vector<8x128xf32>
    %240 = math.exp %239 : vector<8x128xf32>
    %cst_51 = arith.constant 1.000000e+00 : f32
    %241 = vector.broadcast %cst_51 : f32 to vector<8x128xf32>
    %242 = arith.addf %241, %240 : vector<8x128xf32>
    %243 = arith.divf %241, %242 : vector<8x128xf32>
    %244 = vector.extract_strided_slice %232 {offsets = [0, 128], sizes = [8, 128], strides = [1, 1]} : vector<8x384xf32> to vector<8x128xf32>
    %245 = vector.extract_strided_slice %235 {offsets = [0, 128], sizes = [8, 128], strides = [1, 1]} : vector<8x384xf32> to vector<8x128xf32>
    %246 = arith.addf %244, %245 : vector<8x128xf32>
    %247 = arith.negf %246 : vector<8x128xf32>
    %248 = math.exp %247 : vector<8x128xf32>
    %cst_52 = arith.constant 1.000000e+00 : f32
    %249 = vector.broadcast %cst_52 : f32 to vector<8x128xf32>
    %250 = arith.addf %249, %248 : vector<8x128xf32>
    %251 = arith.divf %249, %250 : vector<8x128xf32>
    %252 = vector.extract_strided_slice %232 {offsets = [0, 256], sizes = [8, 128], strides = [1, 1]} : vector<8x384xf32> to vector<8x128xf32>
    %253 = vector.extract_strided_slice %235 {offsets = [0, 256], sizes = [8, 128], strides = [1, 1]} : vector<8x384xf32> to vector<8x128xf32>
    %254 = arith.mulf %243, %253 : vector<8x128xf32>
    %255 = arith.addf %252, %254 : vector<8x128xf32>
    %256 = math.tanh %255 : vector<8x128xf32>
    %cst_53 = arith.constant 1.000000e+00 : f32
    %257 = vector.broadcast %cst_53 : f32 to vector<8x128xf32>
    %258 = arith.subf %257, %251 : vector<8x128xf32>
    %259 = arith.mulf %258, %256 : vector<8x128xf32>
    %260 = arith.mulf %251, %229 : vector<8x128xf32>
    %261 = arith.addf %259, %260 : vector<8x128xf32>
    %c8_i32 = arith.constant 8 : i32
    %c0_54 = arith.constant 0 : index
    %c0_55 = arith.constant 0 : index
    %262 = vector.load %arg7[%c0_54, %c0_55] : memref<8x128xf32, #tpu.memory_space<vmem>>, vector<8x128xf32>
    tpu.vector_store %arg7[%c0_54, %c0_55], %261 {strides = array<i32>} : memref<8x128xf32, #tpu.memory_space<vmem>>, vector<8x128xf32>,
    %c0_i32_56 = arith.constant 0 : i32
    %263 = arith.cmpi eq, %arg1, %c0_i32_56 : i32
    %264 = arith.extui %263 : i1 to i32
    %c0_i32_57 = arith.constant 0 : i32
    %265 = arith.cmpi ne, %264, %c0_i32_57 : i32
    scf.if %265 {
      %c0_58 = arith.constant 0 : index
      %c0_59 = arith.constant 0 : index
      %266 = vector.load %arg7[%c0_58, %c0_59] : memref<8x128xf32, #tpu.memory_space<vmem>>, vector<8x128xf32>
      %c0_60 = arith.constant 0 : index
      %c0_61 = arith.constant 0 : index
      %267 = vector.load %arg6[%c0_60, %c0_61] : memref<8x128xf32, #tpu.memory_space<vmem>>, vector<8x128xf32>
      tpu.vector_store %arg6[%c0_60, %c0_61], %266 {strides = array<i32>} : memref<8x128xf32, #tpu.memory_space<vmem>>, vector<8x128xf32>,
    } else {
    }
    return
  }
  func.func @transform_0(%arg0: i32, %arg1: i32) -> (i32, i32, i32) {
    %c0_i32 = arith.constant 0 : i32
    %c0_i32_0 = arith.constant 0 : i32
    return %arg1, %arg0, %c0_i32 : i32, i32, i32
  }
  func.func @transform_1(%arg0: i32, %arg1: i32) -> (i32, i32) {
    %c0_i32 = arith.constant 0 : i32
    %c0_i32_0 = arith.constant 0 : i32
    %c0_i32_1 = arith.constant 0 : i32
    return %c0_i32, %c0_i32_0 : i32, i32
  }
  func.func @transform_2(%arg0: i32, %arg1: i32) -> (i32, i32) {
    %c0_i32 = arith.constant 0 : i32
    %c0_i32_0 = arith.constant 0 : i32
    %c0_i32_1 = arith.constant 0 : i32
    return %c0_i32, %c0_i32_0 : i32, i32
  }
  func.func @transform_3(%arg0: i32, %arg1: i32) -> (i32, i32) {
    %c0_i32 = arith.constant 0 : i32
    %c0_i32_0 = arith.constant 0 : i32
    return %arg0, %c0_i32 : i32, i32
  }
  func.func @transform_4(%arg0: i32, %arg1: i32) -> (i32, i32) {
    %c0_i32 = arith.constant 0 : i32
    %c0_i32_0 = arith.constant 0 : i32
    return %arg0, %c0_i32 : i32, i32
  }
}

module attributes {stable_mosaic.version = 11 : i64} {
  func.func @_gru_all_kernel(%arg0: i32, %arg1: i32, %arg2: memref<8x8x384xf32, #tpu.memory_space<vmem>>, %arg3: memref<128x384xf32, #tpu.memory_space<vmem>>, %arg4: memref<1x384xf32, #tpu.memory_space<vmem>>, %arg5: memref<8x128xf32, #tpu.memory_space<vmem>>, %arg6: memref<8x8x128xf32, #tpu.memory_space<vmem>>, %arg7: memref<8x128xf32, #tpu.memory_space<vmem>>) attributes {dimension_semantics = [#tpu.dimension_semantics<parallel>, #tpu.dimension_semantics<arbitrary>], iteration_bounds = array<i64: 1, 1>, scalar_prefetch = 0 : i64, scratch_operands = 1 : i64, tpu.core_type = #tpu.core_type<tc>, window_params = [{transform_indices = @transform_0, window_bounds = array<i64: 8, 8, 384>}, {pipeline_mode = #tpu.pipeline_mode<synchronous>, transform_indices = @transform_1, window_bounds = array<i64: 128, 384>}, {pipeline_mode = #tpu.pipeline_mode<synchronous>, transform_indices = @transform_2, window_bounds = array<i64: 1, 384>}, {transform_indices = @transform_3, window_bounds = array<i64: 8, 128>}, {transform_indices = @transform_4, window_bounds = array<i64: 8, 8, 128>}]} {
    %c0_i32 = arith.constant 0 : i32
    %0 = arith.cmpi eq, %arg1, %c0_i32 : i32
    %1 = arith.extui %0 : i1 to i32
    %c0_i32_0 = arith.constant 0 : i32
    %2 = arith.cmpi ne, %1, %c0_i32_0 : i32
    scf.if %2 {
      %c0_72 = arith.constant 0 : index
      %c0_73 = arith.constant 0 : index
      %295 = vector.load %arg5[%c0_72, %c0_73] : memref<8x128xf32, #tpu.memory_space<vmem>>, vector<8x128xf32>
      %c0_74 = arith.constant 0 : index
      %c0_75 = arith.constant 0 : index
      %296 = vector.load %arg7[%c0_74, %c0_75] : memref<8x128xf32, #tpu.memory_space<vmem>>, vector<8x128xf32>
      tpu.vector_store %arg7[%c0_74, %c0_75], %295 {strides = array<i32>} : memref<8x128xf32, #tpu.memory_space<vmem>>, vector<8x128xf32>,
    } else {
    }
    %c0 = arith.constant 0 : index
    %c0_1 = arith.constant 0 : index
    %3 = vector.load %arg3[%c0, %c0_1] : memref<128x384xf32, #tpu.memory_space<vmem>>, vector<128x384xf32>
    %c0_2 = arith.constant 0 : index
    %c0_3 = arith.constant 0 : index
    %4 = vector.load %arg4[%c0_2, %c0_3] : memref<1x384xf32, #tpu.memory_space<vmem>>, vector<1x384xf32>
    %c0_4 = arith.constant 0 : index
    %c0_5 = arith.constant 0 : index
    %5 = vector.load %arg7[%c0_4, %c0_5] : memref<8x128xf32, #tpu.memory_space<vmem>>, vector<8x128xf32>
    %c0_i32_6 = arith.constant 0 : i32
    %6 = arith.index_cast %c0_i32_6 : i32 to index
    %c0_7 = arith.constant 0 : index
    %c0_8 = arith.constant 0 : index
    %7 = vector.load %arg2[%6, %c0_7, %c0_8] : memref<8x8x384xf32, #tpu.memory_space<vmem>>, vector<1x8x384xf32>
    %8 = vector.shape_cast %7 : vector<1x8x384xf32> to vector<8x384xf32>
    %cst = arith.constant dense<0.000000e+00> : vector<8x384xf32>
    %9 = tpu.matmul %5, %3, %cst {dimension_numbers = #tpu.dot_dimension_numbers<[1], [0], [0], [1], [0, 0, 1, 1], [], []>} : vector<8x128xf32>, vector<128x384xf32>, vector<8x384xf32> -> vector<8x384xf32>
    %10 = vector.broadcast %4 : vector<1x384xf32> to vector<8x384xf32>
    %11 = arith.addf %9, %10 : vector<8x384xf32>
    %12 = vector.extract_strided_slice %8 {offsets = [0, 0], sizes = [8, 128], strides = [1, 1]} : vector<8x384xf32> to vector<8x128xf32>
    %13 = vector.extract_strided_slice %11 {offsets = [0, 0], sizes = [8, 128], strides = [1, 1]} : vector<8x384xf32> to vector<8x128xf32>
    %14 = arith.addf %12, %13 : vector<8x128xf32>
    %15 = arith.negf %14 : vector<8x128xf32>
    %16 = math.exp %15 : vector<8x128xf32>
    %cst_9 = arith.constant 1.000000e+00 : f32
    %17 = vector.broadcast %cst_9 : f32 to vector<8x128xf32>
    %18 = arith.addf %17, %16 : vector<8x128xf32>
    %19 = arith.divf %17, %18 : vector<8x128xf32>
    %20 = vector.extract_strided_slice %8 {offsets = [0, 128], sizes = [8, 128], strides = [1, 1]} : vector<8x384xf32> to vector<8x128xf32>
    %21 = vector.extract_strided_slice %11 {offsets = [0, 128], sizes = [8, 128], strides = [1, 1]} : vector<8x384xf32> to vector<8x128xf32>
    %22 = arith.addf %20, %21 : vector<8x128xf32>
    %23 = arith.negf %22 : vector<8x128xf32>
    %24 = math.exp %23 : vector<8x128xf32>
    %cst_10 = arith.constant 1.000000e+00 : f32
    %25 = vector.broadcast %cst_10 : f32 to vector<8x128xf32>
    %26 = arith.addf %25, %24 : vector<8x128xf32>
    %27 = arith.divf %25, %26 : vector<8x128xf32>
    %28 = vector.extract_strided_slice %8 {offsets = [0, 256], sizes = [8, 128], strides = [1, 1]} : vector<8x384xf32> to vector<8x128xf32>
    %29 = vector.extract_strided_slice %11 {offsets = [0, 256], sizes = [8, 128], strides = [1, 1]} : vector<8x384xf32> to vector<8x128xf32>
    %30 = arith.mulf %19, %29 : vector<8x128xf32>
    %31 = arith.addf %28, %30 : vector<8x128xf32>
    %32 = math.tanh %31 : vector<8x128xf32>
    %cst_11 = arith.constant 1.000000e+00 : f32
    %33 = vector.broadcast %cst_11 : f32 to vector<8x128xf32>
    %34 = arith.subf %33, %27 : vector<8x128xf32>
    %35 = arith.mulf %34, %32 : vector<8x128xf32>
    %36 = arith.mulf %27, %5 : vector<8x128xf32>
    %37 = arith.addf %35, %36 : vector<8x128xf32>
    %38 = arith.index_cast %c0_i32_6 : i32 to index
    %c0_12 = arith.constant 0 : index
    %c0_13 = arith.constant 0 : index
    %39 = vector.load %arg6[%38, %c0_12, %c0_13] : memref<8x8x128xf32, #tpu.memory_space<vmem>>, vector<1x8x128xf32>
    %40 = vector.shape_cast %39 : vector<1x8x128xf32> to vector<8x128xf32>
    %41 = vector.shape_cast %37 : vector<8x128xf32> to vector<1x8x128xf32>
    tpu.vector_store %arg6[%38, %c0_12, %c0_13], %41 {strides = array<i32>} : memref<8x8x128xf32, #tpu.memory_space<vmem>>, vector<1x8x128xf32>,
    %c1_i32 = arith.constant 1 : i32
    %42 = arith.index_cast %c1_i32 : i32 to index
    %c0_14 = arith.constant 0 : index
    %c0_15 = arith.constant 0 : index
    %43 = vector.load %arg2[%42, %c0_14, %c0_15] : memref<8x8x384xf32, #tpu.memory_space<vmem>>, vector<1x8x384xf32>
    %44 = vector.shape_cast %43 : vector<1x8x384xf32> to vector<8x384xf32>
    %cst_16 = arith.constant dense<0.000000e+00> : vector<8x384xf32>
    %45 = tpu.matmul %37, %3, %cst_16 {dimension_numbers = #tpu.dot_dimension_numbers<[1], [0], [0], [1], [0, 0, 1, 1], [], []>} : vector<8x128xf32>, vector<128x384xf32>, vector<8x384xf32> -> vector<8x384xf32>
    %46 = vector.broadcast %4 : vector<1x384xf32> to vector<8x384xf32>
    %47 = arith.addf %45, %46 : vector<8x384xf32>
    %48 = vector.extract_strided_slice %44 {offsets = [0, 0], sizes = [8, 128], strides = [1, 1]} : vector<8x384xf32> to vector<8x128xf32>
    %49 = vector.extract_strided_slice %47 {offsets = [0, 0], sizes = [8, 128], strides = [1, 1]} : vector<8x384xf32> to vector<8x128xf32>
    %50 = arith.addf %48, %49 : vector<8x128xf32>
    %51 = arith.negf %50 : vector<8x128xf32>
    %52 = math.exp %51 : vector<8x128xf32>
    %cst_17 = arith.constant 1.000000e+00 : f32
    %53 = vector.broadcast %cst_17 : f32 to vector<8x128xf32>
    %54 = arith.addf %53, %52 : vector<8x128xf32>
    %55 = arith.divf %53, %54 : vector<8x128xf32>
    %56 = vector.extract_strided_slice %44 {offsets = [0, 128], sizes = [8, 128], strides = [1, 1]} : vector<8x384xf32> to vector<8x128xf32>
    %57 = vector.extract_strided_slice %47 {offsets = [0, 128], sizes = [8, 128], strides = [1, 1]} : vector<8x384xf32> to vector<8x128xf32>
    %58 = arith.addf %56, %57 : vector<8x128xf32>
    %59 = arith.negf %58 : vector<8x128xf32>
    %60 = math.exp %59 : vector<8x128xf32>
    %cst_18 = arith.constant 1.000000e+00 : f32
    %61 = vector.broadcast %cst_18 : f32 to vector<8x128xf32>
    %62 = arith.addf %61, %60 : vector<8x128xf32>
    %63 = arith.divf %61, %62 : vector<8x128xf32>
    %64 = vector.extract_strided_slice %44 {offsets = [0, 256], sizes = [8, 128], strides = [1, 1]} : vector<8x384xf32> to vector<8x128xf32>
    %65 = vector.extract_strided_slice %47 {offsets = [0, 256], sizes = [8, 128], strides = [1, 1]} : vector<8x384xf32> to vector<8x128xf32>
    %66 = arith.mulf %55, %65 : vector<8x128xf32>
    %67 = arith.addf %64, %66 : vector<8x128xf32>
    %68 = math.tanh %67 : vector<8x128xf32>
    %cst_19 = arith.constant 1.000000e+00 : f32
    %69 = vector.broadcast %cst_19 : f32 to vector<8x128xf32>
    %70 = arith.subf %69, %63 : vector<8x128xf32>
    %71 = arith.mulf %70, %68 : vector<8x128xf32>
    %72 = arith.mulf %63, %37 : vector<8x128xf32>
    %73 = arith.addf %71, %72 : vector<8x128xf32>
    %74 = arith.index_cast %c1_i32 : i32 to index
    %c0_20 = arith.constant 0 : index
    %c0_21 = arith.constant 0 : index
    %75 = vector.load %arg6[%74, %c0_20, %c0_21] : memref<8x8x128xf32, #tpu.memory_space<vmem>>, vector<1x8x128xf32>
    %76 = vector.shape_cast %75 : vector<1x8x128xf32> to vector<8x128xf32>
    %77 = vector.shape_cast %73 : vector<8x128xf32> to vector<1x8x128xf32>
    tpu.vector_store %arg6[%74, %c0_20, %c0_21], %77 {strides = array<i32>} : memref<8x8x128xf32, #tpu.memory_space<vmem>>, vector<1x8x128xf32>,
    %c2_i32 = arith.constant 2 : i32
    %78 = arith.index_cast %c2_i32 : i32 to index
    %c0_22 = arith.constant 0 : index
    %c0_23 = arith.constant 0 : index
    %79 = vector.load %arg2[%78, %c0_22, %c0_23] : memref<8x8x384xf32, #tpu.memory_space<vmem>>, vector<1x8x384xf32>
    %80 = vector.shape_cast %79 : vector<1x8x384xf32> to vector<8x384xf32>
    %cst_24 = arith.constant dense<0.000000e+00> : vector<8x384xf32>
    %81 = tpu.matmul %73, %3, %cst_24 {dimension_numbers = #tpu.dot_dimension_numbers<[1], [0], [0], [1], [0, 0, 1, 1], [], []>} : vector<8x128xf32>, vector<128x384xf32>, vector<8x384xf32> -> vector<8x384xf32>
    %82 = vector.broadcast %4 : vector<1x384xf32> to vector<8x384xf32>
    %83 = arith.addf %81, %82 : vector<8x384xf32>
    %84 = vector.extract_strided_slice %80 {offsets = [0, 0], sizes = [8, 128], strides = [1, 1]} : vector<8x384xf32> to vector<8x128xf32>
    %85 = vector.extract_strided_slice %83 {offsets = [0, 0], sizes = [8, 128], strides = [1, 1]} : vector<8x384xf32> to vector<8x128xf32>
    %86 = arith.addf %84, %85 : vector<8x128xf32>
    %87 = arith.negf %86 : vector<8x128xf32>
    %88 = math.exp %87 : vector<8x128xf32>
    %cst_25 = arith.constant 1.000000e+00 : f32
    %89 = vector.broadcast %cst_25 : f32 to vector<8x128xf32>
    %90 = arith.addf %89, %88 : vector<8x128xf32>
    %91 = arith.divf %89, %90 : vector<8x128xf32>
    %92 = vector.extract_strided_slice %80 {offsets = [0, 128], sizes = [8, 128], strides = [1, 1]} : vector<8x384xf32> to vector<8x128xf32>
    %93 = vector.extract_strided_slice %83 {offsets = [0, 128], sizes = [8, 128], strides = [1, 1]} : vector<8x384xf32> to vector<8x128xf32>
    %94 = arith.addf %92, %93 : vector<8x128xf32>
    %95 = arith.negf %94 : vector<8x128xf32>
    %96 = math.exp %95 : vector<8x128xf32>
    %cst_26 = arith.constant 1.000000e+00 : f32
    %97 = vector.broadcast %cst_26 : f32 to vector<8x128xf32>
    %98 = arith.addf %97, %96 : vector<8x128xf32>
    %99 = arith.divf %97, %98 : vector<8x128xf32>
    %100 = vector.extract_strided_slice %80 {offsets = [0, 256], sizes = [8, 128], strides = [1, 1]} : vector<8x384xf32> to vector<8x128xf32>
    %101 = vector.extract_strided_slice %83 {offsets = [0, 256], sizes = [8, 128], strides = [1, 1]} : vector<8x384xf32> to vector<8x128xf32>
    %102 = arith.mulf %91, %101 : vector<8x128xf32>
    %103 = arith.addf %100, %102 : vector<8x128xf32>
    %104 = math.tanh %103 : vector<8x128xf32>
    %cst_27 = arith.constant 1.000000e+00 : f32
    %105 = vector.broadcast %cst_27 : f32 to vector<8x128xf32>
    %106 = arith.subf %105, %99 : vector<8x128xf32>
    %107 = arith.mulf %106, %104 : vector<8x128xf32>
    %108 = arith.mulf %99, %73 : vector<8x128xf32>
    %109 = arith.addf %107, %108 : vector<8x128xf32>
    %110 = arith.index_cast %c2_i32 : i32 to index
    %c0_28 = arith.constant 0 : index
    %c0_29 = arith.constant 0 : index
    %111 = vector.load %arg6[%110, %c0_28, %c0_29] : memref<8x8x128xf32, #tpu.memory_space<vmem>>, vector<1x8x128xf32>
    %112 = vector.shape_cast %111 : vector<1x8x128xf32> to vector<8x128xf32>
    %113 = vector.shape_cast %109 : vector<8x128xf32> to vector<1x8x128xf32>
    tpu.vector_store %arg6[%110, %c0_28, %c0_29], %113 {strides = array<i32>} : memref<8x8x128xf32, #tpu.memory_space<vmem>>, vector<1x8x128xf32>,
    %c3_i32 = arith.constant 3 : i32
    %114 = arith.index_cast %c3_i32 : i32 to index
    %c0_30 = arith.constant 0 : index
    %c0_31 = arith.constant 0 : index
    %115 = vector.load %arg2[%114, %c0_30, %c0_31] : memref<8x8x384xf32, #tpu.memory_space<vmem>>, vector<1x8x384xf32>
    %116 = vector.shape_cast %115 : vector<1x8x384xf32> to vector<8x384xf32>
    %cst_32 = arith.constant dense<0.000000e+00> : vector<8x384xf32>
    %117 = tpu.matmul %109, %3, %cst_32 {dimension_numbers = #tpu.dot_dimension_numbers<[1], [0], [0], [1], [0, 0, 1, 1], [], []>} : vector<8x128xf32>, vector<128x384xf32>, vector<8x384xf32> -> vector<8x384xf32>
    %118 = vector.broadcast %4 : vector<1x384xf32> to vector<8x384xf32>
    %119 = arith.addf %117, %118 : vector<8x384xf32>
    %120 = vector.extract_strided_slice %116 {offsets = [0, 0], sizes = [8, 128], strides = [1, 1]} : vector<8x384xf32> to vector<8x128xf32>
    %121 = vector.extract_strided_slice %119 {offsets = [0, 0], sizes = [8, 128], strides = [1, 1]} : vector<8x384xf32> to vector<8x128xf32>
    %122 = arith.addf %120, %121 : vector<8x128xf32>
    %123 = arith.negf %122 : vector<8x128xf32>
    %124 = math.exp %123 : vector<8x128xf32>
    %cst_33 = arith.constant 1.000000e+00 : f32
    %125 = vector.broadcast %cst_33 : f32 to vector<8x128xf32>
    %126 = arith.addf %125, %124 : vector<8x128xf32>
    %127 = arith.divf %125, %126 : vector<8x128xf32>
    %128 = vector.extract_strided_slice %116 {offsets = [0, 128], sizes = [8, 128], strides = [1, 1]} : vector<8x384xf32> to vector<8x128xf32>
    %129 = vector.extract_strided_slice %119 {offsets = [0, 128], sizes = [8, 128], strides = [1, 1]} : vector<8x384xf32> to vector<8x128xf32>
    %130 = arith.addf %128, %129 : vector<8x128xf32>
    %131 = arith.negf %130 : vector<8x128xf32>
    %132 = math.exp %131 : vector<8x128xf32>
    %cst_34 = arith.constant 1.000000e+00 : f32
    %133 = vector.broadcast %cst_34 : f32 to vector<8x128xf32>
    %134 = arith.addf %133, %132 : vector<8x128xf32>
    %135 = arith.divf %133, %134 : vector<8x128xf32>
    %136 = vector.extract_strided_slice %116 {offsets = [0, 256], sizes = [8, 128], strides = [1, 1]} : vector<8x384xf32> to vector<8x128xf32>
    %137 = vector.extract_strided_slice %119 {offsets = [0, 256], sizes = [8, 128], strides = [1, 1]} : vector<8x384xf32> to vector<8x128xf32>
    %138 = arith.mulf %127, %137 : vector<8x128xf32>
    %139 = arith.addf %136, %138 : vector<8x128xf32>
    %140 = math.tanh %139 : vector<8x128xf32>
    %cst_35 = arith.constant 1.000000e+00 : f32
    %141 = vector.broadcast %cst_35 : f32 to vector<8x128xf32>
    %142 = arith.subf %141, %135 : vector<8x128xf32>
    %143 = arith.mulf %142, %140 : vector<8x128xf32>
    %144 = arith.mulf %135, %109 : vector<8x128xf32>
    %145 = arith.addf %143, %144 : vector<8x128xf32>
    %146 = arith.index_cast %c3_i32 : i32 to index
    %c0_36 = arith.constant 0 : index
    %c0_37 = arith.constant 0 : index
    %147 = vector.load %arg6[%146, %c0_36, %c0_37] : memref<8x8x128xf32, #tpu.memory_space<vmem>>, vector<1x8x128xf32>
    %148 = vector.shape_cast %147 : vector<1x8x128xf32> to vector<8x128xf32>
    %149 = vector.shape_cast %145 : vector<8x128xf32> to vector<1x8x128xf32>
    tpu.vector_store %arg6[%146, %c0_36, %c0_37], %149 {strides = array<i32>} : memref<8x8x128xf32, #tpu.memory_space<vmem>>, vector<1x8x128xf32>,
    %c4_i32 = arith.constant 4 : i32
    %150 = arith.index_cast %c4_i32 : i32 to index
    %c0_38 = arith.constant 0 : index
    %c0_39 = arith.constant 0 : index
    %151 = vector.load %arg2[%150, %c0_38, %c0_39] : memref<8x8x384xf32, #tpu.memory_space<vmem>>, vector<1x8x384xf32>
    %152 = vector.shape_cast %151 : vector<1x8x384xf32> to vector<8x384xf32>
    %cst_40 = arith.constant dense<0.000000e+00> : vector<8x384xf32>
    %153 = tpu.matmul %145, %3, %cst_40 {dimension_numbers = #tpu.dot_dimension_numbers<[1], [0], [0], [1], [0, 0, 1, 1], [], []>} : vector<8x128xf32>, vector<128x384xf32>, vector<8x384xf32> -> vector<8x384xf32>
    %154 = vector.broadcast %4 : vector<1x384xf32> to vector<8x384xf32>
    %155 = arith.addf %153, %154 : vector<8x384xf32>
    %156 = vector.extract_strided_slice %152 {offsets = [0, 0], sizes = [8, 128], strides = [1, 1]} : vector<8x384xf32> to vector<8x128xf32>
    %157 = vector.extract_strided_slice %155 {offsets = [0, 0], sizes = [8, 128], strides = [1, 1]} : vector<8x384xf32> to vector<8x128xf32>
    %158 = arith.addf %156, %157 : vector<8x128xf32>
    %159 = arith.negf %158 : vector<8x128xf32>
    %160 = math.exp %159 : vector<8x128xf32>
    %cst_41 = arith.constant 1.000000e+00 : f32
    %161 = vector.broadcast %cst_41 : f32 to vector<8x128xf32>
    %162 = arith.addf %161, %160 : vector<8x128xf32>
    %163 = arith.divf %161, %162 : vector<8x128xf32>
    %164 = vector.extract_strided_slice %152 {offsets = [0, 128], sizes = [8, 128], strides = [1, 1]} : vector<8x384xf32> to vector<8x128xf32>
    %165 = vector.extract_strided_slice %155 {offsets = [0, 128], sizes = [8, 128], strides = [1, 1]} : vector<8x384xf32> to vector<8x128xf32>
    %166 = arith.addf %164, %165 : vector<8x128xf32>
    %167 = arith.negf %166 : vector<8x128xf32>
    %168 = math.exp %167 : vector<8x128xf32>
    %cst_42 = arith.constant 1.000000e+00 : f32
    %169 = vector.broadcast %cst_42 : f32 to vector<8x128xf32>
    %170 = arith.addf %169, %168 : vector<8x128xf32>
    %171 = arith.divf %169, %170 : vector<8x128xf32>
    %172 = vector.extract_strided_slice %152 {offsets = [0, 256], sizes = [8, 128], strides = [1, 1]} : vector<8x384xf32> to vector<8x128xf32>
    %173 = vector.extract_strided_slice %155 {offsets = [0, 256], sizes = [8, 128], strides = [1, 1]} : vector<8x384xf32> to vector<8x128xf32>
    %174 = arith.mulf %163, %173 : vector<8x128xf32>
    %175 = arith.addf %172, %174 : vector<8x128xf32>
    %176 = math.tanh %175 : vector<8x128xf32>
    %cst_43 = arith.constant 1.000000e+00 : f32
    %177 = vector.broadcast %cst_43 : f32 to vector<8x128xf32>
    %178 = arith.subf %177, %171 : vector<8x128xf32>
    %179 = arith.mulf %178, %176 : vector<8x128xf32>
    %180 = arith.mulf %171, %145 : vector<8x128xf32>
    %181 = arith.addf %179, %180 : vector<8x128xf32>
    %182 = arith.index_cast %c4_i32 : i32 to index
    %c0_44 = arith.constant 0 : index
    %c0_45 = arith.constant 0 : index
    %183 = vector.load %arg6[%182, %c0_44, %c0_45] : memref<8x8x128xf32, #tpu.memory_space<vmem>>, vector<1x8x128xf32>
    %184 = vector.shape_cast %183 : vector<1x8x128xf32> to vector<8x128xf32>
    %185 = vector.shape_cast %181 : vector<8x128xf32> to vector<1x8x128xf32>
    tpu.vector_store %arg6[%182, %c0_44, %c0_45], %185 {strides = array<i32>} : memref<8x8x128xf32, #tpu.memory_space<vmem>>, vector<1x8x128xf32>,
    %c5_i32 = arith.constant 5 : i32
    %186 = arith.index_cast %c5_i32 : i32 to index
    %c0_46 = arith.constant 0 : index
    %c0_47 = arith.constant 0 : index
    %187 = vector.load %arg2[%186, %c0_46, %c0_47] : memref<8x8x384xf32, #tpu.memory_space<vmem>>, vector<1x8x384xf32>
    %188 = vector.shape_cast %187 : vector<1x8x384xf32> to vector<8x384xf32>
    %cst_48 = arith.constant dense<0.000000e+00> : vector<8x384xf32>
    %189 = tpu.matmul %181, %3, %cst_48 {dimension_numbers = #tpu.dot_dimension_numbers<[1], [0], [0], [1], [0, 0, 1, 1], [], []>} : vector<8x128xf32>, vector<128x384xf32>, vector<8x384xf32> -> vector<8x384xf32>
    %190 = vector.broadcast %4 : vector<1x384xf32> to vector<8x384xf32>
    %191 = arith.addf %189, %190 : vector<8x384xf32>
    %192 = vector.extract_strided_slice %188 {offsets = [0, 0], sizes = [8, 128], strides = [1, 1]} : vector<8x384xf32> to vector<8x128xf32>
    %193 = vector.extract_strided_slice %191 {offsets = [0, 0], sizes = [8, 128], strides = [1, 1]} : vector<8x384xf32> to vector<8x128xf32>
    %194 = arith.addf %192, %193 : vector<8x128xf32>
    %195 = arith.negf %194 : vector<8x128xf32>
    %196 = math.exp %195 : vector<8x128xf32>
    %cst_49 = arith.constant 1.000000e+00 : f32
    %197 = vector.broadcast %cst_49 : f32 to vector<8x128xf32>
    %198 = arith.addf %197, %196 : vector<8x128xf32>
    %199 = arith.divf %197, %198 : vector<8x128xf32>
    %200 = vector.extract_strided_slice %188 {offsets = [0, 128], sizes = [8, 128], strides = [1, 1]} : vector<8x384xf32> to vector<8x128xf32>
    %201 = vector.extract_strided_slice %191 {offsets = [0, 128], sizes = [8, 128], strides = [1, 1]} : vector<8x384xf32> to vector<8x128xf32>
    %202 = arith.addf %200, %201 : vector<8x128xf32>
    %203 = arith.negf %202 : vector<8x128xf32>
    %204 = math.exp %203 : vector<8x128xf32>
    %cst_50 = arith.constant 1.000000e+00 : f32
    %205 = vector.broadcast %cst_50 : f32 to vector<8x128xf32>
    %206 = arith.addf %205, %204 : vector<8x128xf32>
    %207 = arith.divf %205, %206 : vector<8x128xf32>
    %208 = vector.extract_strided_slice %188 {offsets = [0, 256], sizes = [8, 128], strides = [1, 1]} : vector<8x384xf32> to vector<8x128xf32>
    %209 = vector.extract_strided_slice %191 {offsets = [0, 256], sizes = [8, 128], strides = [1, 1]} : vector<8x384xf32> to vector<8x128xf32>
    %210 = arith.mulf %199, %209 : vector<8x128xf32>
    %211 = arith.addf %208, %210 : vector<8x128xf32>
    %212 = math.tanh %211 : vector<8x128xf32>
    %cst_51 = arith.constant 1.000000e+00 : f32
    %213 = vector.broadcast %cst_51 : f32 to vector<8x128xf32>
    %214 = arith.subf %213, %207 : vector<8x128xf32>
    %215 = arith.mulf %214, %212 : vector<8x128xf32>
    %216 = arith.mulf %207, %181 : vector<8x128xf32>
    %217 = arith.addf %215, %216 : vector<8x128xf32>
    %218 = arith.index_cast %c5_i32 : i32 to index
    %c0_52 = arith.constant 0 : index
    %c0_53 = arith.constant 0 : index
    %219 = vector.load %arg6[%218, %c0_52, %c0_53] : memref<8x8x128xf32, #tpu.memory_space<vmem>>, vector<1x8x128xf32>
    %220 = vector.shape_cast %219 : vector<1x8x128xf32> to vector<8x128xf32>
    %221 = vector.shape_cast %217 : vector<8x128xf32> to vector<1x8x128xf32>
    tpu.vector_store %arg6[%218, %c0_52, %c0_53], %221 {strides = array<i32>} : memref<8x8x128xf32, #tpu.memory_space<vmem>>, vector<1x8x128xf32>,
    %c6_i32 = arith.constant 6 : i32
    %222 = arith.index_cast %c6_i32 : i32 to index
    %c0_54 = arith.constant 0 : index
    %c0_55 = arith.constant 0 : index
    %223 = vector.load %arg2[%222, %c0_54, %c0_55] : memref<8x8x384xf32, #tpu.memory_space<vmem>>, vector<1x8x384xf32>
    %224 = vector.shape_cast %223 : vector<1x8x384xf32> to vector<8x384xf32>
    %cst_56 = arith.constant dense<0.000000e+00> : vector<8x384xf32>
    %225 = tpu.matmul %217, %3, %cst_56 {dimension_numbers = #tpu.dot_dimension_numbers<[1], [0], [0], [1], [0, 0, 1, 1], [], []>} : vector<8x128xf32>, vector<128x384xf32>, vector<8x384xf32> -> vector<8x384xf32>
    %226 = vector.broadcast %4 : vector<1x384xf32> to vector<8x384xf32>
    %227 = arith.addf %225, %226 : vector<8x384xf32>
    %228 = vector.extract_strided_slice %224 {offsets = [0, 0], sizes = [8, 128], strides = [1, 1]} : vector<8x384xf32> to vector<8x128xf32>
    %229 = vector.extract_strided_slice %227 {offsets = [0, 0], sizes = [8, 128], strides = [1, 1]} : vector<8x384xf32> to vector<8x128xf32>
    %230 = arith.addf %228, %229 : vector<8x128xf32>
    %231 = arith.negf %230 : vector<8x128xf32>
    %232 = math.exp %231 : vector<8x128xf32>
    %cst_57 = arith.constant 1.000000e+00 : f32
    %233 = vector.broadcast %cst_57 : f32 to vector<8x128xf32>
    %234 = arith.addf %233, %232 : vector<8x128xf32>
    %235 = arith.divf %233, %234 : vector<8x128xf32>
    %236 = vector.extract_strided_slice %224 {offsets = [0, 128], sizes = [8, 128], strides = [1, 1]} : vector<8x384xf32> to vector<8x128xf32>
    %237 = vector.extract_strided_slice %227 {offsets = [0, 128], sizes = [8, 128], strides = [1, 1]} : vector<8x384xf32> to vector<8x128xf32>
    %238 = arith.addf %236, %237 : vector<8x128xf32>
    %239 = arith.negf %238 : vector<8x128xf32>
    %240 = math.exp %239 : vector<8x128xf32>
    %cst_58 = arith.constant 1.000000e+00 : f32
    %241 = vector.broadcast %cst_58 : f32 to vector<8x128xf32>
    %242 = arith.addf %241, %240 : vector<8x128xf32>
    %243 = arith.divf %241, %242 : vector<8x128xf32>
    %244 = vector.extract_strided_slice %224 {offsets = [0, 256], sizes = [8, 128], strides = [1, 1]} : vector<8x384xf32> to vector<8x128xf32>
    %245 = vector.extract_strided_slice %227 {offsets = [0, 256], sizes = [8, 128], strides = [1, 1]} : vector<8x384xf32> to vector<8x128xf32>
    %246 = arith.mulf %235, %245 : vector<8x128xf32>
    %247 = arith.addf %244, %246 : vector<8x128xf32>
    %248 = math.tanh %247 : vector<8x128xf32>
    %cst_59 = arith.constant 1.000000e+00 : f32
    %249 = vector.broadcast %cst_59 : f32 to vector<8x128xf32>
    %250 = arith.subf %249, %243 : vector<8x128xf32>
    %251 = arith.mulf %250, %248 : vector<8x128xf32>
    %252 = arith.mulf %243, %217 : vector<8x128xf32>
    %253 = arith.addf %251, %252 : vector<8x128xf32>
    %254 = arith.index_cast %c6_i32 : i32 to index
    %c0_60 = arith.constant 0 : index
    %c0_61 = arith.constant 0 : index
    %255 = vector.load %arg6[%254, %c0_60, %c0_61] : memref<8x8x128xf32, #tpu.memory_space<vmem>>, vector<1x8x128xf32>
    %256 = vector.shape_cast %255 : vector<1x8x128xf32> to vector<8x128xf32>
    %257 = vector.shape_cast %253 : vector<8x128xf32> to vector<1x8x128xf32>
    tpu.vector_store %arg6[%254, %c0_60, %c0_61], %257 {strides = array<i32>} : memref<8x8x128xf32, #tpu.memory_space<vmem>>, vector<1x8x128xf32>,
    %c7_i32 = arith.constant 7 : i32
    %258 = arith.index_cast %c7_i32 : i32 to index
    %c0_62 = arith.constant 0 : index
    %c0_63 = arith.constant 0 : index
    %259 = vector.load %arg2[%258, %c0_62, %c0_63] : memref<8x8x384xf32, #tpu.memory_space<vmem>>, vector<1x8x384xf32>
    %260 = vector.shape_cast %259 : vector<1x8x384xf32> to vector<8x384xf32>
    %cst_64 = arith.constant dense<0.000000e+00> : vector<8x384xf32>
    %261 = tpu.matmul %253, %3, %cst_64 {dimension_numbers = #tpu.dot_dimension_numbers<[1], [0], [0], [1], [0, 0, 1, 1], [], []>} : vector<8x128xf32>, vector<128x384xf32>, vector<8x384xf32> -> vector<8x384xf32>
    %262 = vector.broadcast %4 : vector<1x384xf32> to vector<8x384xf32>
    %263 = arith.addf %261, %262 : vector<8x384xf32>
    %264 = vector.extract_strided_slice %260 {offsets = [0, 0], sizes = [8, 128], strides = [1, 1]} : vector<8x384xf32> to vector<8x128xf32>
    %265 = vector.extract_strided_slice %263 {offsets = [0, 0], sizes = [8, 128], strides = [1, 1]} : vector<8x384xf32> to vector<8x128xf32>
    %266 = arith.addf %264, %265 : vector<8x128xf32>
    %267 = arith.negf %266 : vector<8x128xf32>
    %268 = math.exp %267 : vector<8x128xf32>
    %cst_65 = arith.constant 1.000000e+00 : f32
    %269 = vector.broadcast %cst_65 : f32 to vector<8x128xf32>
    %270 = arith.addf %269, %268 : vector<8x128xf32>
    %271 = arith.divf %269, %270 : vector<8x128xf32>
    %272 = vector.extract_strided_slice %260 {offsets = [0, 128], sizes = [8, 128], strides = [1, 1]} : vector<8x384xf32> to vector<8x128xf32>
    %273 = vector.extract_strided_slice %263 {offsets = [0, 128], sizes = [8, 128], strides = [1, 1]} : vector<8x384xf32> to vector<8x128xf32>
    %274 = arith.addf %272, %273 : vector<8x128xf32>
    %275 = arith.negf %274 : vector<8x128xf32>
    %276 = math.exp %275 : vector<8x128xf32>
    %cst_66 = arith.constant 1.000000e+00 : f32
    %277 = vector.broadcast %cst_66 : f32 to vector<8x128xf32>
    %278 = arith.addf %277, %276 : vector<8x128xf32>
    %279 = arith.divf %277, %278 : vector<8x128xf32>
    %280 = vector.extract_strided_slice %260 {offsets = [0, 256], sizes = [8, 128], strides = [1, 1]} : vector<8x384xf32> to vector<8x128xf32>
    %281 = vector.extract_strided_slice %263 {offsets = [0, 256], sizes = [8, 128], strides = [1, 1]} : vector<8x384xf32> to vector<8x128xf32>
    %282 = arith.mulf %271, %281 : vector<8x128xf32>
    %283 = arith.addf %280, %282 : vector<8x128xf32>
    %284 = math.tanh %283 : vector<8x128xf32>
    %cst_67 = arith.constant 1.000000e+00 : f32
    %285 = vector.broadcast %cst_67 : f32 to vector<8x128xf32>
    %286 = arith.subf %285, %279 : vector<8x128xf32>
    %287 = arith.mulf %286, %284 : vector<8x128xf32>
    %288 = arith.mulf %279, %253 : vector<8x128xf32>
    %289 = arith.addf %287, %288 : vector<8x128xf32>
    %290 = arith.index_cast %c7_i32 : i32 to index
    %c0_68 = arith.constant 0 : index
    %c0_69 = arith.constant 0 : index
    %291 = vector.load %arg6[%290, %c0_68, %c0_69] : memref<8x8x128xf32, #tpu.memory_space<vmem>>, vector<1x8x128xf32>
    %292 = vector.shape_cast %291 : vector<1x8x128xf32> to vector<8x128xf32>
    %293 = vector.shape_cast %289 : vector<8x128xf32> to vector<1x8x128xf32>
    tpu.vector_store %arg6[%290, %c0_68, %c0_69], %293 {strides = array<i32>} : memref<8x8x128xf32, #tpu.memory_space<vmem>>, vector<1x8x128xf32>,
    %c8_i32 = arith.constant 8 : i32
    %c0_70 = arith.constant 0 : index
    %c0_71 = arith.constant 0 : index
    %294 = vector.load %arg7[%c0_70, %c0_71] : memref<8x128xf32, #tpu.memory_space<vmem>>, vector<8x128xf32>
    tpu.vector_store %arg7[%c0_70, %c0_71], %289 {strides = array<i32>} : memref<8x128xf32, #tpu.memory_space<vmem>>, vector<8x128xf32>,
    return
  }
  func.func @transform_0(%arg0: i32, %arg1: i32) -> (i32, i32, i32) {
    %c0_i32 = arith.constant 0 : i32
    %c0_i32_0 = arith.constant 0 : i32
    return %arg1, %arg0, %c0_i32 : i32, i32, i32
  }
  func.func @transform_1(%arg0: i32, %arg1: i32) -> (i32, i32) {
    %c0_i32 = arith.constant 0 : i32
    %c0_i32_0 = arith.constant 0 : i32
    %c0_i32_1 = arith.constant 0 : i32
    return %c0_i32, %c0_i32_0 : i32, i32
  }
  func.func @transform_2(%arg0: i32, %arg1: i32) -> (i32, i32) {
    %c0_i32 = arith.constant 0 : i32
    %c0_i32_0 = arith.constant 0 : i32
    %c0_i32_1 = arith.constant 0 : i32
    return %c0_i32, %c0_i32_0 : i32, i32
  }
  func.func @transform_3(%arg0: i32, %arg1: i32) -> (i32, i32) {
    %c0_i32 = arith.constant 0 : i32
    %c0_i32_0 = arith.constant 0 : i32
    return %arg0, %c0_i32 : i32, i32
  }
  func.func @transform_4(%arg0: i32, %arg1: i32) -> (i32, i32, i32) {
    %c0_i32 = arith.constant 0 : i32
    %c0_i32_0 = arith.constant 0 : i32
    return %arg1, %arg0, %c0_i32 : i32, i32, i32
  }
}

module attributes {stable_mosaic.version = 11 : i64} {
  func.func @_proj_logsoftmax_kernel(%arg0: i32, %arg1: memref<128x128xf32, #tpu.memory_space<vmem>>, %arg2: memref<128x128xf32, #tpu.memory_space<vmem>>, %arg3: memref<1x128xf32, #tpu.memory_space<vmem>>, %arg4: memref<128x128xf32, #tpu.memory_space<vmem>>) attributes {dimension_semantics = [#tpu.dimension_semantics<parallel>], iteration_bounds = array<i64: 1>, scalar_prefetch = 0 : i64, scratch_operands = 0 : i64, tpu.core_type = #tpu.core_type<tc>, window_params = [{transform_indices = @transform_0, window_bounds = array<i64: 128, 128>}, {pipeline_mode = #tpu.pipeline_mode<synchronous>, transform_indices = @transform_1, window_bounds = array<i64: 128, 128>}, {pipeline_mode = #tpu.pipeline_mode<synchronous>, transform_indices = @transform_2, window_bounds = array<i64: 1, 128>}, {transform_indices = @transform_3, window_bounds = array<i64: 128, 128>}]} {
    %c0 = arith.constant 0 : index
    %c0_0 = arith.constant 0 : index
    %0 = vector.load %arg1[%c0, %c0_0] : memref<128x128xf32, #tpu.memory_space<vmem>>, vector<128x128xf32>
    %c0_1 = arith.constant 0 : index
    %c0_2 = arith.constant 0 : index
    %1 = vector.load %arg2[%c0_1, %c0_2] : memref<128x128xf32, #tpu.memory_space<vmem>>, vector<128x128xf32>
    %cst = arith.constant dense<0.000000e+00> : vector<128x128xf32>
    %2 = tpu.matmul %0, %1, %cst {dimension_numbers = #tpu.dot_dimension_numbers<[1], [0], [0], [1], [0, 0, 1, 1], [], []>} : vector<128x128xf32>, vector<128x128xf32>, vector<128x128xf32> -> vector<128x128xf32>
    %c0_3 = arith.constant 0 : index
    %c0_4 = arith.constant 0 : index
    %3 = vector.load %arg3[%c0_3, %c0_4] : memref<1x128xf32, #tpu.memory_space<vmem>>, vector<1x128xf32>
    %4 = vector.broadcast %3 : vector<1x128xf32> to vector<128x128xf32>
    %5 = arith.addf %2, %4 : vector<128x128xf32>
    %6 = tpu.iota {dimensions = array<i32: 1>} : vector<128x128xi32>
    %c64_i32 = arith.constant 64 : i32
    %7 = vector.broadcast %c64_i32 : i32 to vector<128x128xi32>
    %8 = arith.cmpi slt, %6, %7 : vector<128x128xi32>
    %cst_5 = arith.constant -1.000000e+30 : f32
    %9 = vector.broadcast %cst_5 : f32 to vector<128x128xf32>
    %10 = arith.select %8, %5, %9 : vector<128x128xi1>, vector<128x128xf32>
    %cst_6 = arith.constant dense<0xFF800000> : vector<128xf32>
    %11 = vector.multi_reduction <maximumf>, %10, %cst_6 [1] : vector<128x128xf32> to vector<128xf32>
    %12 = vector.shape_cast %11 : vector<128xf32> to vector<128x1xf32>
    %13 = vector.broadcast %12 : vector<128x1xf32> to vector<128x128xf32>
    %14 = arith.subf %10, %13 : vector<128x128xf32>
    %15 = math.exp %14 : vector<128x128xf32>
    %cst_7 = arith.constant dense<0.000000e+00> : vector<128xf32>
    %16 = vector.multi_reduction <add>, %15, %cst_7 [1] : vector<128x128xf32> to vector<128xf32>
    %17 = vector.shape_cast %16 : vector<128xf32> to vector<128x1xf32>
    %18 = math.log %17 : vector<128x1xf32>
    %19 = vector.broadcast %18 : vector<128x1xf32> to vector<128x128xf32>
    %20 = arith.subf %14, %19 : vector<128x128xf32>
    %c0_8 = arith.constant 0 : index
    %c0_9 = arith.constant 0 : index
    %21 = vector.load %arg4[%c0_8, %c0_9] : memref<128x128xf32, #tpu.memory_space<vmem>>, vector<128x128xf32>
    tpu.vector_store %arg4[%c0_8, %c0_9], %20 {strides = array<i32>} : memref<128x128xf32, #tpu.memory_space<vmem>>, vector<128x128xf32>,
    return
  }
  func.func @transform_0(%arg0: i32) -> (i32, i32) {
    %c0_i32 = arith.constant 0 : i32
    %c0_i32_0 = arith.constant 0 : i32
    return %arg0, %c0_i32 : i32, i32
  }
  func.func @transform_1(%arg0: i32) -> (i32, i32) {
    %c0_i32 = arith.constant 0 : i32
    %c0_i32_0 = arith.constant 0 : i32
    %c0_i32_1 = arith.constant 0 : i32
    return %c0_i32, %c0_i32_0 : i32, i32
  }
  func.func @transform_2(%arg0: i32) -> (i32, i32) {
    %c0_i32 = arith.constant 0 : i32
    %c0_i32_0 = arith.constant 0 : i32
    %c0_i32_1 = arith.constant 0 : i32
    return %c0_i32, %c0_i32_0 : i32, i32
  }
  func.func @transform_3(%arg0: i32) -> (i32, i32) {
    %c0_i32 = arith.constant 0 : i32
    %c0_i32_0 = arith.constant 0 : i32
    return %arg0, %c0_i32 : i32, i32
  }
}

</mosaic_0001>

<bundles_post_ra>
// kernel: plain_seq2seq_forward.5
= control target key start
LH: loop header
LB: loop body
LE: loop exit
PB: predicated region body
PF: predicated region fallthrough
CT: control target
= control target key end

     0   :  { %v198_v40 = vlaneseq  ;;  %s880_s1 = inlined_call_operand.vmem [shape: f32[128,128], index: 1, kind: input, shape index: {}]   ;;  %s881_s0 = inlined_call_operand.vmem [shape: f32[128,128], index: 0, kind: input, shape index: {}]   ;;  %s882_s2 = inlined_call_operand.vmem [shape: f32[1,128], index: 2, kind: input, shape index: {}]   ;;  %s883_s3 = inlined_call_operand.vmem [shape: f32[128,128], index: 3, kind: output, shape index: {}]  }
   0x1   :  { %v30_v0 = vld [vmem:[%s880_s1] sm:$0xff]  ;;  %v31_v1 = vld [vmem:[%s880_s1 + $0x8] sm:$0xff]  ;;  %v32_v2 = vld [vmem:[%s880_s1 + $0x10] sm:$0xff] }
   0x2   :  { %v486_v3 = vpack.c.bf16 %v31_v1, %v30_v0  ;;  %v33_v4 = vld [vmem:[%s880_s1 + $0x18] sm:$0xff]  ;;  %v34_v6 = vld [vmem:[%s880_s1 + $0x20] sm:$0xff]  ;;  %v35_v7 = vld [vmem:[%s880_s1 + $0x28] sm:$0xff]  ;;  %v714_v41 = vand.u32 127, %v198_v40 }
   0x3   :  { %v490_v5 = vpack.c.bf16 %v33_v4, %v32_v2  ;;  %v494_v8 = vpack.c.bf16 %v35_v7, %v34_v6  ;;  %v14_v9 = vld [vmem:[%s881_s0] sm:$0xff]  ;;  %v36_v11 = vld [vmem:[%s880_s1 + $0x30] sm:$0xff]  ;;  %v37_v12 = vld [vmem:[%s880_s1 + $0x38] sm:$0xff] }
   0x4   :  { %487 = vmatprep.subr.bf16.mxu0 %v486_v3  ;;  %518 = vmatprep.subr.bf16.mxu1 %v486_v3  ;;  %v22_v10 = vld [vmem:[%s881_s0 + $0x40] sm:$0xff]  ;;  %v498_v13 = vpack.c.bf16 %v37_v12, %v36_v11  ;;  %v39_v15 = vld [vmem:[%s880_s1 + $0x48] sm:$0xff]  ;;  %v40_v17 = vld [vmem:[%s880_s1 + $0x50] sm:$0xff]  ;;  %vm200_vm0 = vcmp.lt.s32.totalorder %v714_v41, 64 }
   0x5   :  { %489 = vmatpush3.bf16.msra.mxu0 %v486_v3  ;;  %526 = vmatpush3.bf16.msra.mxu1 %v486_v3  ;;  %v38_v14 = vld [vmem:[%s880_s1 + $0x40] sm:$0xff]  ;;  %v41_v18 = vld [vmem:[%s880_s1 + $0x58] sm:$0xff]  ;;  %v43_v21 = vld [vmem:[%s880_s1 + $0x68] sm:$0xff] }
   0x6   :  { %491 = vmatprep.subr.bf16.mxu0 %v490_v5  ;;  %519 = vmatprep.subr.bf16.mxu1 %v490_v5  ;;  %v502_v16 = vpack.c.bf16 %v39_v15, %v38_v14  ;;  %v506_v19 = vpack.c.bf16 %v41_v18, %v40_v17  ;;  %v42_v20 = vld [vmem:[%s880_s1 + $0x60] sm:$0xff]  ;;  %v44_v23 = vld [vmem:[%s880_s1 + $0x70] sm:$0xff]  ;;  %v45_v24 = vld [vmem:[%s880_s1 + $0x78] sm:$0xff] }
   0x7   :  { %462 = vmatprep.mubr.f32.mxu0 %v14_v9  ;;  %474 = vmatprep.mubr.f32.mxu1 %v22_v10  ;;  %v510_v22 = vpack.c.bf16 %v43_v21, %v42_v20  ;;  %v514_v25 = vpack.c.bf16 %v45_v24, %v44_v23  ;;  %v15_v26 = vld [vmem:[%s881_s0 + $0x8] sm:$0xff]  ;;  %v16_v28 = vld [vmem:[%s881_s0 + $0x10] sm:$0xff]  ;;  %v17_v30 = vld [vmem:[%s881_s0 + $0x18] sm:$0xff] }
   0x8   :  { %v23_v27 = vld [vmem:[%s881_s0 + $0x48] sm:$0xff]  ;;  %v24_v29 = vld [vmem:[%s881_s0 + $0x50] sm:$0xff]  ;;  %v25_v31 = vld [vmem:[%s881_s0 + $0x58] sm:$0xff] }
   0x9   :  { %493 = vmatpush3.bf16.msra.mxu0 %v490_v5  ;;  %527 = vmatpush3.bf16.msra.mxu1 %v490_v5  ;;  %v18_v32 = vld [vmem:[%s881_s0 + $0x20] sm:$0xff]  ;;  %v19_v34 = vld [vmem:[%s881_s0 + $0x28] sm:$0xff]  ;;  %v20_v36 = vld [vmem:[%s881_s0 + $0x30] sm:$0xff] }
   0xa   :  { %495 = vmatprep.subr.bf16.mxu0 %v494_v8  ;;  %520 = vmatprep.subr.bf16.mxu1 %v494_v8  ;;  %v26_v33 = vld [vmem:[%s881_s0 + $0x60] sm:$0xff]  ;;  %v27_v35 = vld [vmem:[%s881_s0 + $0x68] sm:$0xff]  ;;  %v28_v37 = vld [vmem:[%s881_s0 + $0x70] sm:$0xff] }
   0xb   :  { %v21_v38 = vld [vmem:[%s881_s0 + $0x38] sm:$0xff]  ;;  %v397_v42 = vld [vmem:[%s882_s2] ss:$0 sm:$0xff] }
   0xc   :  { %v29_v39 = vld [vmem:[%s881_s0 + $0x78] sm:$0xff] }
   0xd   :  { %497 = vmatpush3.bf16.msra.mxu0 %v494_v8  ;;  %528 = vmatpush3.bf16.msra.mxu1 %v494_v8 }
   0xe   :  { %499 = vmatprep.subr.bf16.mxu0 %v498_v13  ;;  %521 = vmatprep.subr.bf16.mxu1 %v498_v13 }
  0x11   :  { %501 = vmatpush3.bf16.msra.mxu0 %v498_v13  ;;  %529 = vmatpush3.bf16.msra.mxu1 %v498_v13 }
  0x12   :  { %503 = vmatprep.subr.bf16.mxu0 %v502_v16  ;;  %522 = vmatprep.subr.bf16.mxu1 %v502_v16 }
  0x15   :  { %505 = vmatpush3.bf16.msra.mxu0 %v502_v16  ;;  %530 = vmatpush3.bf16.msra.mxu1 %v502_v16 }
  0x16   :  { %507 = vmatprep.subr.bf16.mxu0 %v506_v19  ;;  %523 = vmatprep.subr.bf16.mxu1 %v506_v19 }
  0x19   :  { %509 = vmatpush3.bf16.msra.mxu0 %v506_v19  ;;  %531 = vmatpush3.bf16.msra.mxu1 %v506_v19 }
  0x1a   :  { %511 = vmatprep.subr.bf16.mxu0 %v510_v22  ;;  %524 = vmatprep.subr.bf16.mxu1 %v510_v22 }
  0x1d   :  { %513 = vmatpush3.bf16.msra.mxu0 %v510_v22  ;;  %532 = vmatpush3.bf16.msra.mxu1 %v510_v22 }
  0x1e   :  { %515 = vmatprep.subr.bf16.mxu0 %v514_v25  ;;  %525 = vmatprep.subr.bf16.mxu1 %v514_v25 }
  0x21   :  { %517 = vmatpush3.bf16.msra.mxu0 %v514_v25  ;;  %533 = vmatpush3.bf16.msra.mxu1 %v514_v25 }
  0x24   :  { %463 = vmatmul.mubr.f32.vlgmr.msra.gmra.mrb[0].mxu0 %v15_v26  ;;  %475 = vmatmul.mubr.f32.vlgmr.msra.gmra.mrb[0].mxu1 %v23_v27 }
  0x25   :  { %465 = vmatprep.mubr.f32.mxu0 %v16_v28  ;;  %477 = vmatprep.mubr.f32.mxu1 %v24_v29 }
  0x28   :  { %466 = vmatmul.mubr.f32.gmra.mrb[2].mxu0 %v17_v30  ;;  %478 = vmatmul.mubr.f32.gmra.mrb[2].mxu1 %v25_v31 }
  0x29   :  { %468 = vmatprep.mubr.f32.mxu0 %v18_v32  ;;  %480 = vmatprep.mubr.f32.mxu1 %v26_v33 }
  0x2c   :  { %469 = vmatmul.mubr.f32.gmra.mrb[4].mxu0 %v19_v34  ;;  %481 = vmatmul.mubr.f32.gmra.mrb[4].mxu1 %v27_v35 }
  0x2d   :  { %471 = vmatprep.mubr.f32.mxu0 %v20_v36  ;;  %483 = vmatprep.mubr.f32.mxu1 %v28_v37 }
  0x30   :  { %472 = vmatmul.mubr.f32.gmra.mrb[6].mxu0 %v21_v38  ;;  %484 = vmatmul.mubr.f32.gmra.mrb[6].mxu1 %v29_v39 }
  0xf7   :  { %v464_v43 = vpop.f32.mrb[0].mxu0  ;;  %v476_v44 = vpop.f32.mrb[0].mxu1 }
  0xf8   :  { %v125_v45 = vadd.f32 %v464_v43, %v397_v42  ;;  %v165_v46 = vadd.f32 %v476_v44, %v397_v42  ;;  %v119_v47 = vpop.f32.mrb[1].mxu0  ;;  %v159_v48 = vpop.f32.mrb[1].mxu1 }
  0xf9   :  { %v120_v49 = vadd.f32 %v397_v42, %v119_v47  ;;  %v160_v58 = vadd.f32 %v397_v42, %v159_v48 }
  0xfa   :  { %v210_v50 = vsel %vm200_vm0, %v165_v46, -1e+30  ;;  %v202_v51 = vsel %vm200_vm0, %v125_v45, -1e+30 }
  0xfb   :  { %235 = vmax.xlane.f32.xlu1 %v210_v50  ;;  %219 = vmax.xlane.f32.xlu0 %v202_v51  ;;  %v467_v52 = vpop.f32.mrb[2].mxu0  ;;  %v479_v53 = vpop.f32.mrb[2].mxu1  ;;  %v201_v60 = vsel %vm200_vm0, %v120_v49, -1e+30  ;;  %v209_v4 = vsel %vm200_vm0, %v160_v58, -1e+30 }
  0xfc   :  { %v135_v54 = vadd.f32 %v467_v52, %v397_v42  ;;  %v129_v55 = vpop.f32.mrb[3].mxu0  ;;  %v175_v56 = vadd.f32 %v479_v53, %v397_v42  ;;  %v169_v57 = vpop.f32.mrb[3].mxu1 }
  0xfd   :  { %v130_v2 = vadd.f32 %v397_v42, %v129_v55  ;;  %v170_v3 = vadd.f32 %v397_v42, %v169_v57 }
  0xfe   :  { %v204_v59 = vsel %vm200_vm0, %v135_v54, -1e+30  ;;  %v212_v63 = vsel %vm200_vm0, %v175_v56, -1e+30 }
  0xff   :  { %223 = vmax.xlane.f32.xlu1 %v204_v59  ;;  %217 = vmax.xlane.f32.xlu0 %v201_v60  ;;  %v470_v61 = vpop.f32.mrb[4].mxu0  ;;  %v482_v62 = vpop.f32.mrb[4].mxu1  ;;  %v203_v11 = vsel %vm200_vm0, %v130_v2, -1e+30  ;;  %v211_v12 = vsel %vm200_vm0, %v170_v3, -1e+30 }
 0x100   :  { %v139_v0 = vpop.f32.mrb[5].mxu0  ;;  %v179_v1 = vpop.f32.mrb[5].mxu1  ;;  %v145_v7 = vadd.f32 %v470_v61, %v397_v42  ;;  %v185_v13 = vadd.f32 %v482_v62, %v397_v42 }
 0x101   :  { %v140_v8 = vadd.f32 %v397_v42, %v139_v0  ;;  %v180_v14 = vadd.f32 %v397_v42, %v179_v1 }
 0x102   :  { %v206_v15 = vsel %vm200_vm0, %v145_v7, -1e+30  ;;  %v214_v19 = vsel %vm200_vm0, %v185_v13, -1e+30 }
 0x103   :  { %239 = vmax.xlane.f32.xlu1 %v212_v63  ;;  %233 = vmax.xlane.f32.xlu0 %v209_v4  ;;  %v473_v5 = vpop.f32.mrb[6].mxu0  ;;  %v485_v6 = vpop.f32.mrb[6].mxu1  ;;  %v205_v16 = vsel %vm200_vm0, %v140_v8, -1e+30  ;;  %v213_v20 = vsel %vm200_vm0, %v180_v14, -1e+30 }
 0x104   :  { %v149_v9 = vpop.f32.mrb[7].mxu0  ;;  %v189_v10 = vpop.f32.mrb[7].mxu1  ;;  %v155_v17 = vadd.f32 %v473_v5, %v397_v42  ;;  %v195_v21 = vadd.f32 %v485_v6, %v397_v42 }
 0x105   :  { %v150_v18 = vadd.f32 %v397_v42, %v149_v9  ;;  %v190_v22 = vadd.f32 %v397_v42, %v189_v10 }
 0x106   :  { %v746_v23 = vsel %vm200_vm0, %v155_v17, -1e+30  ;;  %v756_v25 = vsel %vm200_vm0, %v195_v21, -1e+30 }
 0x107   :  { %221 = vmax.xlane.f32.xlu1 %v203_v11  ;;  %237 = vmax.xlane.f32.xlu0 %v211_v12  ;;  %v750_v24 = vsel %vm200_vm0, %v150_v18, -1e+30  ;;  %v760_v26 = vsel %vm200_vm0, %v190_v22, -1e+30 }
 0x10b   :  { %227 = vmax.xlane.f32.xlu1 %v206_v15  ;;  %225 = vmax.xlane.f32.xlu0 %v205_v16 }
 0x10f   :  { %243 = vmax.xlane.f32.xlu1 %v214_v19  ;;  %241 = vmax.xlane.f32.xlu0 %v213_v20 }
 0x113   :  { %231 = vmax.xlane.f32.xlu1 %v746_v23  ;;  %229 = vmax.xlane.f32.xlu0 %v750_v24 }
 0x117   :  { %247 = vmax.xlane.f32.xlu1 %v756_v25  ;;  %245 = vmax.xlane.f32.xlu0 %v760_v26 }
 0x188   :  { %v236_v27 = vpop.xlane.xlu1 %235  ;;  %v220_v28 = vpop.xlane.xlu0 %219 }
 0x189   :  { %v764_v29 = vsub.f32 %v210_v50, %v236_v27  ;;  %v766_v30 = vsub.f32 %v202_v51, %v220_v28 }
 0x18b   :  { %v267_v31 = vmul.f32 1.442695, %v766_v30  ;;  %v283_v34 = vmul.f32 1.442695, %v764_v29 }
 0x18c   :  { %v224_v32 = vpop.xlane.xlu1 %223  ;;  %v218_v33 = vpop.xlane.xlu0 %217 }
 0x18d   :  { %v770_v35 = vsub.f32 %v204_v59, %v224_v32  ;;  %v772_v36 = vsub.f32 %v201_v60, %v218_v33  ;;  %534 = vpow2.f32 %v267_v31 }
 0x18e   :  { %536 = vpow2.f32 %v283_v34 }
 0x18f   :  { %v265_v37 = vmul.f32 1.442695, %v772_v36  ;;  %v271_v40 = vmul.f32 1.442695, %v770_v35 }
 0x190   :  { %v240_v38 = vpop.xlane.xlu1 %239  ;;  %v234_v39 = vpop.xlane.xlu0 %233 }
 0x191   :  { %v776_v41 = vsub.f32 %v209_v4, %v234_v39  ;;  %538 = vpow2.f32 %v265_v37  ;;  %v778_v42 = vsub.f32 %v212_v63, %v240_v38 }
 0x192   :  { %540 = vpow2.f32 %v271_v40 }
 0x193   :  { %v281_v43 = vmul.f32 1.442695, %v776_v41  ;;  %v287_v47 = vmul.f32 1.442695, %v778_v42 }
 0x194   :  { %v222_v44 = vpop.xlane.xlu1 %221  ;;  %v238_v45 = vpop.xlane.xlu0 %237 }
 0x195   :  { %v781_v46 = vsub.f32 %v203_v11, %v222_v44  ;;  %542 = vpow2.f32 %v281_v43  ;;  %v784_v48 = vsub.f32 %v211_v12, %v238_v45 }
 0x197   :  { %v269_v49 = vmul.f32 1.442695, %v781_v46  ;;  %v535_v50 = vpop.eup %534  ;;  %v285_v54 = vmul.f32 1.442695, %v784_v48 }
 0x198   :  { %v228_v51 = vpop.xlane.xlu1 %227  ;;  %v226_v52 = vpop.xlane.xlu0 %225  ;;  %299 = vadd.xlane.f32.xlu1 %v535_v50 }
 0x199   :  { %544 = vpow2.f32 %v269_v49  ;;  %v787_v53 = vsub.f32 %v206_v15, %v228_v51  ;;  %v790_v55 = vsub.f32 %v205_v16, %v226_v52  ;;  %v537_v56 = vpop.eup %536 }
 0x19a   :  { %546 = vpow2.f32 %v287_v47 }
 0x19b   :  { %v275_v57 = vmul.f32 1.442695, %v787_v53  ;;  %v539_v58 = vpop.eup %538  ;;  %v273_v62 = vmul.f32 1.442695, %v790_v55 }
 0x19c   :  { %v244_v59 = vpop.xlane.xlu1 %243  ;;  %v242_v60 = vpop.xlane.xlu0 %241  ;;  %315 = vadd.xlane.f32.xlu1 %v537_v56  ;;  %297 = vadd.xlane.f32.xlu0 %v539_v58 }
 0x19d   :  { %548 = vpow2.f32 %v275_v57  ;;  %v793_v61 = vsub.f32 %v214_v19, %v244_v59  ;;  %v796_v63 = vsub.f32 %v213_v20, %v242_v60  ;;  %v541_v0 = vpop.eup %540 }
 0x19e   :  { %550 = vpow2.f32 %v285_v54 }
 0x19f   :  { %v291_v1 = vmul.f32 1.442695, %v793_v61  ;;  %v543_v2 = vpop.eup %542  ;;  %v289_v6 = vmul.f32 1.442695, %v796_v63 }
 0x1a0   :  { %v232_v3 = vpop.xlane.xlu1 %231  ;;  %v230_v4 = vpop.xlane.xlu0 %229  ;;  %303 = vadd.xlane.f32.xlu1 %v541_v0  ;;  %313 = vadd.xlane.f32.xlu0 %v543_v2 }
 0x1a1   :  { %552 = vpow2.f32 %v291_v1  ;;  %v800_v5 = vsub.f32 %v746_v23, %v232_v3  ;;  %v804_v7 = vsub.f32 %v750_v24, %v230_v4 }
 0x1a2   :  { %554 = vpow2.f32 %v273_v62 }
 0x1a3   :  { %v545_v8 = vpop.eup %544  ;;  %v279_v9 = vmul.f32 1.442695, %v800_v5  ;;  %v277_v14 = vmul.f32 1.442695, %v804_v7 }
 0x1a4   :  { %v547_v10 = vpop.eup %546  ;;  %v248_v11 = vpop.xlane.xlu1 %247  ;;  %301 = vadd.xlane.f32.xlu0 %v545_v8 }
 0x1a5   :  { %v246_v12 = vpop.xlane.xlu0 %245  ;;  %556 = vpow2.f32 %v279_v9  ;;  %319 = vadd.xlane.f32.xlu1 %v547_v10  ;;  %v808_v13 = vsub.f32 %v756_v25, %v248_v11 }
 0x1a6   :  { %558 = vpow2.f32 %v289_v6  ;;  %v812_v15 = vsub.f32 %v760_v26, %v246_v12 }
 0x1a7   :  { %v549_v16 = vpop.eup %548  ;;  %v295_v17 = vmul.f32 1.442695, %v808_v13 }
 0x1a8   :  { %v551_v18 = vpop.eup %550  ;;  %v293_v19 = vmul.f32 1.442695, %v812_v15 }
 0x1a9   :  { %560 = vpow2.f32 %v295_v17  ;;  %307 = vadd.xlane.f32.xlu1 %v549_v16  ;;  %317 = vadd.xlane.f32.xlu0 %v551_v18 }
 0x1aa   :  { %562 = vpow2.f32 %v277_v14 }
 0x1ab   :  { %v553_v20 = vpop.eup %552  ;;  %564 = vpow2.f32 %v293_v19 }
 0x1ac   :  { %v555_v21 = vpop.eup %554 }
 0x1ad   :  { %323 = vadd.xlane.f32.xlu1 %v553_v20  ;;  %305 = vadd.xlane.f32.xlu0 %v555_v21 }
 0x1af   :  { %v557_v22 = vpop.eup %556 }
 0x1b0   :  { %v559_v23 = vpop.eup %558 }
 0x1b1   :  { %311 = vadd.xlane.f32.xlu1 %v557_v22  ;;  %321 = vadd.xlane.f32.xlu0 %v559_v23 }
 0x1b3   :  { %v561_v24 = vpop.eup %560 }
 0x1b4   :  { %v563_v25 = vpop.eup %562 }
 0x1b5   :  { %327 = vadd.xlane.f32.xlu1 %v561_v24  ;;  %309 = vadd.xlane.f32.xlu0 %v563_v25  ;;  %v565_v26 = vpop.eup %564 }
 0x1b9   :  { %325 = vadd.xlane.f32.xlu0 %v565_v26 }
 0x225   :  { %v300_v27 = vpop.xlane.xlu1 %299 }
 0x226   :  { %566 = vlog2.f32 %v300_v27 }
 0x229   :  { %v316_v28 = vpop.xlane.xlu1 %315  ;;  %v298_v31 = vpop.xlane.xlu0 %297 }
 0x22a   :  { %568 = vlog2.f32 %v316_v28 }
 0x22b   :  { %570 = vlog2.f32 %v298_v31 }
 0x22d   :  { %v304_v32 = vpop.xlane.xlu1 %303  ;;  %v314_v33 = vpop.xlane.xlu0 %313 }
 0x22e   :  { %572 = vlog2.f32 %v304_v32 }
 0x22f   :  { %574 = vlog2.f32 %v314_v33 }
 0x230   :  { %v567_v34 = vpop.eup %566 }
 0x231   :  { %v332_v37 = vmul.f32 0.6931472, %v567_v34  ;;  %v302_v39 = vpop.xlane.xlu0 %301 }
 0x232   :  { %v320_v38 = vpop.xlane.xlu1 %319 }
 0x233   :  { %576 = vlog2.f32 %v320_v38  ;;  %v362_v40 = vsub.f32 %v766_v30, %v332_v37 }
 0x234   :  { %578 = vlog2.f32 %v302_v39  ;;  %v569_v43 = vpop.eup %568 }
 0x235   :  { %v571_v44 = vpop.eup %570  ;;  %378 = vst [vmem:[%s883_s3 + $0x8] sm:$0xff] %v362_v40  ;;  %v348_v45 = vmul.f32 0.6931472, %v569_v43 }
 0x236   :  { %v308_v47 = vpop.xlane.xlu1 %307  ;;  %v318_v49 = vpop.xlane.xlu0 %317  ;;  %v330_v50 = vmul.f32 0.6931472, %v571_v44 }
 0x237   :  { %580 = vlog2.f32 %v308_v47  ;;  %v370_v51 = vsub.f32 %v764_v29, %v348_v45 }
 0x238   :  { %582 = vlog2.f32 %v318_v49  ;;  %v573_v52 = vpop.eup %572  ;;  %v361_v54 = vsub.f32 %v772_v36, %v330_v50 }
 0x239   :  { %v575_v56 = vpop.eup %574  ;;  %386 = vst [vmem:[%s883_s3 + $0x48] sm:$0xff] %v370_v51  ;;  %v336_v30 = vmul.f32 0.6931472, %v573_v52 }
 0x23a   :  { %v324_v57 = vpop.xlane.xlu1 %323  ;;  %v306_v58 = vpop.xlane.xlu0 %305  ;;  %377 = vst [vmem:[%s883_s3] sm:$0xff] %v361_v54  ;;  %v346_v59 = vmul.f32 0.6931472, %v575_v56 }
 0x23b   :  { %584 = vlog2.f32 %v324_v57  ;;  %v364_v29 = vsub.f32 %v770_v35, %v336_v30 }
 0x23c   :  { %586 = vlog2.f32 %v306_v58  ;;  %v369_v36 = vsub.f32 %v776_v41, %v346_v59 }
 0x23d   :  { %v577_v60 = vpop.eup %576  ;;  %380 = vst [vmem:[%s883_s3 + $0x18] sm:$0xff] %v364_v29 }
 0x23e   :  { %v579_v62 = vpop.eup %578  ;;  %v352_v0 = vmul.f32 0.6931472, %v577_v60  ;;  %v312_v1 = vpop.xlane.xlu1 %311  ;;  %385 = vst [vmem:[%s883_s3 + $0x40] sm:$0xff] %v369_v36 }
 0x23f   :  { %v322_v2 = vpop.xlane.xlu0 %321  ;;  %v334_v3 = vmul.f32 0.6931472, %v579_v62  ;;  %588 = vlog2.f32 %v312_v1 }
 0x240   :  { %v372_v35 = vsub.f32 %v778_v42, %v352_v0  ;;  %590 = vlog2.f32 %v322_v2 }
 0x241   :  { %v581_v4 = vpop.eup %580  ;;  %v363_v41 = vsub.f32 %v781_v46, %v334_v3 }
 0x242   :  { %v583_v6 = vpop.eup %582  ;;  %388 = vst [vmem:[%s883_s3 + $0x58] sm:$0xff] %v372_v35  ;;  %v340_v8 = vmul.f32 0.6931472, %v581_v4  ;;  %v328_v9 = vpop.xlane.xlu1 %327 }
 0x243   :  { %v310_v10 = vpop.xlane.xlu0 %309  ;;  %379 = vst [vmem:[%s883_s3 + $0x10] sm:$0xff] %v363_v41  ;;  %v350_v11 = vmul.f32 0.6931472, %v583_v6  ;;  %592 = vlog2.f32 %v328_v9 }
 0x244   :  { %v366_v42 = vsub.f32 %v787_v53, %v340_v8  ;;  %594 = vlog2.f32 %v310_v10 }
 0x245   :  { %v585_v12 = vpop.eup %584  ;;  %v371_v46 = vsub.f32 %v784_v48, %v350_v11 }
 0x246   :  { %v587_v14 = vpop.eup %586  ;;  %382 = vst [vmem:[%s883_s3 + $0x28] sm:$0xff] %v366_v42  ;;  %v356_v16 = vmul.f32 0.6931472, %v585_v12 }
 0x247   :  { %v326_v17 = vpop.xlane.xlu0 %325  ;;  %387 = vst [vmem:[%s883_s3 + $0x50] sm:$0xff] %v371_v46  ;;  %v338_v18 = vmul.f32 0.6931472, %v587_v14 }
 0x248   :  { %596 = vlog2.f32 %v326_v17  ;;  %v374_v19 = vsub.f32 %v793_v61, %v356_v16 }
 0x249   :  { %v589_v53 = vpop.eup %588  ;;  %v365_v20 = vsub.f32 %v790_v55, %v338_v18 }
 0x24a   :  { %v591_v21 = vpop.eup %590  ;;  %390 = vst [vmem:[%s883_s3 + $0x68] sm:$0xff] %v374_v19  ;;  %v344_v48 = vmul.f32 0.6931472, %v589_v53 }
 0x24b   :  { %381 = vst [vmem:[%s883_s3 + $0x20] sm:$0xff] %v365_v20  ;;  %v354_v22 = vmul.f32 0.6931472, %v591_v21 }
 0x24c   :  { %v368_v23 = vsub.f32 %v800_v5, %v344_v48 }
 0x24d   :  { %v593_v24 = vpop.eup %592  ;;  %v373_v25 = vsub.f32 %v796_v63, %v354_v22 }
 0x24e   :  { %v595_v61 = vpop.eup %594  ;;  %384 = vst [vmem:[%s883_s3 + $0x38] sm:$0xff] %v368_v23  ;;  %v360_v55 = vmul.f32 0.6931472, %v593_v24 }
 0x24f   :  { %389 = vst [vmem:[%s883_s3 + $0x60] sm:$0xff] %v373_v25  ;;  %v342_v26 = vmul.f32 0.6931472, %v595_v61 }
 0x250   :  { %v376_v27 = vsub.f32 %v808_v13, %v360_v55 }
 0x251   :  { %v367_v31 = vsub.f32 %v804_v7, %v342_v26 }
 0x252   :  { %v597_v28 = vpop.eup %596  ;;  %392 = vst [vmem:[%s883_s3 + $0x78] sm:$0xff] %v376_v27 }
 0x253   :  { %v358_v63 = vmul.f32 0.6931472, %v597_v28  ;;  %383 = vst [vmem:[%s883_s3 + $0x30] sm:$0xff] %v367_v31 }
 0x255   :  { %v375_v5 = vsub.f32 %v812_v15, %v358_v63 }
 0x257   :  { %391 = vst [vmem:[%s883_s3 + $0x70] sm:$0xff] %v375_v5 }

// kernel: plain_seq2seq_forward.3
= control target key start
LH: loop header
LB: loop body
LE: loop exit
PB: predicated region body
PF: predicated region fallthrough
CT: control target
= control target key end

     0   :  { %v2410_v3 = vmov 0.0|0.0   ;;  %v2411_v4 = vmov 0.0   ;;  %vm2412_vm0 = vmmov 0   ;;  %s3056_s1 = inlined_call_operand.vmem [shape: f32[128,384], index: 1, kind: input, shape index: {}]   ;;  %s3057_s3 = inlined_call_operand.vmem [shape: f32[8,128], index: 3, kind: input, shape index: {}]   ;;  %s3058_s2 = inlined_call_operand.vmem [shape: f32[1,384], index: 2, kind: input, shape index: {}]   ;;  %s3059_s0 = inlined_call_operand.vmem [shape: f32[8,8,384], index: 0, kind: input, shape index: {}]   ;;  %s3060_s4 = inlined_call_operand.vmem [shape: f32[8,128], index: 4, kind: output, shape index: {}]  }
   0x1   :  { %v24_v0 = vld [vmem:[%s3056_s1 + $0x8] sm:$0xff]  ;;  %v27_v1 = vld [vmem:[%s3056_s1 + $0x20] sm:$0xff]  ;;  %1911 = vmatprep.subr.bf16.mxu1 %v2410_v3  ;;  %156 = vmatprep.mubr.f32.mxu0 %v2411_v4  ;;  %v26_v6 = vld [vmem:[%s3056_s1 + $0x18] sm:$0xff] }
   0x2   :  { %v23_v2 = vld [vmem:[%s3056_s1] sm:$0xff]  ;;  %v2449_v5 = vpack.c.bf16 %v27_v1, %v24_v0  ;;  %v30_v7 = vld [vmem:[%s3056_s1 + $0x38] sm:$0xff]  ;;  %v33_v8 = vld [vmem:[%s3056_s1 + $0x50] sm:$0xff]  ;;  %1631 = vmatprep.mubr.msk.f32.mxu1 %vm2412_vm0, %v2411_v4 }
   0x3   :  { %v2462_v9 = vpack.c.bf16 %v26_v6, %v23_v2  ;;  %v2464_v10 = vpack.c.bf16 %v33_v8, %v30_v7  ;;  %v29_v11 = vld [vmem:[%s3056_s1 + $0x30] sm:$0xff]  ;;  %v32_v12 = vld [vmem:[%s3056_s1 + $0x48] sm:$0xff]  ;;  %v39_v14 = vld [vmem:[%s3056_s1 + $0x80] sm:$0xff] }
   0x4   :  { %v36_v13 = vld [vmem:[%s3056_s1 + $0x68] sm:$0xff]  ;;  %1880 = vmatprep.subr.bf16.mxu0 %v2449_v5  ;;  %v2480_v15 = vpack.c.bf16 %v32_v12, %v29_v11  ;;  %v35_v17 = vld [vmem:[%s3056_s1 + $0x60] sm:$0xff]  ;;  %v38_v18 = vld [vmem:[%s3056_s1 + $0x78] sm:$0xff] }
   0x5   :  { %1882 = vmatpush1.bf16.msra.mxu0 %v2462_v9  ;;  %v2483_v16 = vpack.c.bf16 %v39_v14, %v36_v13  ;;  %v42_v19 = vld [vmem:[%s3056_s1 + $0x98] sm:$0xff]  ;;  %v45_v20 = vld [vmem:[%s3056_s1 + $0xb0] sm:$0xff]  ;;  %v2498_v21 = vpack.c.bf16 %v38_v18, %v35_v17  ;;  %v44_v24 = vld [vmem:[%s3056_s1 + $0xa8] sm:$0xff]  ;;  %v77_v18 = vlaneseq }
   0x6   :  { %1884 = vmatprep.subr.bf16.mxu0 %v2464_v10  ;;  %v2501_v22 = vpack.c.bf16 %v45_v20, %v42_v19  ;;  %v41_v23 = vld [vmem:[%s3056_s1 + $0x90] sm:$0xff]  ;;  %v48_v25 = vld [vmem:[%s3056_s1 + $0xc8] sm:$0xff]  ;;  %v51_v26 = vld [vmem:[%s3056_s1 + $0xe0] sm:$0xff] }
   0x7   :  { %v25_v27 = vld [vmem:[%s3056_s1 + $0x10] sm:$0xff]  ;;  %v28_v28 = vld [vmem:[%s3056_s1 + $0x28] sm:$0xff]  ;;  %v31_v30 = vld [vmem:[%s3056_s1 + $0x40] sm:$0xff]  ;;  %v2527_v31 = vpack.c.bf16 %v44_v24, %v41_v23  ;;  %v2533_v33 = vpack.c.bf16 %v51_v26, %v48_v25  ;;  %v78_v19 = vshrl.u32 %v77_v18, 7 }
   0x8   :  { %v2521_v29 = vpack.c.bf16 %v28_v28, %v25_v27  ;;  %v34_v32 = vld [vmem:[%s3056_s1 + $0x58] sm:$0xff]  ;;  %v47_v34 = vld [vmem:[%s3056_s1 + $0xc0] sm:$0xff]  ;;  %v57_v38 = vld [vmem:[%s3056_s1 + $0x110] sm:$0xff] }
   0x9   :  { %1886 = vmatpush1.bf16.msra.mxu0 %v2480_v15  ;;  %v50_v35 = vld [vmem:[%s3056_s1 + $0xd8] sm:$0xff]  ;;  %v2545_v37 = vpack.c.bf16 %v34_v32, %v31_v30  ;;  %v37_v39 = vld [vmem:[%s3056_s1 + $0x70] sm:$0xff]  ;;  %v40_v40 = vld [vmem:[%s3056_s1 + $0x88] sm:$0xff]  ;;  %v79_v20 = vsub.s32 0, %v78_v19  ;;  %v83_v24 = vsub.s32 1, %v78_v19 }
   0xa   :  { %1888 = vmatprep.subr.bf16.mxu0 %v2483_v16  ;;  %v54_v36 = vld [vmem:[%s3056_s1 + $0xf8] sm:$0xff]  ;;  %1913 = vmatpush3.bf16.msra.mxu1 %v2521_v29  ;;  %v2558_v41 = vpack.c.bf16 %v50_v35, %v47_v34  ;;  %v53_v43 = vld [vmem:[%s3056_s1 + $0xf0] sm:$0xff]  ;;  %v56_v44 = vld [vmem:[%s3056_s1 + $0x108] sm:$0xff]  ;;  %v2573_v46 = vpack.c.bf16 %v40_v40, %v37_v39 }
   0xb   :  { %1914 = vmatprep.subr.bf16.mxu1 %v2410_v3  ;;  %v2561_v42 = vpack.c.bf16 %v57_v38, %v54_v36  ;;  %v60_v45 = vld [vmem:[%s3056_s1 + $0x128] sm:$0xff]  ;;  %v63_v47 = vld [vmem:[%s3056_s1 + $0x140] sm:$0xff]  ;;  %v46_v49 = vld [vmem:[%s3056_s1 + $0xb8] sm:$0xff]  ;;  %v2586_v50 = vpack.c.bf16 %v56_v44, %v53_v43 }
   0xc   :  { %v43_v48 = vld [vmem:[%s3056_s1 + $0xa0] sm:$0xff]  ;;  %v2589_v51 = vpack.c.bf16 %v63_v47, %v60_v45  ;;  %v62_v53 = vld [vmem:[%s3056_s1 + $0x138] sm:$0xff]  ;;  %v69_v56 = vld [vmem:[%s3056_s1 + $0x170] sm:$0xff] }
   0xd   :  { %1890 = vmatpush1.bf16.msra.mxu0 %v2498_v21  ;;  %v59_v52 = vld [vmem:[%s3056_s1 + $0x120] sm:$0xff]  ;;  %v66_v54 = vld [vmem:[%s3056_s1 + $0x158] sm:$0xff]  ;;  %v2601_v55 = vpack.c.bf16 %v46_v49, %v43_v48  ;;  %v49_v57 = vld [vmem:[%s3056_s1 + $0xd0] sm:$0xff]  ;;  %v87_v48 = vsub.s32 2, %v78_v19 }
   0xe   :  { %1892 = vmatprep.subr.bf16.mxu0 %v2501_v22  ;;  %1916 = vmatpush3.bf16.msra.mxu1 %v2545_v37  ;;  %v52_v58 = vld [vmem:[%s3056_s1 + $0xe8] sm:$0xff]  ;;  %v2614_v59 = vpack.c.bf16 %v62_v53, %v59_v52  ;;  %v2617_v60 = vpack.c.bf16 %v69_v56, %v66_v54  ;;  %v65_v61 = vld [vmem:[%s3056_s1 + $0x150] sm:$0xff]  ;;  %v55_v0 = vld [vmem:[%s3056_s1 + $0x100] sm:$0xff] }
   0xf   :  { %1917 = vmatprep.subr.bf16.mxu1 %v2410_v3  ;;  %v68_v62 = vld [vmem:[%s3056_s1 + $0x168] sm:$0xff]  ;;  %v2626_v63 = vpack.c.bf16 %v52_v58, %v49_v57  ;;  %v58_v1 = vld [vmem:[%s3056_s1 + $0x118] sm:$0xff]  ;;  %v61_v7 = vld [vmem:[%s3056_s1 + $0x130] sm:$0xff] }
  0x10   :  { %v2636_v2 = vpack.c.bf16 %v68_v62, %v65_v61  ;;  %v2640_v6 = vpack.c.bf16 %v58_v1, %v55_v0  ;;  %v64_v8 = vld [vmem:[%s3056_s1 + $0x148] sm:$0xff]  ;;  %v2653_v11 = vld [vmem:[%s3057_s3] sm:$0xff]  ;;  %v70_v14 = vld [vmem:[%s3056_s1 + $0x178] sm:$0xff] }
  0x11   :  { %1894 = vmatpush1.bf16.msra.mxu0 %v2527_v31  ;;  %v2656_v12 = vpack.c.bf16 %v64_v8, %v61_v7  ;;  %v67_v13 = vld [vmem:[%s3056_s1 + $0x160] sm:$0xff]  ;;  %v74_v36 = vld [vmem:[%s3059_s0 + $0x8] sm:$0xff]  ;;  %v75_v57 = vld [vmem:[%s3059_s0 + $0x10] sm:$0xff] }
  0x12   :  { %1896 = vmatprep.subr.bf16.mxu0 %v2533_v33  ;;  %1919 = vmatpush3.bf16.msra.mxu1 %v2573_v46  ;;  %v2670_v17 = vpack.c.bf16 %v70_v14, %v67_v13  ;;  %v71_v23 = vld [vmem:[%s3058_s2] sm:$0x7] }
  0x13   :  { %1920 = vmatprep.subr.bf16.mxu1 %v2410_v3  ;;  %v2712_v25 = vrot.slane %v71_v23, %v79_v20  ;;  %v2714_v26 = vrot.slane %v71_v23, %v83_v24  ;;  %v73_v27 = vld [vmem:[%s3059_s0] sm:$0xff]  ;;  %v2724_v49 = vrot.slane %v71_v23, %v87_v48 }
  0x15   :  { %1898 = vmatpush1.bf16.msra.mxu0 %v2558_v41 }
  0x16   :  { %1900 = vmatprep.subr.bf16.mxu0 %v2561_v42  ;;  %1922 = vmatpush3.bf16.msra.mxu1 %v2601_v55 }
  0x17   :  { %1923 = vmatprep.subr.bf16.mxu1 %v2410_v3 }
  0x19   :  { %1902 = vmatpush1.bf16.msra.mxu0 %v2586_v50 }
  0x1a   :  { %1904 = vmatprep.subr.bf16.mxu0 %v2589_v51  ;;  %1925 = vmatpush3.bf16.msra.mxu1 %v2626_v63 }
  0x1b   :  { %1926 = vmatprep.subr.bf16.mxu1 %v2410_v3 }
  0x1d   :  { %1906 = vmatpush1.bf16.msra.mxu0 %v2614_v59 }
  0x1e   :  { %1908 = vmatprep.subr.bf16.mxu0 %v2617_v60  ;;  %1928 = vmatpush3.bf16.msra.mxu1 %v2640_v6 }
  0x1f   :  { %1929 = vmatprep.subr.bf16.mxu1 %v2410_v3 }
  0x21   :  { %1910 = vmatpush1.bf16.msra.mxu0 %v2636_v2 }
  0x22   :  { %1936 = vmatprep.subr.bf16.mxu0 %v2449_v5  ;;  %1931 = vmatpush3.bf16.msra.mxu1 %v2656_v12 }
  0x23   :  { %1932 = vmatprep.subr.bf16.mxu1 %v2410_v3 }
  0x24   :  { %157 = vmatmul.mubr.f32.vlgmr.msra.gmra.mrb[0].mxu0 %v2653_v11 }
  0x25   :  { %1938 = vmatpush1.bf16.msra.mxu0 %v2462_v9  ;;  %322 = vmatprep.mubr.f32.mxu0 %v2411_v4 }
  0x26   :  { %1940 = vmatprep.subr.bf16.mxu0 %v2464_v10  ;;  %1934 = vmatpush3.bf16.msra.mxu1 %v2670_v17 }
  0x27   :  { %1967 = vmatprep.subr.bf16.mxu1 %v2410_v3 }
  0x29   :  { %1942 = vmatpush1.bf16.msra.mxu0 %v2480_v15  ;;  %1632 = vmatmul.mubr.f32.vlgmr.msra.gmra.mrb[0].mxu1 %v2653_v11 }
  0x2a   :  { %1944 = vmatprep.subr.bf16.mxu0 %v2483_v16  ;;  %1969 = vmatpush3.bf16.msra.mxu1 %v2521_v29 }
  0x2b   :  { %1970 = vmatprep.subr.bf16.mxu1 %v2410_v3  ;;  %1666 = vmatprep.mubr.msk.f32.mxu1 %vm2412_vm0, %v2411_v4 }
  0x2d   :  { %1946 = vmatpush1.bf16.msra.mxu0 %v2498_v21 }
  0x2e   :  { %1948 = vmatprep.subr.bf16.mxu0 %v2501_v22  ;;  %1972 = vmatpush3.bf16.msra.mxu1 %v2545_v37 }
  0x2f   :  { %1973 = vmatprep.subr.bf16.mxu1 %v2410_v3 }
  0x31   :  { %1950 = vmatpush1.bf16.msra.mxu0 %v2527_v31 }
  0x32   :  { %1952 = vmatprep.subr.bf16.mxu0 %v2533_v33  ;;  %1975 = vmatpush3.bf16.msra.mxu1 %v2573_v46 }
  0x33   :  { %1976 = vmatprep.subr.bf16.mxu1 %v2410_v3 }
  0x35   :  { %1954 = vmatpush1.bf16.msra.mxu0 %v2558_v41 }
  0x36   :  { %1956 = vmatprep.subr.bf16.mxu0 %v2561_v42  ;;  %1978 = vmatpush3.bf16.msra.mxu1 %v2601_v55 }
  0x37   :  { %1979 = vmatprep.subr.bf16.mxu1 %v2410_v3 }
  0x39   :  { %1958 = vmatpush1.bf16.msra.mxu0 %v2586_v50 }
  0x3a   :  { %1960 = vmatprep.subr.bf16.mxu0 %v2589_v51  ;;  %1981 = vmatpush3.bf16.msra.mxu1 %v2626_v63 }
  0x3b   :  { %1982 = vmatprep.subr.bf16.mxu1 %v2410_v3 }
  0x3d   :  { %1962 = vmatpush1.bf16.msra.mxu0 %v2614_v59 }
  0x3e   :  { %1964 = vmatprep.subr.bf16.mxu0 %v2617_v60  ;;  %1984 = vmatpush3.bf16.msra.mxu1 %v2640_v6 }
  0x3f   :  { %1985 = vmatprep.subr.bf16.mxu1 %v2410_v3 }
  0x41   :  { %1966 = vmatpush1.bf16.msra.mxu0 %v2636_v2 }
  0x42   :  { %1992 = vmatprep.subr.bf16.mxu0 %v2449_v5  ;;  %1987 = vmatpush3.bf16.msra.mxu1 %v2656_v12 }
  0x43   :  { %1988 = vmatprep.subr.bf16.mxu1 %v2410_v3 }
  0x46   :  { %1990 = vmatpush3.bf16.msra.mxu1 %v2670_v17 }
  0x47   :  { %2023 = vmatprep.subr.bf16.mxu1 %v2410_v3 }
  0xf7   :  { %v158_v28 = vpop.f32.mrb[0].mxu0 }
  0xf8   :  { %v159_v30 = vadd.f32 %v158_v28, %v2712_v25  ;;  %v160_v32 = vpop.f32.mrb[1].mxu0  ;;  %v1429_v28 = vld [vmem:[%s3059_s0 + $0x20] sm:$0xff] }
  0xf9   :  { %v161_v34 = vadd.f32 %v160_v32, %v2714_v26 }
  0xfa   :  { %v233_v35 = vadd.f32 %v159_v30, %v73_v27 }
  0xfb   :  { %v240_v39 = vadd.f32 %v161_v34, %v74_v36 }
  0xfc   :  { %v1426_v38 = vmul.f32 -1.442695, %v233_v35  ;;  %v229_v40 = vpop.f32.mrb[0].mxu1 }
  0xfd   :  { %v1427_v43 = vmul.f32 -1.442695, %v240_v39  ;;  %v1633_v44 = vpop.f32.mrb[1].mxu1  ;;  %v230_v54 = vadd.f32 %v229_v40, %v2724_v49 }
  0xfe   :  { %2330 = vpow2.f32 %v1426_v38  ;;  %v1430_v44 = vld [vmem:[%s3059_s0 + $0x28] sm:$0xff] }
  0xff   :  { %2332 = vpow2.f32 %v1427_v43 }
 0x108   :  { %v2331_v45 = vpop.eup %2330 }
 0x109   :  { %v237_v47 = vadd.f32 1.0, %v2331_v45  ;;  %v2333_v52 = vpop.eup %2332 }
 0x10a   :  { %v244_v53 = vadd.f32 1.0, %v2333_v52 }
 0x10b   :  { %2334 = vrcp.f32 %v237_v47 }
 0x10c   :  { %2336 = vrcp.f32 %v244_v53 }
 0x115   :  { %v2335_v56 = vpop.eup %2334 }
 0x116   :  { %v247_v58 = vmul.f32 %v2335_v56, %v230_v54  ;;  %v2337_v62 = vpop.eup %2336 }
 0x117   :  { %v250_v0 = vsub.f32 1.0, %v2337_v62  ;;  %v252_v8 = vmul.f32 %v2337_v62, %v2653_v11  ;;  %v1428_v11 = vld [vmem:[%s3059_s0 + $0x18] sm:$0xff] }
 0x118   :  { %v248_v61 = vadd.f32 %v247_v58, %v75_v57  ;;  %v1433_v58 = vld [vmem:[%s3059_s0 + $0x30] sm:$0xff] }
 0x11a   :  { %2338 = vtanh.f32 %v248_v61 }
 0x124   :  { %v2339_v1 = vpop.eup %2338 }
 0x125   :  { %v251_v7 = vmul.f32 %v2339_v1, %v250_v0 }
 0x127   :  { %v2731_v13 = vadd.f32 %v252_v8, %v251_v7 }
 0x129   :  { %323 = vmatmul.mubr.f32.vlgmr.msra.gmra.mrb[2].mxu0 %v2731_v13  ;;  %1667 = vmatmul.mubr.f32.vlgmr.msra.gmra.mrb[2].mxu1 %v2731_v13 }
 0x12a   :  { %1994 = vmatpush1.bf16.msra.mxu0 %v2462_v9  ;;  %2025 = vmatpush3.bf16.msra.mxu1 %v2521_v29 }
 0x12b   :  { %1996 = vmatprep.subr.bf16.mxu0 %v2464_v10  ;;  %2026 = vmatprep.subr.bf16.mxu1 %v2410_v3 }
 0x12c   :  { %488 = vmatprep.mubr.f32.mxu0 %v2411_v4  ;;  %1701 = vmatprep.mubr.msk.f32.mxu1 %vm2412_vm0, %v2411_v4 }
 0x12e   :  { %1998 = vmatpush1.bf16.msra.mxu0 %v2480_v15  ;;  %2028 = vmatpush3.bf16.msra.mxu1 %v2545_v37 }
 0x12f   :  { %2000 = vmatprep.subr.bf16.mxu0 %v2483_v16  ;;  %2029 = vmatprep.subr.bf16.mxu1 %v2410_v3 }
 0x132   :  { %2002 = vmatpush1.bf16.msra.mxu0 %v2498_v21  ;;  %2031 = vmatpush3.bf16.msra.mxu1 %v2573_v46 }
 0x133   :  { %2004 = vmatprep.subr.bf16.mxu0 %v2501_v22  ;;  %2032 = vmatprep.subr.bf16.mxu1 %v2410_v3 }
 0x136   :  { %2006 = vmatpush1.bf16.msra.mxu0 %v2527_v31  ;;  %2034 = vmatpush3.bf16.msra.mxu1 %v2601_v55 }
 0x137   :  { %2008 = vmatprep.subr.bf16.mxu0 %v2533_v33  ;;  %2035 = vmatprep.subr.bf16.mxu1 %v2410_v3 }
 0x13a   :  { %2010 = vmatpush1.bf16.msra.mxu0 %v2558_v41  ;;  %2037 = vmatpush3.bf16.msra.mxu1 %v2626_v63 }
 0x13b   :  { %2012 = vmatprep.subr.bf16.mxu0 %v2561_v42  ;;  %2038 = vmatprep.subr.bf16.mxu1 %v2410_v3 }
 0x13e   :  { %2014 = vmatpush1.bf16.msra.mxu0 %v2586_v50  ;;  %2040 = vmatpush3.bf16.msra.mxu1 %v2640_v6 }
 0x13f   :  { %2016 = vmatprep.subr.bf16.mxu0 %v2589_v51  ;;  %2041 = vmatprep.subr.bf16.mxu1 %v2410_v3 }
 0x142   :  { %2018 = vmatpush1.bf16.msra.mxu0 %v2614_v59  ;;  %2043 = vmatpush3.bf16.msra.mxu1 %v2656_v12 }
 0x143   :  { %2020 = vmatprep.subr.bf16.mxu0 %v2617_v60  ;;  %2044 = vmatprep.subr.bf16.mxu1 %v2410_v3 }
 0x146   :  { %2022 = vmatpush1.bf16.msra.mxu0 %v2636_v2  ;;  %2046 = vmatpush3.bf16.msra.mxu1 %v2670_v17 }
 0x147   :  { %2048 = vmatprep.subr.bf16.mxu0 %v2449_v5  ;;  %2079 = vmatprep.subr.bf16.mxu1 %v2410_v3 }
 0x1fc   :  { %v324_v14 = vpop.f32.mrb[2].mxu0  ;;  %v395_v18 = vpop.f32.mrb[2].mxu1 }
 0x1fd   :  { %v325_v19 = vadd.f32 %v324_v14, %v2712_v25  ;;  %v326_v20 = vpop.f32.mrb[3].mxu0  ;;  %v1668_v23 = vpop.f32.mrb[3].mxu1  ;;  %v396_v40 = vadd.f32 %v395_v18, %v2724_v49 }
 0x1fe   :  { %v327_v24 = vadd.f32 %v326_v20, %v2714_v26 }
 0x1ff   :  { %v399_v27 = vadd.f32 %v1428_v11, %v325_v19  ;;  %v1434_v11 = vld [vmem:[%s3059_s0 + $0x38] sm:$0xff] }
 0x200   :  { %v406_v32 = vadd.f32 %v1429_v28, %v327_v24 }
 0x201   :  { %v1431_v30 = vmul.f32 -1.442695, %v399_v27 }
 0x202   :  { %v1432_v34 = vmul.f32 -1.442695, %v406_v32  ;;  %v1435_v32 = vld [vmem:[%s3059_s0 + $0x40] sm:$0xff] }
 0x203   :  { %2340 = vpow2.f32 %v1431_v30 }
 0x204   :  { %2342 = vpow2.f32 %v1432_v34 }
 0x20d   :  { %v2341_v35 = vpop.eup %2340 }
 0x20e   :  { %v403_v36 = vadd.f32 1.0, %v2341_v35  ;;  %v2343_v38 = vpop.eup %2342 }
 0x20f   :  { %v410_v39 = vadd.f32 1.0, %v2343_v38 }
 0x210   :  { %2344 = vrcp.f32 %v403_v36 }
 0x211   :  { %2346 = vrcp.f32 %v410_v39 }
 0x21a   :  { %v2345_v43 = vpop.eup %2344 }
 0x21b   :  { %v413_v45 = vmul.f32 %v2345_v43, %v396_v40  ;;  %v2347_v48 = vpop.eup %2346 }
 0x21c   :  { %v416_v52 = vsub.f32 1.0, %v2347_v48  ;;  %v418_v56 = vmul.f32 %v2347_v48, %v2731_v13 }
 0x21d   :  { %v414_v47 = vadd.f32 %v1430_v44, %v413_v45  ;;  %v1438_v45 = vld [vmem:[%s3059_s0 + $0x48] sm:$0xff] }
 0x21f   :  { %2348 = vtanh.f32 %v414_v47 }
 0x229   :  { %v2349_v53 = vpop.eup %2348 }
 0x22a   :  { %v417_v54 = vmul.f32 %v2349_v53, %v416_v52 }
 0x22c   :  { %v2783_v57 = vadd.f32 %v418_v56, %v417_v54 }
 0x22e   :  { %489 = vmatmul.mubr.f32.vlgmr.msra.gmra.mrb[4].mxu0 %v2783_v57  ;;  %1702 = vmatmul.mubr.f32.vlgmr.msra.gmra.mrb[4].mxu1 %v2783_v57 }
 0x22f   :  { %2050 = vmatpush1.bf16.msra.mxu0 %v2462_v9  ;;  %2081 = vmatpush3.bf16.msra.mxu1 %v2521_v29 }
 0x230   :  { %2052 = vmatprep.subr.bf16.mxu0 %v2464_v10  ;;  %2082 = vmatprep.subr.bf16.mxu1 %v2410_v3 }
 0x231   :  { %654 = vmatprep.mubr.f32.mxu0 %v2411_v4  ;;  %1736 = vmatprep.mubr.msk.f32.mxu1 %vm2412_vm0, %v2411_v4 }
 0x233   :  { %2054 = vmatpush1.bf16.msra.mxu0 %v2480_v15  ;;  %2084 = vmatpush3.bf16.msra.mxu1 %v2545_v37 }
 0x234   :  { %2056 = vmatprep.subr.bf16.mxu0 %v2483_v16  ;;  %2085 = vmatprep.subr.bf16.mxu1 %v2410_v3 }
 0x237   :  { %2058 = vmatpush1.bf16.msra.mxu0 %v2498_v21  ;;  %2087 = vmatpush3.bf16.msra.mxu1 %v2573_v46 }
 0x238   :  { %2060 = vmatprep.subr.bf16.mxu0 %v2501_v22  ;;  %2088 = vmatprep.subr.bf16.mxu1 %v2410_v3 }
 0x23b   :  { %2062 = vmatpush1.bf16.msra.mxu0 %v2527_v31  ;;  %2090 = vmatpush3.bf16.msra.mxu1 %v2601_v55 }
 0x23c   :  { %2064 = vmatprep.subr.bf16.mxu0 %v2533_v33  ;;  %2091 = vmatprep.subr.bf16.mxu1 %v2410_v3 }
 0x23f   :  { %2066 = vmatpush1.bf16.msra.mxu0 %v2558_v41  ;;  %2093 = vmatpush3.bf16.msra.mxu1 %v2626_v63 }
 0x240   :  { %2068 = vmatprep.subr.bf16.mxu0 %v2561_v42  ;;  %2094 = vmatprep.subr.bf16.mxu1 %v2410_v3 }
 0x243   :  { %2070 = vmatpush1.bf16.msra.mxu0 %v2586_v50  ;;  %2096 = vmatpush3.bf16.msra.mxu1 %v2640_v6 }
 0x244   :  { %2072 = vmatprep.subr.bf16.mxu0 %v2589_v51  ;;  %2097 = vmatprep.subr.bf16.mxu1 %v2410_v3 }
 0x247   :  { %2074 = vmatpush1.bf16.msra.mxu0 %v2614_v59  ;;  %2099 = vmatpush3.bf16.msra.mxu1 %v2656_v12 }
 0x248   :  { %2076 = vmatprep.subr.bf16.mxu0 %v2617_v60  ;;  %2100 = vmatprep.subr.bf16.mxu1 %v2410_v3 }
 0x24b   :  { %2078 = vmatpush1.bf16.msra.mxu0 %v2636_v2  ;;  %2102 = vmatpush3.bf16.msra.mxu1 %v2670_v17 }
 0x24c   :  { %2104 = vmatprep.subr.bf16.mxu0 %v2449_v5  ;;  %2135 = vmatprep.subr.bf16.mxu1 %v2410_v3 }
 0x301   :  { %v490_v61 = vpop.f32.mrb[4].mxu0  ;;  %v561_v62 = vpop.f32.mrb[4].mxu1 }
 0x302   :  { %v491_v0 = vadd.f32 %v490_v61, %v2712_v25  ;;  %v492_v1 = vpop.f32.mrb[5].mxu0  ;;  %v1703_v7 = vpop.f32.mrb[5].mxu1  ;;  %v562_v28 = vadd.f32 %v561_v62, %v2724_v49 }
 0x303   :  { %v493_v8 = vadd.f32 %v492_v1, %v2714_v26 }
 0x304   :  { %v565_v13 = vadd.f32 %v1433_v58, %v491_v0  ;;  %v1439_v58 = vld [vmem:[%s3059_s0 + $0x50] sm:$0xff] }
 0x305   :  { %v572_v18 = vadd.f32 %v1434_v11, %v493_v8 }
 0x306   :  { %v1436_v14 = vmul.f32 -1.442695, %v565_v13 }
 0x307   :  { %v1437_v19 = vmul.f32 -1.442695, %v572_v18  ;;  %v1440_v18 = vld [vmem:[%s3059_s0 + $0x58] sm:$0xff] }
 0x308   :  { %2350 = vpow2.f32 %v1436_v14 }
 0x309   :  { %2352 = vpow2.f32 %v1437_v19 }
 0x312   :  { %v2351_v20 = vpop.eup %2350 }
 0x313   :  { %v569_v23 = vadd.f32 1.0, %v2351_v20  ;;  %v2353_v24 = vpop.eup %2352 }
 0x314   :  { %v576_v27 = vadd.f32 1.0, %v2353_v24 }
 0x315   :  { %2354 = vrcp.f32 %v569_v23 }
 0x316   :  { %2356 = vrcp.f32 %v576_v27 }
 0x31f   :  { %v2355_v30 = vpop.eup %2354 }
 0x320   :  { %v579_v34 = vmul.f32 %v2355_v30, %v562_v28  ;;  %v2357_v36 = vpop.eup %2356 }
 0x321   :  { %v582_v38 = vsub.f32 1.0, %v2357_v36  ;;  %v584_v43 = vmul.f32 %v2357_v36, %v2783_v57 }
 0x322   :  { %v580_v35 = vadd.f32 %v1435_v32, %v579_v34  ;;  %v1443_v34 = vld [vmem:[%s3059_s0 + $0x60] sm:$0xff] }
 0x324   :  { %2358 = vtanh.f32 %v580_v35 }
 0x32e   :  { %v2359_v39 = vpop.eup %2358 }
 0x32f   :  { %v583_v40 = vmul.f32 %v2359_v39, %v582_v38 }
 0x331   :  { %v2835_v44 = vadd.f32 %v584_v43, %v583_v40 }
 0x333   :  { %655 = vmatmul.mubr.f32.vlgmr.msra.gmra.mrb[6].mxu0 %v2835_v44  ;;  %1737 = vmatmul.mubr.f32.vlgmr.msra.gmra.mrb[6].mxu1 %v2835_v44 }
 0x334   :  { %2106 = vmatpush1.bf16.msra.mxu0 %v2462_v9  ;;  %2137 = vmatpush3.bf16.msra.mxu1 %v2521_v29 }
 0x335   :  { %2108 = vmatprep.subr.bf16.mxu0 %v2464_v10  ;;  %2138 = vmatprep.subr.bf16.mxu1 %v2410_v3 }
 0x336   :  { %820 = vmatprep.mubr.f32.mxu0 %v2411_v4  ;;  %1771 = vmatprep.mubr.msk.f32.mxu1 %vm2412_vm0, %v2411_v4 }
 0x338   :  { %2110 = vmatpush1.bf16.msra.mxu0 %v2480_v15  ;;  %2140 = vmatpush3.bf16.msra.mxu1 %v2545_v37 }
 0x339   :  { %2112 = vmatprep.subr.bf16.mxu0 %v2483_v16  ;;  %2141 = vmatprep.subr.bf16.mxu1 %v2410_v3 }
 0x33c   :  { %2114 = vmatpush1.bf16.msra.mxu0 %v2498_v21  ;;  %2143 = vmatpush3.bf16.msra.mxu1 %v2573_v46 }
 0x33d   :  { %2116 = vmatprep.subr.bf16.mxu0 %v2501_v22  ;;  %2144 = vmatprep.subr.bf16.mxu1 %v2410_v3 }
 0x340   :  { %2118 = vmatpush1.bf16.msra.mxu0 %v2527_v31  ;;  %2146 = vmatpush3.bf16.msra.mxu1 %v2601_v55 }
 0x341   :  { %2120 = vmatprep.subr.bf16.mxu0 %v2533_v33  ;;  %2147 = vmatprep.subr.bf16.mxu1 %v2410_v3 }
 0x344   :  { %2122 = vmatpush1.bf16.msra.mxu0 %v2558_v41  ;;  %2149 = vmatpush3.bf16.msra.mxu1 %v2626_v63 }
 0x345   :  { %2124 = vmatprep.subr.bf16.mxu0 %v2561_v42  ;;  %2150 = vmatprep.subr.bf16.mxu1 %v2410_v3 }
 0x348   :  { %2126 = vmatpush1.bf16.msra.mxu0 %v2586_v50  ;;  %2152 = vmatpush3.bf16.msra.mxu1 %v2640_v6 }
 0x349   :  { %2128 = vmatprep.subr.bf16.mxu0 %v2589_v51  ;;  %2153 = vmatprep.subr.bf16.mxu1 %v2410_v3 }
 0x34c   :  { %2130 = vmatpush1.bf16.msra.mxu0 %v2614_v59  ;;  %2155 = vmatpush3.bf16.msra.mxu1 %v2656_v12 }
 0x34d   :  { %2132 = vmatprep.subr.bf16.mxu0 %v2617_v60  ;;  %2156 = vmatprep.subr.bf16.mxu1 %v2410_v3 }
 0x350   :  { %2134 = vmatpush1.bf16.msra.mxu0 %v2636_v2  ;;  %2158 = vmatpush3.bf16.msra.mxu1 %v2670_v17 }
 0x351   :  { %2160 = vmatprep.subr.bf16.mxu0 %v2449_v5  ;;  %2191 = vmatprep.subr.bf16.mxu1 %v2410_v3 }
 0x406   :  { %v656_v47 = vpop.f32.mrb[6].mxu0  ;;  %v727_v48 = vpop.f32.mrb[6].mxu1 }
 0x407   :  { %v657_v52 = vadd.f32 %v656_v47, %v2712_v25  ;;  %v658_v53 = vpop.f32.mrb[7].mxu0  ;;  %v1738_v54 = vpop.f32.mrb[7].mxu1  ;;  %v728_v11 = vadd.f32 %v727_v48, %v2724_v49 }
 0x408   :  { %v659_v56 = vadd.f32 %v658_v53, %v2714_v26 }
 0x409   :  { %v731_v57 = vadd.f32 %v1438_v45, %v657_v52  ;;  %v1444_v45 = vld [vmem:[%s3059_s0 + $0x68] sm:$0xff] }
 0x40a   :  { %v738_v62 = vadd.f32 %v1439_v58, %v659_v56 }
 0x40b   :  { %v1441_v61 = vmul.f32 -1.442695, %v731_v57 }
 0x40c   :  { %v1442_v0 = vmul.f32 -1.442695, %v738_v62  ;;  %v1445_v62 = vld [vmem:[%s3059_s0 + $0x70] sm:$0xff] }
 0x40d   :  { %2360 = vpow2.f32 %v1441_v61 }
 0x40e   :  { %2362 = vpow2.f32 %v1442_v0 }
 0x417   :  { %v2361_v1 = vpop.eup %2360 }
 0x418   :  { %v735_v7 = vadd.f32 1.0, %v2361_v1  ;;  %v2363_v8 = vpop.eup %2362 }
 0x419   :  { %v742_v13 = vadd.f32 1.0, %v2363_v8 }
 0x41a   :  { %2364 = vrcp.f32 %v735_v7 }
 0x41b   :  { %2366 = vrcp.f32 %v742_v13 }
 0x424   :  { %v2365_v14 = vpop.eup %2364 }
 0x425   :  { %v745_v19 = vmul.f32 %v2365_v14, %v728_v11  ;;  %v2367_v23 = vpop.eup %2366 }
 0x426   :  { %v748_v24 = vsub.f32 1.0, %v2367_v23  ;;  %v750_v30 = vmul.f32 %v2367_v23, %v2835_v44 }
 0x427   :  { %v746_v20 = vadd.f32 %v1440_v18, %v745_v19  ;;  %v1448_v19 = vld [vmem:[%s3059_s0 + $0x78] sm:$0xff] }
 0x429   :  { %2368 = vtanh.f32 %v746_v20 }
 0x433   :  { %v2369_v27 = vpop.eup %2368 }
 0x434   :  { %v749_v28 = vmul.f32 %v2369_v27, %v748_v24 }
 0x436   :  { %v2887_v32 = vadd.f32 %v750_v30, %v749_v28 }
 0x438   :  { %821 = vmatmul.mubr.f32.vlgmr.msra.gmra.mrb[8].mxu0 %v2887_v32  ;;  %1772 = vmatmul.mubr.f32.vlgmr.msra.gmra.mrb[8].mxu1 %v2887_v32 }
 0x439   :  { %2162 = vmatpush1.bf16.msra.mxu0 %v2462_v9  ;;  %2193 = vmatpush3.bf16.msra.mxu1 %v2521_v29 }
 0x43a   :  { %2164 = vmatprep.subr.bf16.mxu0 %v2464_v10  ;;  %2194 = vmatprep.subr.bf16.mxu1 %v2410_v3 }
 0x43b   :  { %986 = vmatprep.mubr.f32.mxu0 %v2411_v4  ;;  %1806 = vmatprep.mubr.msk.f32.mxu1 %vm2412_vm0, %v2411_v4 }
 0x43d   :  { %2166 = vmatpush1.bf16.msra.mxu0 %v2480_v15  ;;  %2196 = vmatpush3.bf16.msra.mxu1 %v2545_v37 }
 0x43e   :  { %2168 = vmatprep.subr.bf16.mxu0 %v2483_v16  ;;  %2197 = vmatprep.subr.bf16.mxu1 %v2410_v3 }
 0x441   :  { %2170 = vmatpush1.bf16.msra.mxu0 %v2498_v21  ;;  %2199 = vmatpush3.bf16.msra.mxu1 %v2573_v46 }
 0x442   :  { %2172 = vmatprep.subr.bf16.mxu0 %v2501_v22  ;;  %2200 = vmatprep.subr.bf16.mxu1 %v2410_v3 }
 0x445   :  { %2174 = vmatpush1.bf16.msra.mxu0 %v2527_v31  ;;  %2202 = vmatpush3.bf16.msra.mxu1 %v2601_v55 }
 0x446   :  { %2176 = vmatprep.subr.bf16.mxu0 %v2533_v33  ;;  %2203 = vmatprep.subr.bf16.mxu1 %v2410_v3 }
 0x449   :  { %2178 = vmatpush1.bf16.msra.mxu0 %v2558_v41  ;;  %2205 = vmatpush3.bf16.msra.mxu1 %v2626_v63 }
 0x44a   :  { %2180 = vmatprep.subr.bf16.mxu0 %v2561_v42  ;;  %2206 = vmatprep.subr.bf16.mxu1 %v2410_v3 }
 0x44d   :  { %2182 = vmatpush1.bf16.msra.mxu0 %v2586_v50  ;;  %2208 = vmatpush3.bf16.msra.mxu1 %v2640_v6 }
 0x44e   :  { %2184 = vmatprep.subr.bf16.mxu0 %v2589_v51  ;;  %2209 = vmatprep.subr.bf16.mxu1 %v2410_v3 }
 0x451   :  { %2186 = vmatpush1.bf16.msra.mxu0 %v2614_v59  ;;  %2211 = vmatpush3.bf16.msra.mxu1 %v2656_v12 }
 0x452   :  { %2188 = vmatprep.subr.bf16.mxu0 %v2617_v60  ;;  %2212 = vmatprep.subr.bf16.mxu1 %v2410_v3 }
 0x455   :  { %2190 = vmatpush1.bf16.msra.mxu0 %v2636_v2  ;;  %2214 = vmatpush3.bf16.msra.mxu1 %v2670_v17 }
 0x456   :  { %2216 = vmatprep.subr.bf16.mxu0 %v2449_v5  ;;  %2247 = vmatprep.subr.bf16.mxu1 %v2410_v3 }
 0x50b   :  { %v822_v35 = vpop.f32.mrb[8].mxu0  ;;  %v893_v36 = vpop.f32.mrb[8].mxu1 }
 0x50c   :  { %v823_v38 = vadd.f32 %v822_v35, %v2712_v25  ;;  %v824_v39 = vpop.f32.mrb[9].mxu0  ;;  %v1773_v40 = vpop.f32.mrb[9].mxu1  ;;  %v894_v58 = vadd.f32 %v893_v36, %v2724_v49 }
 0x50d   :  { %v825_v43 = vadd.f32 %v824_v39, %v2714_v26 }
 0x50e   :  { %v897_v44 = vadd.f32 %v1443_v34, %v823_v38  ;;  %v1449_v34 = vld [vmem:[%s3059_s0 + $0x80] sm:$0xff] }
 0x50f   :  { %v904_v48 = vadd.f32 %v1444_v45, %v825_v43 }
 0x510   :  { %v1446_v47 = vmul.f32 -1.442695, %v897_v44 }
 0x511   :  { %v1447_v52 = vmul.f32 -1.442695, %v904_v48 }
 0x512   :  { %2370 = vpow2.f32 %v1446_v47  ;;  %v1450_v47 = vld [vmem:[%s3059_s0 + $0x88] sm:$0xff] }
 0x513   :  { %2372 = vpow2.f32 %v1447_v52 }
 0x51c   :  { %v2371_v53 = vpop.eup %2370 }
 0x51d   :  { %v901_v54 = vadd.f32 1.0, %v2371_v53  ;;  %v2373_v56 = vpop.eup %2372 }
 0x51e   :  { %v908_v57 = vadd.f32 1.0, %v2373_v56 }
 0x51f   :  { %2374 = vrcp.f32 %v901_v54 }
 0x520   :  { %2376 = vrcp.f32 %v908_v57 }
 0x529   :  { %v2375_v61 = vpop.eup %2374 }
 0x52a   :  { %v911_v0 = vmul.f32 %v2375_v61, %v894_v58  ;;  %v2377_v7 = vpop.eup %2376 }
 0x52b   :  { %v914_v8 = vsub.f32 1.0, %v2377_v7  ;;  %v916_v14 = vmul.f32 %v2377_v7, %v2887_v32 }
 0x52c   :  { %v912_v1 = vadd.f32 %v1445_v62, %v911_v0 }
 0x52e   :  { %2378 = vtanh.f32 %v912_v1  ;;  %v1458_v1 = vld [vmem:[%s3059_s0 + $0xa8] sm:$0xff] }
 0x538   :  { %v2379_v13 = vpop.eup %2378 }
 0x539   :  { %v915_v11 = vmul.f32 %v2379_v13, %v914_v8 }
 0x53b   :  { %v2939_v18 = vadd.f32 %v916_v14, %v915_v11 }
 0x53d   :  { %987 = vmatmul.mubr.f32.vlgmr.msra.gmra.mrb[10].mxu0 %v2939_v18  ;;  %1807 = vmatmul.mubr.f32.vlgmr.msra.gmra.mrb[10].mxu1 %v2939_v18 }
 0x53e   :  { %2218 = vmatpush1.bf16.msra.mxu0 %v2462_v9  ;;  %2249 = vmatpush3.bf16.msra.mxu1 %v2521_v29 }
 0x53f   :  { %2220 = vmatprep.subr.bf16.mxu0 %v2464_v10  ;;  %2250 = vmatprep.subr.bf16.mxu1 %v2410_v3 }
 0x540   :  { %1152 = vmatprep.mubr.f32.mxu0 %v2411_v4  ;;  %1841 = vmatprep.mubr.msk.f32.mxu1 %vm2412_vm0, %v2411_v4 }
 0x542   :  { %2222 = vmatpush1.bf16.msra.mxu0 %v2480_v15  ;;  %2252 = vmatpush3.bf16.msra.mxu1 %v2545_v37 }
 0x543   :  { %2224 = vmatprep.subr.bf16.mxu0 %v2483_v16  ;;  %2253 = vmatprep.subr.bf16.mxu1 %v2410_v3 }
 0x546   :  { %2226 = vmatpush1.bf16.msra.mxu0 %v2498_v21  ;;  %2255 = vmatpush3.bf16.msra.mxu1 %v2573_v46 }
 0x547   :  { %2228 = vmatprep.subr.bf16.mxu0 %v2501_v22  ;;  %2256 = vmatprep.subr.bf16.mxu1 %v2410_v3 }
 0x54a   :  { %2230 = vmatpush1.bf16.msra.mxu0 %v2527_v31  ;;  %2258 = vmatpush3.bf16.msra.mxu1 %v2601_v55 }
 0x54b   :  { %2232 = vmatprep.subr.bf16.mxu0 %v2533_v33  ;;  %2259 = vmatprep.subr.bf16.mxu1 %v2410_v3 }
 0x54e   :  { %2234 = vmatpush1.bf16.msra.mxu0 %v2558_v41  ;;  %2261 = vmatpush3.bf16.msra.mxu1 %v2626_v63 }
 0x54f   :  { %2236 = vmatprep.subr.bf16.mxu0 %v2561_v42  ;;  %2262 = vmatprep.subr.bf16.mxu1 %v2410_v3 }
 0x552   :  { %2238 = vmatpush1.bf16.msra.mxu0 %v2586_v50  ;;  %2264 = vmatpush3.bf16.msra.mxu1 %v2640_v6 }
 0x553   :  { %2240 = vmatprep.subr.bf16.mxu0 %v2589_v51  ;;  %2265 = vmatprep.subr.bf16.mxu1 %v2410_v3 }
 0x556   :  { %2242 = vmatpush1.bf16.msra.mxu0 %v2614_v59  ;;  %2267 = vmatpush3.bf16.msra.mxu1 %v2656_v12 }
 0x557   :  { %2244 = vmatprep.subr.bf16.mxu0 %v2617_v60  ;;  %2268 = vmatprep.subr.bf16.mxu1 %v2410_v3 }
 0x55a   :  { %2246 = vmatpush1.bf16.msra.mxu0 %v2636_v2  ;;  %2270 = vmatpush3.bf16.msra.mxu1 %v2670_v17 }
 0x55b   :  { %2272 = vmatprep.subr.bf16.mxu0 %v2449_v5  ;;  %2303 = vmatprep.subr.bf16.mxu1 %v2410_v3 }
 0x610   :  { %v988_v20 = vpop.f32.mrb[10].mxu0  ;;  %v1059_v23 = vpop.f32.mrb[10].mxu1 }
 0x611   :  { %v989_v24 = vadd.f32 %v988_v20, %v2712_v25  ;;  %v990_v27 = vpop.f32.mrb[11].mxu0  ;;  %v1808_v28 = vpop.f32.mrb[11].mxu1  ;;  %v1060_v44 = vadd.f32 %v1059_v23, %v2724_v49  ;;  %v1459_v20 = vld [vmem:[%s3059_s0 + $0xb0] sm:$0xff] }
 0x612   :  { %v991_v30 = vadd.f32 %v990_v27, %v2714_v26 }
 0x613   :  { %v1063_v32 = vadd.f32 %v1448_v19, %v989_v24 }
 0x614   :  { %v1070_v35 = vadd.f32 %v1449_v34, %v991_v30 }
 0x615   :  { %v1451_v5 = vmul.f32 -1.442695, %v1063_v32 }
 0x616   :  { %v1452_v36 = vmul.f32 -1.442695, %v1070_v35 }
 0x617   :  { %2380 = vpow2.f32 %v1451_v5 }
 0x618   :  { %2382 = vpow2.f32 %v1452_v36 }
 0x621   :  { %v2381_v38 = vpop.eup %2380 }
 0x622   :  { %v1067_v39 = vadd.f32 1.0, %v2381_v38  ;;  %v2383_v40 = vpop.eup %2382 }
 0x623   :  { %v1074_v43 = vadd.f32 1.0, %v2383_v40 }
 0x624   :  { %2384 = vrcp.f32 %v1067_v39 }
 0x625   :  { %2386 = vrcp.f32 %v1074_v43 }
 0x62e   :  { %v2385_v45 = vpop.eup %2384 }
 0x62f   :  { %v1077_v48 = vmul.f32 %v2385_v45, %v1060_v44  ;;  %v2387_v53 = vpop.eup %2386 }
 0x630   :  { %v1080_v54 = vsub.f32 1.0, %v2387_v53  ;;  %v1082_v58 = vmul.f32 %v2387_v53, %v2939_v18 }
 0x631   :  { %v1078_v52 = vadd.f32 %v1450_v47, %v1077_v48 }
 0x633   :  { %2388 = vtanh.f32 %v1078_v52 }
 0x63d   :  { %v2389_v56 = vpop.eup %2388 }
 0x63e   :  { %v1081_v57 = vmul.f32 %v2389_v56, %v1080_v54 }
 0x640   :  { %v2991_v61 = vadd.f32 %v1082_v58, %v1081_v57 }
 0x642   :  { %1153 = vmatmul.mubr.f32.vlgmr.msra.gmra.mrb[12].mxu0 %v2991_v61  ;;  %1842 = vmatmul.mubr.f32.vlgmr.msra.gmra.mrb[12].mxu1 %v2991_v61 }
 0x643   :  { %2274 = vmatpush1.bf16.msra.mxu0 %v2462_v9  ;;  %2305 = vmatpush3.bf16.msra.mxu1 %v2521_v29 }
 0x644   :  { %2276 = vmatprep.subr.bf16.mxu0 %v2464_v10  ;;  %2306 = vmatprep.subr.bf16.mxu1 %v2410_v3 }
 0x645   :  { %1318 = vmatprep.mubr.f32.mxu0 %v2411_v4  ;;  %1876 = vmatprep.mubr.msk.f32.mxu1 %vm2412_vm0, %v2411_v4  ;;  %v1453_v4 = vld [vmem:[%s3059_s0 + $0x90] sm:$0xff] }
 0x647   :  { %2278 = vmatpush1.bf16.msra.mxu0 %v2480_v15  ;;  %2308 = vmatpush3.bf16.msra.mxu1 %v2545_v37 }
 0x648   :  { %2280 = vmatprep.subr.bf16.mxu0 %v2483_v16  ;;  %2309 = vmatprep.subr.bf16.mxu1 %v2410_v3 }
 0x64b   :  { %2282 = vmatpush1.bf16.msra.mxu0 %v2498_v21  ;;  %2311 = vmatpush3.bf16.msra.mxu1 %v2573_v46 }
 0x64c   :  { %2284 = vmatprep.subr.bf16.mxu0 %v2501_v22  ;;  %2312 = vmatprep.subr.bf16.mxu1 %v2410_v3 }
 0x64f   :  { %2286 = vmatpush1.bf16.msra.mxu0 %v2527_v31  ;;  %2314 = vmatpush3.bf16.msra.mxu1 %v2601_v55 }
 0x650   :  { %2288 = vmatprep.subr.bf16.mxu0 %v2533_v33  ;;  %2315 = vmatprep.subr.bf16.mxu1 %v2410_v3 }
 0x653   :  { %2290 = vmatpush1.bf16.msra.mxu0 %v2558_v41  ;;  %2317 = vmatpush3.bf16.msra.mxu1 %v2626_v63 }
 0x654   :  { %2292 = vmatprep.subr.bf16.mxu0 %v2561_v42  ;;  %2318 = vmatprep.subr.bf16.mxu1 %v2410_v3 }
 0x657   :  { %2294 = vmatpush1.bf16.msra.mxu0 %v2586_v50  ;;  %2320 = vmatpush3.bf16.msra.mxu1 %v2640_v6 }
 0x658   :  { %2296 = vmatprep.subr.bf16.mxu0 %v2589_v51  ;;  %2321 = vmatprep.subr.bf16.mxu1 %v2410_v3 }
 0x65b   :  { %2298 = vmatpush1.bf16.msra.mxu0 %v2614_v59  ;;  %2323 = vmatpush3.bf16.msra.mxu1 %v2656_v12  ;;  %v1455_v59 = vld [vmem:[%s3059_s0 + $0xa0] sm:$0xff] }
 0x65c   :  { %2300 = vmatprep.subr.bf16.mxu0 %v2617_v60  ;;  %2324 = vmatprep.subr.bf16.mxu1 %v2410_v3  ;;  %v1454_v3 = vld [vmem:[%s3059_s0 + $0x98] sm:$0xff] }
 0x65f   :  { %2302 = vmatpush1.bf16.msra.mxu0 %v2636_v2  ;;  %2326 = vmatpush3.bf16.msra.mxu1 %v2670_v17 }
 0x715   :  { %v1154_v9 = vpop.f32.mrb[12].mxu0  ;;  %v1225_v10 = vpop.f32.mrb[12].mxu1 }
 0x716   :  { %v1155_v15 = vadd.f32 %v1154_v9, %v2712_v25  ;;  %v1156_v16 = vpop.f32.mrb[13].mxu0  ;;  %v1843_v21 = vpop.f32.mrb[13].mxu1  ;;  %v1226_v51 = vadd.f32 %v1225_v10, %v2724_v49 }
 0x717   :  { %v1157_v22 = vadd.f32 %v1156_v16, %v2714_v26 }
 0x718   :  { %v1229_v29 = vadd.f32 %v1453_v4, %v1155_v15 }
 0x719   :  { %v1236_v33 = vadd.f32 %v1454_v3, %v1157_v22 }
 0x71a   :  { %v1456_v31 = vmul.f32 -1.442695, %v1229_v29 }
 0x71b   :  { %v1457_v37 = vmul.f32 -1.442695, %v1236_v33 }
 0x71c   :  { %2390 = vpow2.f32 %v1456_v31 }
 0x71d   :  { %2392 = vpow2.f32 %v1457_v37 }
 0x726   :  { %v2391_v41 = vpop.eup %2390 }
 0x727   :  { %v1233_v42 = vadd.f32 1.0, %v2391_v41  ;;  %v2393_v46 = vpop.eup %2392 }
 0x728   :  { %v1240_v50 = vadd.f32 1.0, %v2393_v46 }
 0x729   :  { %2394 = vrcp.f32 %v1233_v42 }
 0x72a   :  { %2396 = vrcp.f32 %v1240_v50 }
 0x733   :  { %v2395_v55 = vpop.eup %2394 }
 0x734   :  { %v1243_v60 = vmul.f32 %v2395_v55, %v1226_v51  ;;  %v2397_v2 = vpop.eup %2396 }
 0x735   :  { %v1246_v6 = vsub.f32 1.0, %v2397_v2  ;;  %v1248_v62 = vmul.f32 %v2397_v2, %v2991_v61 }
 0x736   :  { %v1244_v63 = vadd.f32 %v1455_v59, %v1243_v60 }
 0x738   :  { %2398 = vtanh.f32 %v1244_v63 }
 0x742   :  { %v2399_v12 = vpop.eup %2398 }
 0x743   :  { %v1247_v17 = vmul.f32 %v2399_v12, %v1246_v6 }
 0x745   :  { %v1249_v0 = vadd.f32 %v1248_v62, %v1247_v17 }
 0x747   :  { %1319 = vmatmul.mubr.f32.vlgmr.msra.gmra.mrb[14].mxu0 %v1249_v0  ;;  %1877 = vmatmul.mubr.f32.vlgmr.msra.gmra.mrb[14].mxu1 %v1249_v0 }
 0x81a   :  { %v1320_v7 = vpop.f32.mrb[14].mxu0  ;;  %v1391_v8 = vpop.f32.mrb[14].mxu1 }
 0x81b   :  { %v1321_v13 = vadd.f32 %v1320_v7, %v2712_v25  ;;  %v1322_v11 = vpop.f32.mrb[15].mxu0  ;;  %v1878_v14 = vpop.f32.mrb[15].mxu1  ;;  %v1392_v25 = vadd.f32 %v1391_v8, %v2724_v49 }
 0x81c   :  { %v1323_v18 = vadd.f32 %v1322_v11, %v2714_v26  ;;  %v1460_v26 = vld [vmem:[%s3059_s0 + $0xb8] sm:$0xff] }
 0x81d   :  { %v1395_v19 = vadd.f32 %v1458_v1, %v1321_v13 }
 0x81e   :  { %v1402_v24 = vadd.f32 %v1459_v20, %v1323_v18 }
 0x81f   :  { %v1461_v23 = vmul.f32 -1.442695, %v1395_v19 }
 0x820   :  { %v1462_v27 = vmul.f32 -1.442695, %v1402_v24 }
 0x821   :  { %2400 = vpow2.f32 %v1461_v23 }
 0x822   :  { %2402 = vpow2.f32 %v1462_v27 }
 0x82b   :  { %v2401_v28 = vpop.eup %2400 }
 0x82c   :  { %v1399_v30 = vadd.f32 1.0, %v2401_v28  ;;  %v2403_v32 = vpop.eup %2402 }
 0x82d   :  { %v1406_v34 = vadd.f32 1.0, %v2403_v32 }
 0x82e   :  { %2404 = vrcp.f32 %v1399_v30 }
 0x82f   :  { %2406 = vrcp.f32 %v1406_v34 }
 0x838   :  { %v2405_v5 = vpop.eup %2404 }
 0x839   :  { %v1409_v35 = vmul.f32 %v2405_v5, %v1392_v25  ;;  %v2407_v38 = vpop.eup %2406 }
 0x83a   :  { %v1412_v39 = vsub.f32 1.0, %v2407_v38  ;;  %v1414_v44 = vmul.f32 %v2407_v38, %v1249_v0 }
 0x83b   :  { %v1410_v36 = vadd.f32 %v1460_v26, %v1409_v35 }
 0x83d   :  { %2408 = vtanh.f32 %v1410_v36 }
 0x847   :  { %v2409_v40 = vpop.eup %2408 }
 0x848   :  { %v1413_v43 = vmul.f32 %v2409_v40, %v1412_v39 }
 0x84a   :  { %v1415_v45 = vadd.f32 %v1414_v44, %v1413_v43 }
 0x84c   :  { %1421 = vst [vmem:[%s3060_s4] sm:$0xff] %v1415_v45 }

// kernel: plain_seq2seq_forward.4
= control target key start
LH: loop header
LB: loop body
LE: loop exit
PB: predicated region body
PF: predicated region fallthrough
CT: control target
= control target key end

     0   :  { %v2427_v3 = vmov 0.0|0.0   ;;  %v2428_v4 = vmov 0.0   ;;  %vm2429_vm0 = vmmov 0   ;;  %s3100_s1 = inlined_call_operand.vmem [shape: f32[128,384], index: 1, kind: input, shape index: {}]   ;;  %s3101_s3 = inlined_call_operand.vmem [shape: f32[8,128], index: 3, kind: input, shape index: {}]   ;;  %s3102_s2 = inlined_call_operand.vmem [shape: f32[1,384], index: 2, kind: input, shape index: {}]   ;;  %s3103_s0 = inlined_call_operand.vmem [shape: f32[8,8,384], index: 0, kind: input, shape index: {}]   ;;  %s3104_s4 = inlined_call_operand.vmem [shape: f32[8,8,128], index: 4, kind: output, shape index: {}]  }
   0x1   :  { %v24_v0 = vld [vmem:[%s3100_s1 + $0x8] sm:$0xff]  ;;  %v27_v1 = vld [vmem:[%s3100_s1 + $0x20] sm:$0xff]  ;;  %1928 = vmatprep.subr.bf16.mxu1 %v2427_v3  ;;  %156 = vmatprep.mubr.f32.mxu0 %v2428_v4  ;;  %v26_v6 = vld [vmem:[%s3100_s1 + $0x18] sm:$0xff] }
   0x2   :  { %v23_v2 = vld [vmem:[%s3100_s1] sm:$0xff]  ;;  %v2466_v5 = vpack.c.bf16 %v27_v1, %v24_v0  ;;  %v30_v7 = vld [vmem:[%s3100_s1 + $0x38] sm:$0xff]  ;;  %v33_v8 = vld [vmem:[%s3100_s1 + $0x50] sm:$0xff]  ;;  %1648 = vmatprep.mubr.msk.f32.mxu1 %vm2429_vm0, %v2428_v4 }
   0x3   :  { %v2479_v9 = vpack.c.bf16 %v26_v6, %v23_v2  ;;  %v2481_v10 = vpack.c.bf16 %v33_v8, %v30_v7  ;;  %v29_v11 = vld [vmem:[%s3100_s1 + $0x30] sm:$0xff]  ;;  %v32_v12 = vld [vmem:[%s3100_s1 + $0x48] sm:$0xff]  ;;  %v39_v14 = vld [vmem:[%s3100_s1 + $0x80] sm:$0xff] }
   0x4   :  { %v36_v13 = vld [vmem:[%s3100_s1 + $0x68] sm:$0xff]  ;;  %1897 = vmatprep.subr.bf16.mxu0 %v2466_v5  ;;  %v2497_v15 = vpack.c.bf16 %v32_v12, %v29_v11  ;;  %v35_v17 = vld [vmem:[%s3100_s1 + $0x60] sm:$0xff]  ;;  %v38_v18 = vld [vmem:[%s3100_s1 + $0x78] sm:$0xff] }
   0x5   :  { %1899 = vmatpush1.bf16.msra.mxu0 %v2479_v9  ;;  %v2500_v16 = vpack.c.bf16 %v39_v14, %v36_v13  ;;  %v42_v19 = vld [vmem:[%s3100_s1 + $0x98] sm:$0xff]  ;;  %v45_v20 = vld [vmem:[%s3100_s1 + $0xb0] sm:$0xff]  ;;  %v2515_v21 = vpack.c.bf16 %v38_v18, %v35_v17  ;;  %v44_v24 = vld [vmem:[%s3100_s1 + $0xa8] sm:$0xff]  ;;  %v77_v18 = vlaneseq }
   0x6   :  { %1901 = vmatprep.subr.bf16.mxu0 %v2481_v10  ;;  %v2518_v22 = vpack.c.bf16 %v45_v20, %v42_v19  ;;  %v41_v23 = vld [vmem:[%s3100_s1 + $0x90] sm:$0xff]  ;;  %v48_v25 = vld [vmem:[%s3100_s1 + $0xc8] sm:$0xff]  ;;  %v51_v26 = vld [vmem:[%s3100_s1 + $0xe0] sm:$0xff] }
   0x7   :  { %v25_v27 = vld [vmem:[%s3100_s1 + $0x10] sm:$0xff]  ;;  %v28_v28 = vld [vmem:[%s3100_s1 + $0x28] sm:$0xff]  ;;  %v31_v30 = vld [vmem:[%s3100_s1 + $0x40] sm:$0xff]  ;;  %v2544_v31 = vpack.c.bf16 %v44_v24, %v41_v23  ;;  %v2550_v33 = vpack.c.bf16 %v51_v26, %v48_v25  ;;  %v78_v19 = vshrl.u32 %v77_v18, 7 }
   0x8   :  { %v2538_v29 = vpack.c.bf16 %v28_v28, %v25_v27  ;;  %v34_v32 = vld [vmem:[%s3100_s1 + $0x58] sm:$0xff]  ;;  %v47_v34 = vld [vmem:[%s3100_s1 + $0xc0] sm:$0xff]  ;;  %v57_v38 = vld [vmem:[%s3100_s1 + $0x110] sm:$0xff] }
   0x9   :  { %1903 = vmatpush1.bf16.msra.mxu0 %v2497_v15  ;;  %v50_v35 = vld [vmem:[%s3100_s1 + $0xd8] sm:$0xff]  ;;  %v2562_v37 = vpack.c.bf16 %v34_v32, %v31_v30  ;;  %v37_v39 = vld [vmem:[%s3100_s1 + $0x70] sm:$0xff]  ;;  %v40_v40 = vld [vmem:[%s3100_s1 + $0x88] sm:$0xff]  ;;  %v79_v20 = vsub.s32 0, %v78_v19  ;;  %v83_v24 = vsub.s32 1, %v78_v19 }
   0xa   :  { %1905 = vmatprep.subr.bf16.mxu0 %v2500_v16  ;;  %v54_v36 = vld [vmem:[%s3100_s1 + $0xf8] sm:$0xff]  ;;  %1930 = vmatpush3.bf16.msra.mxu1 %v2538_v29  ;;  %v2575_v41 = vpack.c.bf16 %v50_v35, %v47_v34  ;;  %v53_v43 = vld [vmem:[%s3100_s1 + $0xf0] sm:$0xff]  ;;  %v56_v44 = vld [vmem:[%s3100_s1 + $0x108] sm:$0xff]  ;;  %v2590_v46 = vpack.c.bf16 %v40_v40, %v37_v39 }
   0xb   :  { %1931 = vmatprep.subr.bf16.mxu1 %v2427_v3  ;;  %v2578_v42 = vpack.c.bf16 %v57_v38, %v54_v36  ;;  %v60_v45 = vld [vmem:[%s3100_s1 + $0x128] sm:$0xff]  ;;  %v63_v47 = vld [vmem:[%s3100_s1 + $0x140] sm:$0xff]  ;;  %v46_v49 = vld [vmem:[%s3100_s1 + $0xb8] sm:$0xff]  ;;  %v2603_v50 = vpack.c.bf16 %v56_v44, %v53_v43 }
   0xc   :  { %v43_v48 = vld [vmem:[%s3100_s1 + $0xa0] sm:$0xff]  ;;  %v2606_v51 = vpack.c.bf16 %v63_v47, %v60_v45  ;;  %v62_v53 = vld [vmem:[%s3100_s1 + $0x138] sm:$0xff]  ;;  %v69_v56 = vld [vmem:[%s3100_s1 + $0x170] sm:$0xff] }
   0xd   :  { %1907 = vmatpush1.bf16.msra.mxu0 %v2515_v21  ;;  %v59_v52 = vld [vmem:[%s3100_s1 + $0x120] sm:$0xff]  ;;  %v66_v54 = vld [vmem:[%s3100_s1 + $0x158] sm:$0xff]  ;;  %v2618_v55 = vpack.c.bf16 %v46_v49, %v43_v48  ;;  %v49_v57 = vld [vmem:[%s3100_s1 + $0xd0] sm:$0xff]  ;;  %v87_v48 = vsub.s32 2, %v78_v19 }
   0xe   :  { %1909 = vmatprep.subr.bf16.mxu0 %v2518_v22  ;;  %1933 = vmatpush3.bf16.msra.mxu1 %v2562_v37  ;;  %v52_v58 = vld [vmem:[%s3100_s1 + $0xe8] sm:$0xff]  ;;  %v2631_v59 = vpack.c.bf16 %v62_v53, %v59_v52  ;;  %v2634_v60 = vpack.c.bf16 %v69_v56, %v66_v54  ;;  %v65_v61 = vld [vmem:[%s3100_s1 + $0x150] sm:$0xff]  ;;  %v55_v0 = vld [vmem:[%s3100_s1 + $0x100] sm:$0xff] }
   0xf   :  { %1934 = vmatprep.subr.bf16.mxu1 %v2427_v3  ;;  %v68_v62 = vld [vmem:[%s3100_s1 + $0x168] sm:$0xff]  ;;  %v2643_v63 = vpack.c.bf16 %v52_v58, %v49_v57  ;;  %v58_v1 = vld [vmem:[%s3100_s1 + $0x118] sm:$0xff]  ;;  %v61_v7 = vld [vmem:[%s3100_s1 + $0x130] sm:$0xff] }
  0x10   :  { %v2653_v2 = vpack.c.bf16 %v68_v62, %v65_v61  ;;  %v2657_v6 = vpack.c.bf16 %v58_v1, %v55_v0  ;;  %v64_v8 = vld [vmem:[%s3100_s1 + $0x148] sm:$0xff]  ;;  %v2670_v11 = vld [vmem:[%s3101_s3] sm:$0xff]  ;;  %v70_v14 = vld [vmem:[%s3100_s1 + $0x178] sm:$0xff] }
  0x11   :  { %1911 = vmatpush1.bf16.msra.mxu0 %v2544_v31  ;;  %v2673_v12 = vpack.c.bf16 %v64_v8, %v61_v7  ;;  %v67_v13 = vld [vmem:[%s3100_s1 + $0x160] sm:$0xff]  ;;  %v74_v36 = vld [vmem:[%s3103_s0 + $0x8] sm:$0xff]  ;;  %v75_v57 = vld [vmem:[%s3103_s0 + $0x10] sm:$0xff] }
  0x12   :  { %1913 = vmatprep.subr.bf16.mxu0 %v2550_v33  ;;  %1936 = vmatpush3.bf16.msra.mxu1 %v2590_v46  ;;  %v2687_v17 = vpack.c.bf16 %v70_v14, %v67_v13  ;;  %v71_v23 = vld [vmem:[%s3102_s2] sm:$0x7] }
  0x13   :  { %1937 = vmatprep.subr.bf16.mxu1 %v2427_v3  ;;  %v2729_v25 = vrot.slane %v71_v23, %v79_v20  ;;  %v2731_v26 = vrot.slane %v71_v23, %v83_v24  ;;  %v73_v27 = vld [vmem:[%s3103_s0] sm:$0xff]  ;;  %v2741_v49 = vrot.slane %v71_v23, %v87_v48 }
  0x15   :  { %1915 = vmatpush1.bf16.msra.mxu0 %v2575_v41 }
  0x16   :  { %1917 = vmatprep.subr.bf16.mxu0 %v2578_v42  ;;  %1939 = vmatpush3.bf16.msra.mxu1 %v2618_v55 }
  0x17   :  { %1940 = vmatprep.subr.bf16.mxu1 %v2427_v3 }
  0x19   :  { %1919 = vmatpush1.bf16.msra.mxu0 %v2603_v50 }
  0x1a   :  { %1921 = vmatprep.subr.bf16.mxu0 %v2606_v51  ;;  %1942 = vmatpush3.bf16.msra.mxu1 %v2643_v63 }
  0x1b   :  { %1943 = vmatprep.subr.bf16.mxu1 %v2427_v3 }
  0x1d   :  { %1923 = vmatpush1.bf16.msra.mxu0 %v2631_v59 }
  0x1e   :  { %1925 = vmatprep.subr.bf16.mxu0 %v2634_v60  ;;  %1945 = vmatpush3.bf16.msra.mxu1 %v2657_v6 }
  0x1f   :  { %1946 = vmatprep.subr.bf16.mxu1 %v2427_v3 }
  0x21   :  { %1927 = vmatpush1.bf16.msra.mxu0 %v2653_v2 }
  0x22   :  { %1953 = vmatprep.subr.bf16.mxu0 %v2466_v5  ;;  %1948 = vmatpush3.bf16.msra.mxu1 %v2673_v12 }
  0x23   :  { %1949 = vmatprep.subr.bf16.mxu1 %v2427_v3 }
  0x24   :  { %157 = vmatmul.mubr.f32.vlgmr.msra.gmra.mrb[0].mxu0 %v2670_v11 }
  0x25   :  { %1955 = vmatpush1.bf16.msra.mxu0 %v2479_v9  ;;  %323 = vmatprep.mubr.f32.mxu0 %v2428_v4 }
  0x26   :  { %1957 = vmatprep.subr.bf16.mxu0 %v2481_v10  ;;  %1951 = vmatpush3.bf16.msra.mxu1 %v2687_v17 }
  0x27   :  { %1984 = vmatprep.subr.bf16.mxu1 %v2427_v3 }
  0x29   :  { %1959 = vmatpush1.bf16.msra.mxu0 %v2497_v15  ;;  %1649 = vmatmul.mubr.f32.vlgmr.msra.gmra.mrb[0].mxu1 %v2670_v11 }
  0x2a   :  { %1961 = vmatprep.subr.bf16.mxu0 %v2500_v16  ;;  %1986 = vmatpush3.bf16.msra.mxu1 %v2538_v29 }
  0x2b   :  { %1987 = vmatprep.subr.bf16.mxu1 %v2427_v3  ;;  %1683 = vmatprep.mubr.msk.f32.mxu1 %vm2429_vm0, %v2428_v4 }
  0x2d   :  { %1963 = vmatpush1.bf16.msra.mxu0 %v2515_v21 }
  0x2e   :  { %1965 = vmatprep.subr.bf16.mxu0 %v2518_v22  ;;  %1989 = vmatpush3.bf16.msra.mxu1 %v2562_v37 }
  0x2f   :  { %1990 = vmatprep.subr.bf16.mxu1 %v2427_v3 }
  0x31   :  { %1967 = vmatpush1.bf16.msra.mxu0 %v2544_v31 }
  0x32   :  { %1969 = vmatprep.subr.bf16.mxu0 %v2550_v33  ;;  %1992 = vmatpush3.bf16.msra.mxu1 %v2590_v46 }
  0x33   :  { %1993 = vmatprep.subr.bf16.mxu1 %v2427_v3 }
  0x35   :  { %1971 = vmatpush1.bf16.msra.mxu0 %v2575_v41 }
  0x36   :  { %1973 = vmatprep.subr.bf16.mxu0 %v2578_v42  ;;  %1995 = vmatpush3.bf16.msra.mxu1 %v2618_v55 }
  0x37   :  { %1996 = vmatprep.subr.bf16.mxu1 %v2427_v3 }
  0x39   :  { %1975 = vmatpush1.bf16.msra.mxu0 %v2603_v50 }
  0x3a   :  { %1977 = vmatprep.subr.bf16.mxu0 %v2606_v51  ;;  %1998 = vmatpush3.bf16.msra.mxu1 %v2643_v63 }
  0x3b   :  { %1999 = vmatprep.subr.bf16.mxu1 %v2427_v3 }
  0x3d   :  { %1979 = vmatpush1.bf16.msra.mxu0 %v2631_v59 }
  0x3e   :  { %1981 = vmatprep.subr.bf16.mxu0 %v2634_v60  ;;  %2001 = vmatpush3.bf16.msra.mxu1 %v2657_v6 }
  0x3f   :  { %2002 = vmatprep.subr.bf16.mxu1 %v2427_v3 }
  0x41   :  { %1983 = vmatpush1.bf16.msra.mxu0 %v2653_v2 }
  0x42   :  { %2009 = vmatprep.subr.bf16.mxu0 %v2466_v5  ;;  %2004 = vmatpush3.bf16.msra.mxu1 %v2673_v12 }
  0x43   :  { %2005 = vmatprep.subr.bf16.mxu1 %v2427_v3 }
  0x46   :  { %2007 = vmatpush3.bf16.msra.mxu1 %v2687_v17 }
  0x47   :  { %2040 = vmatprep.subr.bf16.mxu1 %v2427_v3 }
  0xf7   :  { %v158_v28 = vpop.f32.mrb[0].mxu0 }
  0xf8   :  { %v159_v30 = vadd.f32 %v158_v28, %v2729_v25  ;;  %v160_v32 = vpop.f32.mrb[1].mxu0  ;;  %v1439_v28 = vld [vmem:[%s3103_s0 + $0x20] sm:$0xff] }
  0xf9   :  { %v161_v34 = vadd.f32 %v160_v32, %v2731_v26 }
  0xfa   :  { %v233_v35 = vadd.f32 %v159_v30, %v73_v27 }
  0xfb   :  { %v240_v39 = vadd.f32 %v161_v34, %v74_v36 }
  0xfc   :  { %v1436_v38 = vmul.f32 -1.442695, %v233_v35  ;;  %v229_v40 = vpop.f32.mrb[0].mxu1 }
  0xfd   :  { %v1437_v43 = vmul.f32 -1.442695, %v240_v39  ;;  %v1650_v44 = vpop.f32.mrb[1].mxu1  ;;  %v230_v54 = vadd.f32 %v229_v40, %v2741_v49 }
  0xfe   :  { %2347 = vpow2.f32 %v1436_v38  ;;  %v1440_v44 = vld [vmem:[%s3103_s0 + $0x28] sm:$0xff] }
  0xff   :  { %2349 = vpow2.f32 %v1437_v43 }
 0x108   :  { %v2348_v45 = vpop.eup %2347 }
 0x109   :  { %v237_v47 = vadd.f32 1.0, %v2348_v45  ;;  %v2350_v52 = vpop.eup %2349 }
 0x10a   :  { %v244_v53 = vadd.f32 1.0, %v2350_v52 }
 0x10b   :  { %2351 = vrcp.f32 %v237_v47 }
 0x10c   :  { %2353 = vrcp.f32 %v244_v53 }
 0x115   :  { %v2352_v56 = vpop.eup %2351 }
 0x116   :  { %v247_v58 = vmul.f32 %v2352_v56, %v230_v54  ;;  %v2354_v62 = vpop.eup %2353 }
 0x117   :  { %v250_v0 = vsub.f32 1.0, %v2354_v62  ;;  %v252_v8 = vmul.f32 %v2354_v62, %v2670_v11  ;;  %v1438_v11 = vld [vmem:[%s3103_s0 + $0x18] sm:$0xff] }
 0x118   :  { %v248_v61 = vadd.f32 %v247_v58, %v75_v57  ;;  %v1444_v58 = vld [vmem:[%s3103_s0 + $0x30] sm:$0xff] }
 0x11a   :  { %2355 = vtanh.f32 %v248_v61 }
 0x124   :  { %v2356_v1 = vpop.eup %2355 }
 0x125   :  { %v251_v7 = vmul.f32 %v2356_v1, %v250_v0 }
 0x127   :  { %v2748_v13 = vadd.f32 %v252_v8, %v251_v7 }
 0x129   :  { %254 = vst [vmem:[%s3104_s4] sm:$0xff] %v2748_v13  ;;  %324 = vmatmul.mubr.f32.vlgmr.msra.gmra.mrb[2].mxu0 %v2748_v13  ;;  %1684 = vmatmul.mubr.f32.vlgmr.msra.gmra.mrb[2].mxu1 %v2748_v13 }
 0x12a   :  { %2011 = vmatpush1.bf16.msra.mxu0 %v2479_v9  ;;  %2042 = vmatpush3.bf16.msra.mxu1 %v2538_v29 }
 0x12b   :  { %2013 = vmatprep.subr.bf16.mxu0 %v2481_v10  ;;  %2043 = vmatprep.subr.bf16.mxu1 %v2427_v3 }
 0x12c   :  { %491 = vmatprep.mubr.f32.mxu0 %v2428_v4  ;;  %1718 = vmatprep.mubr.msk.f32.mxu1 %vm2429_vm0, %v2428_v4 }
 0x12e   :  { %2015 = vmatpush1.bf16.msra.mxu0 %v2497_v15  ;;  %2045 = vmatpush3.bf16.msra.mxu1 %v2562_v37 }
 0x12f   :  { %2017 = vmatprep.subr.bf16.mxu0 %v2500_v16  ;;  %2046 = vmatprep.subr.bf16.mxu1 %v2427_v3 }
 0x132   :  { %2019 = vmatpush1.bf16.msra.mxu0 %v2515_v21  ;;  %2048 = vmatpush3.bf16.msra.mxu1 %v2590_v46 }
 0x133   :  { %2021 = vmatprep.subr.bf16.mxu0 %v2518_v22  ;;  %2049 = vmatprep.subr.bf16.mxu1 %v2427_v3 }
 0x136   :  { %2023 = vmatpush1.bf16.msra.mxu0 %v2544_v31  ;;  %2051 = vmatpush3.bf16.msra.mxu1 %v2618_v55 }
 0x137   :  { %2025 = vmatprep.subr.bf16.mxu0 %v2550_v33  ;;  %2052 = vmatprep.subr.bf16.mxu1 %v2427_v3 }
 0x13a   :  { %2027 = vmatpush1.bf16.msra.mxu0 %v2575_v41  ;;  %2054 = vmatpush3.bf16.msra.mxu1 %v2643_v63 }
 0x13b   :  { %2029 = vmatprep.subr.bf16.mxu0 %v2578_v42  ;;  %2055 = vmatprep.subr.bf16.mxu1 %v2427_v3 }
 0x13e   :  { %2031 = vmatpush1.bf16.msra.mxu0 %v2603_v50  ;;  %2057 = vmatpush3.bf16.msra.mxu1 %v2657_v6 }
 0x13f   :  { %2033 = vmatprep.subr.bf16.mxu0 %v2606_v51  ;;  %2058 = vmatprep.subr.bf16.mxu1 %v2427_v3 }
 0x142   :  { %2035 = vmatpush1.bf16.msra.mxu0 %v2631_v59  ;;  %2060 = vmatpush3.bf16.msra.mxu1 %v2673_v12 }
 0x143   :  { %2037 = vmatprep.subr.bf16.mxu0 %v2634_v60  ;;  %2061 = vmatprep.subr.bf16.mxu1 %v2427_v3 }
 0x146   :  { %2039 = vmatpush1.bf16.msra.mxu0 %v2653_v2  ;;  %2063 = vmatpush3.bf16.msra.mxu1 %v2687_v17 }
 0x147   :  { %2065 = vmatprep.subr.bf16.mxu0 %v2466_v5  ;;  %2096 = vmatprep.subr.bf16.mxu1 %v2427_v3 }
 0x1fc   :  { %v325_v14 = vpop.f32.mrb[2].mxu0  ;;  %v396_v18 = vpop.f32.mrb[2].mxu1 }
 0x1fd   :  { %v326_v19 = vadd.f32 %v325_v14, %v2729_v25  ;;  %v327_v20 = vpop.f32.mrb[3].mxu0  ;;  %v1685_v23 = vpop.f32.mrb[3].mxu1  ;;  %v397_v40 = vadd.f32 %v396_v18, %v2741_v49 }
 0x1fe   :  { %v328_v24 = vadd.f32 %v327_v20, %v2731_v26 }
 0x1ff   :  { %v400_v27 = vadd.f32 %v1438_v11, %v326_v19  ;;  %v1445_v11 = vld [vmem:[%s3103_s0 + $0x38] sm:$0xff] }
 0x200   :  { %v407_v32 = vadd.f32 %v1439_v28, %v328_v24 }
 0x201   :  { %v1441_v30 = vmul.f32 -1.442695, %v400_v27 }
 0x202   :  { %v1442_v34 = vmul.f32 -1.442695, %v407_v32  ;;  %v1446_v32 = vld [vmem:[%s3103_s0 + $0x40] sm:$0xff] }
 0x203   :  { %2357 = vpow2.f32 %v1441_v30 }
 0x204   :  { %2359 = vpow2.f32 %v1442_v34 }
 0x20d   :  { %v2358_v35 = vpop.eup %2357 }
 0x20e   :  { %v404_v36 = vadd.f32 1.0, %v2358_v35  ;;  %v2360_v38 = vpop.eup %2359 }
 0x20f   :  { %v411_v39 = vadd.f32 1.0, %v2360_v38 }
 0x210   :  { %2361 = vrcp.f32 %v404_v36 }
 0x211   :  { %2363 = vrcp.f32 %v411_v39 }
 0x21a   :  { %v2362_v43 = vpop.eup %2361 }
 0x21b   :  { %v414_v45 = vmul.f32 %v2362_v43, %v397_v40  ;;  %v2364_v48 = vpop.eup %2363 }
 0x21c   :  { %v417_v52 = vsub.f32 1.0, %v2364_v48  ;;  %v419_v56 = vmul.f32 %v2364_v48, %v2748_v13 }
 0x21d   :  { %v415_v47 = vadd.f32 %v1440_v44, %v414_v45  ;;  %v1450_v45 = vld [vmem:[%s3103_s0 + $0x48] sm:$0xff] }
 0x21f   :  { %2365 = vtanh.f32 %v415_v47 }
 0x229   :  { %v2366_v53 = vpop.eup %2365 }
 0x22a   :  { %v418_v54 = vmul.f32 %v2366_v53, %v417_v52 }
 0x22c   :  { %v2804_v57 = vadd.f32 %v419_v56, %v418_v54 }
 0x22e   :  { %1443 = vst [vmem:[%s3104_s4 + $0x8] sm:$0xff] %v2804_v57  ;;  %492 = vmatmul.mubr.f32.vlgmr.msra.gmra.mrb[4].mxu0 %v2804_v57  ;;  %1719 = vmatmul.mubr.f32.vlgmr.msra.gmra.mrb[4].mxu1 %v2804_v57 }
 0x22f   :  { %2067 = vmatpush1.bf16.msra.mxu0 %v2479_v9  ;;  %2098 = vmatpush3.bf16.msra.mxu1 %v2538_v29 }
 0x230   :  { %2069 = vmatprep.subr.bf16.mxu0 %v2481_v10  ;;  %2099 = vmatprep.subr.bf16.mxu1 %v2427_v3 }
 0x231   :  { %659 = vmatprep.mubr.f32.mxu0 %v2428_v4  ;;  %1753 = vmatprep.mubr.msk.f32.mxu1 %vm2429_vm0, %v2428_v4 }
 0x233   :  { %2071 = vmatpush1.bf16.msra.mxu0 %v2497_v15  ;;  %2101 = vmatpush3.bf16.msra.mxu1 %v2562_v37 }
 0x234   :  { %2073 = vmatprep.subr.bf16.mxu0 %v2500_v16  ;;  %2102 = vmatprep.subr.bf16.mxu1 %v2427_v3 }
 0x237   :  { %2075 = vmatpush1.bf16.msra.mxu0 %v2515_v21  ;;  %2104 = vmatpush3.bf16.msra.mxu1 %v2590_v46 }
 0x238   :  { %2077 = vmatprep.subr.bf16.mxu0 %v2518_v22  ;;  %2105 = vmatprep.subr.bf16.mxu1 %v2427_v3 }
 0x23b   :  { %2079 = vmatpush1.bf16.msra.mxu0 %v2544_v31  ;;  %2107 = vmatpush3.bf16.msra.mxu1 %v2618_v55 }
 0x23c   :  { %2081 = vmatprep.subr.bf16.mxu0 %v2550_v33  ;;  %2108 = vmatprep.subr.bf16.mxu1 %v2427_v3 }
 0x23f   :  { %2083 = vmatpush1.bf16.msra.mxu0 %v2575_v41  ;;  %2110 = vmatpush3.bf16.msra.mxu1 %v2643_v63 }
 0x240   :  { %2085 = vmatprep.subr.bf16.mxu0 %v2578_v42  ;;  %2111 = vmatprep.subr.bf16.mxu1 %v2427_v3 }
 0x243   :  { %2087 = vmatpush1.bf16.msra.mxu0 %v2603_v50  ;;  %2113 = vmatpush3.bf16.msra.mxu1 %v2657_v6 }
 0x244   :  { %2089 = vmatprep.subr.bf16.mxu0 %v2606_v51  ;;  %2114 = vmatprep.subr.bf16.mxu1 %v2427_v3 }
 0x247   :  { %2091 = vmatpush1.bf16.msra.mxu0 %v2631_v59  ;;  %2116 = vmatpush3.bf16.msra.mxu1 %v2673_v12 }
 0x248   :  { %2093 = vmatprep.subr.bf16.mxu0 %v2634_v60  ;;  %2117 = vmatprep.subr.bf16.mxu1 %v2427_v3 }
 0x24b   :  { %2095 = vmatpush1.bf16.msra.mxu0 %v2653_v2  ;;  %2119 = vmatpush3.bf16.msra.mxu1 %v2687_v17 }
 0x24c   :  { %2121 = vmatprep.subr.bf16.mxu0 %v2466_v5  ;;  %2152 = vmatprep.subr.bf16.mxu1 %v2427_v3 }
 0x301   :  { %v493_v61 = vpop.f32.mrb[4].mxu0  ;;  %v564_v62 = vpop.f32.mrb[4].mxu1 }
 0x302   :  { %v494_v0 = vadd.f32 %v493_v61, %v2729_v25  ;;  %v495_v1 = vpop.f32.mrb[5].mxu0  ;;  %v1720_v7 = vpop.f32.mrb[5].mxu1  ;;  %v565_v28 = vadd.f32 %v564_v62, %v2741_v49 }
 0x303   :  { %v496_v8 = vadd.f32 %v495_v1, %v2731_v26 }
 0x304   :  { %v568_v13 = vadd.f32 %v1444_v58, %v494_v0  ;;  %v1451_v58 = vld [vmem:[%s3103_s0 + $0x50] sm:$0xff] }
 0x305   :  { %v575_v18 = vadd.f32 %v1445_v11, %v496_v8 }
 0x306   :  { %v1447_v14 = vmul.f32 -1.442695, %v568_v13 }
 0x307   :  { %v1448_v19 = vmul.f32 -1.442695, %v575_v18  ;;  %v1452_v18 = vld [vmem:[%s3103_s0 + $0x58] sm:$0xff] }
 0x308   :  { %2367 = vpow2.f32 %v1447_v14 }
 0x309   :  { %2369 = vpow2.f32 %v1448_v19 }
 0x312   :  { %v2368_v20 = vpop.eup %2367 }
 0x313   :  { %v572_v23 = vadd.f32 1.0, %v2368_v20  ;;  %v2370_v24 = vpop.eup %2369 }
 0x314   :  { %v579_v27 = vadd.f32 1.0, %v2370_v24 }
 0x315   :  { %2371 = vrcp.f32 %v572_v23 }
 0x316   :  { %2373 = vrcp.f32 %v579_v27 }
 0x31f   :  { %v2372_v30 = vpop.eup %2371 }
 0x320   :  { %v582_v34 = vmul.f32 %v2372_v30, %v565_v28  ;;  %v2374_v36 = vpop.eup %2373 }
 0x321   :  { %v585_v38 = vsub.f32 1.0, %v2374_v36  ;;  %v587_v43 = vmul.f32 %v2374_v36, %v2804_v57 }
 0x322   :  { %v583_v35 = vadd.f32 %v1446_v32, %v582_v34  ;;  %v1456_v34 = vld [vmem:[%s3103_s0 + $0x60] sm:$0xff] }
 0x324   :  { %2375 = vtanh.f32 %v583_v35 }
 0x32e   :  { %v2376_v39 = vpop.eup %2375 }
 0x32f   :  { %v586_v40 = vmul.f32 %v2376_v39, %v585_v38 }
 0x331   :  { %v2860_v44 = vadd.f32 %v587_v43, %v586_v40 }
 0x333   :  { %1449 = vst [vmem:[%s3104_s4 + $0x10] sm:$0xff] %v2860_v44  ;;  %660 = vmatmul.mubr.f32.vlgmr.msra.gmra.mrb[6].mxu0 %v2860_v44  ;;  %1754 = vmatmul.mubr.f32.vlgmr.msra.gmra.mrb[6].mxu1 %v2860_v44 }
 0x334   :  { %2123 = vmatpush1.bf16.msra.mxu0 %v2479_v9  ;;  %2154 = vmatpush3.bf16.msra.mxu1 %v2538_v29 }
 0x335   :  { %2125 = vmatprep.subr.bf16.mxu0 %v2481_v10  ;;  %2155 = vmatprep.subr.bf16.mxu1 %v2427_v3 }
 0x336   :  { %827 = vmatprep.mubr.f32.mxu0 %v2428_v4  ;;  %1788 = vmatprep.mubr.msk.f32.mxu1 %vm2429_vm0, %v2428_v4 }
 0x338   :  { %2127 = vmatpush1.bf16.msra.mxu0 %v2497_v15  ;;  %2157 = vmatpush3.bf16.msra.mxu1 %v2562_v37 }
 0x339   :  { %2129 = vmatprep.subr.bf16.mxu0 %v2500_v16  ;;  %2158 = vmatprep.subr.bf16.mxu1 %v2427_v3 }
 0x33c   :  { %2131 = vmatpush1.bf16.msra.mxu0 %v2515_v21  ;;  %2160 = vmatpush3.bf16.msra.mxu1 %v2590_v46 }
 0x33d   :  { %2133 = vmatprep.subr.bf16.mxu0 %v2518_v22  ;;  %2161 = vmatprep.subr.bf16.mxu1 %v2427_v3 }
 0x340   :  { %2135 = vmatpush1.bf16.msra.mxu0 %v2544_v31  ;;  %2163 = vmatpush3.bf16.msra.mxu1 %v2618_v55 }
 0x341   :  { %2137 = vmatprep.subr.bf16.mxu0 %v2550_v33  ;;  %2164 = vmatprep.subr.bf16.mxu1 %v2427_v3 }
 0x344   :  { %2139 = vmatpush1.bf16.msra.mxu0 %v2575_v41  ;;  %2166 = vmatpush3.bf16.msra.mxu1 %v2643_v63 }
 0x345   :  { %2141 = vmatprep.subr.bf16.mxu0 %v2578_v42  ;;  %2167 = vmatprep.subr.bf16.mxu1 %v2427_v3 }
 0x348   :  { %2143 = vmatpush1.bf16.msra.mxu0 %v2603_v50  ;;  %2169 = vmatpush3.bf16.msra.mxu1 %v2657_v6 }
 0x349   :  { %2145 = vmatprep.subr.bf16.mxu0 %v2606_v51  ;;  %2170 = vmatprep.subr.bf16.mxu1 %v2427_v3 }
 0x34c   :  { %2147 = vmatpush1.bf16.msra.mxu0 %v2631_v59  ;;  %2172 = vmatpush3.bf16.msra.mxu1 %v2673_v12 }
 0x34d   :  { %2149 = vmatprep.subr.bf16.mxu0 %v2634_v60  ;;  %2173 = vmatprep.subr.bf16.mxu1 %v2427_v3 }
 0x350   :  { %2151 = vmatpush1.bf16.msra.mxu0 %v2653_v2  ;;  %2175 = vmatpush3.bf16.msra.mxu1 %v2687_v17 }
 0x351   :  { %2177 = vmatprep.subr.bf16.mxu0 %v2466_v5  ;;  %2208 = vmatprep.subr.bf16.mxu1 %v2427_v3 }
 0x406   :  { %v661_v47 = vpop.f32.mrb[6].mxu0  ;;  %v732_v48 = vpop.f32.mrb[6].mxu1 }
 0x407   :  { %v662_v52 = vadd.f32 %v661_v47, %v2729_v25  ;;  %v663_v53 = vpop.f32.mrb[7].mxu0  ;;  %v1755_v54 = vpop.f32.mrb[7].mxu1  ;;  %v733_v11 = vadd.f32 %v732_v48, %v2741_v49 }
 0x408   :  { %v664_v56 = vadd.f32 %v663_v53, %v2731_v26 }
 0x409   :  { %v736_v57 = vadd.f32 %v1450_v45, %v662_v52  ;;  %v1457_v45 = vld [vmem:[%s3103_s0 + $0x68] sm:$0xff] }
 0x40a   :  { %v743_v62 = vadd.f32 %v1451_v58, %v664_v56 }
 0x40b   :  { %v1453_v61 = vmul.f32 -1.442695, %v736_v57 }
 0x40c   :  { %v1454_v0 = vmul.f32 -1.442695, %v743_v62  ;;  %v1458_v62 = vld [vmem:[%s3103_s0 + $0x70] sm:$0xff] }
 0x40d   :  { %2377 = vpow2.f32 %v1453_v61 }
 0x40e   :  { %2379 = vpow2.f32 %v1454_v0 }
 0x417   :  { %v2378_v1 = vpop.eup %2377 }
 0x418   :  { %v740_v7 = vadd.f32 1.0, %v2378_v1  ;;  %v2380_v8 = vpop.eup %2379 }
 0x419   :  { %v747_v13 = vadd.f32 1.0, %v2380_v8 }
 0x41a   :  { %2381 = vrcp.f32 %v740_v7 }
 0x41b   :  { %2383 = vrcp.f32 %v747_v13 }
 0x424   :  { %v2382_v14 = vpop.eup %2381 }
 0x425   :  { %v750_v19 = vmul.f32 %v2382_v14, %v733_v11  ;;  %v2384_v23 = vpop.eup %2383 }
 0x426   :  { %v753_v24 = vsub.f32 1.0, %v2384_v23  ;;  %v755_v30 = vmul.f32 %v2384_v23, %v2860_v44 }
 0x427   :  { %v751_v20 = vadd.f32 %v1452_v18, %v750_v19  ;;  %v1462_v19 = vld [vmem:[%s3103_s0 + $0x78] sm:$0xff] }
 0x429   :  { %2385 = vtanh.f32 %v751_v20 }
 0x433   :  { %v2386_v27 = vpop.eup %2385 }
 0x434   :  { %v754_v28 = vmul.f32 %v2386_v27, %v753_v24 }
 0x436   :  { %v2916_v32 = vadd.f32 %v755_v30, %v754_v28 }
 0x438   :  { %1455 = vst [vmem:[%s3104_s4 + $0x18] sm:$0xff] %v2916_v32  ;;  %828 = vmatmul.mubr.f32.vlgmr.msra.gmra.mrb[8].mxu0 %v2916_v32  ;;  %1789 = vmatmul.mubr.f32.vlgmr.msra.gmra.mrb[8].mxu1 %v2916_v32 }
 0x439   :  { %2179 = vmatpush1.bf16.msra.mxu0 %v2479_v9  ;;  %2210 = vmatpush3.bf16.msra.mxu1 %v2538_v29 }
 0x43a   :  { %2181 = vmatprep.subr.bf16.mxu0 %v2481_v10  ;;  %2211 = vmatprep.subr.bf16.mxu1 %v2427_v3 }
 0x43b   :  { %995 = vmatprep.mubr.f32.mxu0 %v2428_v4  ;;  %1823 = vmatprep.mubr.msk.f32.mxu1 %vm2429_vm0, %v2428_v4 }
 0x43d   :  { %2183 = vmatpush1.bf16.msra.mxu0 %v2497_v15  ;;  %2213 = vmatpush3.bf16.msra.mxu1 %v2562_v37 }
 0x43e   :  { %2185 = vmatprep.subr.bf16.mxu0 %v2500_v16  ;;  %2214 = vmatprep.subr.bf16.mxu1 %v2427_v3 }
 0x441   :  { %2187 = vmatpush1.bf16.msra.mxu0 %v2515_v21  ;;  %2216 = vmatpush3.bf16.msra.mxu1 %v2590_v46 }
 0x442   :  { %2189 = vmatprep.subr.bf16.mxu0 %v2518_v22  ;;  %2217 = vmatprep.subr.bf16.mxu1 %v2427_v3 }
 0x445   :  { %2191 = vmatpush1.bf16.msra.mxu0 %v2544_v31  ;;  %2219 = vmatpush3.bf16.msra.mxu1 %v2618_v55 }
 0x446   :  { %2193 = vmatprep.subr.bf16.mxu0 %v2550_v33  ;;  %2220 = vmatprep.subr.bf16.mxu1 %v2427_v3 }
 0x449   :  { %2195 = vmatpush1.bf16.msra.mxu0 %v2575_v41  ;;  %2222 = vmatpush3.bf16.msra.mxu1 %v2643_v63 }
 0x44a   :  { %2197 = vmatprep.subr.bf16.mxu0 %v2578_v42  ;;  %2223 = vmatprep.subr.bf16.mxu1 %v2427_v3 }
 0x44d   :  { %2199 = vmatpush1.bf16.msra.mxu0 %v2603_v50  ;;  %2225 = vmatpush3.bf16.msra.mxu1 %v2657_v6 }
 0x44e   :  { %2201 = vmatprep.subr.bf16.mxu0 %v2606_v51  ;;  %2226 = vmatprep.subr.bf16.mxu1 %v2427_v3 }
 0x451   :  { %2203 = vmatpush1.bf16.msra.mxu0 %v2631_v59  ;;  %2228 = vmatpush3.bf16.msra.mxu1 %v2673_v12 }
 0x452   :  { %2205 = vmatprep.subr.bf16.mxu0 %v2634_v60  ;;  %2229 = vmatprep.subr.bf16.mxu1 %v2427_v3 }
 0x455   :  { %2207 = vmatpush1.bf16.msra.mxu0 %v2653_v2  ;;  %2231 = vmatpush3.bf16.msra.mxu1 %v2687_v17 }
 0x456   :  { %2233 = vmatprep.subr.bf16.mxu0 %v2466_v5  ;;  %2264 = vmatprep.subr.bf16.mxu1 %v2427_v3 }
 0x50b   :  { %v829_v35 = vpop.f32.mrb[8].mxu0  ;;  %v900_v36 = vpop.f32.mrb[8].mxu1 }
 0x50c   :  { %v830_v38 = vadd.f32 %v829_v35, %v2729_v25  ;;  %v831_v39 = vpop.f32.mrb[9].mxu0  ;;  %v1790_v40 = vpop.f32.mrb[9].mxu1  ;;  %v901_v58 = vadd.f32 %v900_v36, %v2741_v49 }
 0x50d   :  { %v832_v43 = vadd.f32 %v831_v39, %v2731_v26 }
 0x50e   :  { %v904_v44 = vadd.f32 %v1456_v34, %v830_v38  ;;  %v1463_v34 = vld [vmem:[%s3103_s0 + $0x80] sm:$0xff] }
 0x50f   :  { %v911_v48 = vadd.f32 %v1457_v45, %v832_v43 }
 0x510   :  { %v1459_v47 = vmul.f32 -1.442695, %v904_v44 }
 0x511   :  { %v1460_v52 = vmul.f32 -1.442695, %v911_v48 }
 0x512   :  { %2387 = vpow2.f32 %v1459_v47  ;;  %v1464_v47 = vld [vmem:[%s3103_s0 + $0x88] sm:$0xff] }
 0x513   :  { %2389 = vpow2.f32 %v1460_v52 }
 0x51c   :  { %v2388_v53 = vpop.eup %2387 }
 0x51d   :  { %v908_v54 = vadd.f32 1.0, %v2388_v53  ;;  %v2390_v56 = vpop.eup %2389 }
 0x51e   :  { %v915_v57 = vadd.f32 1.0, %v2390_v56 }
 0x51f   :  { %2391 = vrcp.f32 %v908_v54 }
 0x520   :  { %2393 = vrcp.f32 %v915_v57 }
 0x529   :  { %v2392_v61 = vpop.eup %2391 }
 0x52a   :  { %v918_v0 = vmul.f32 %v2392_v61, %v901_v58  ;;  %v2394_v7 = vpop.eup %2393 }
 0x52b   :  { %v921_v8 = vsub.f32 1.0, %v2394_v7  ;;  %v923_v14 = vmul.f32 %v2394_v7, %v2916_v32 }
 0x52c   :  { %v919_v1 = vadd.f32 %v1458_v62, %v918_v0 }
 0x52e   :  { %2395 = vtanh.f32 %v919_v1  ;;  %v1474_v1 = vld [vmem:[%s3103_s0 + $0xa8] sm:$0xff] }
 0x538   :  { %v2396_v13 = vpop.eup %2395 }
 0x539   :  { %v922_v11 = vmul.f32 %v2396_v13, %v921_v8 }
 0x53b   :  { %v2972_v18 = vadd.f32 %v923_v14, %v922_v11 }
 0x53d   :  { %1461 = vst [vmem:[%s3104_s4 + $0x20] sm:$0xff] %v2972_v18  ;;  %996 = vmatmul.mubr.f32.vlgmr.msra.gmra.mrb[10].mxu0 %v2972_v18  ;;  %1824 = vmatmul.mubr.f32.vlgmr.msra.gmra.mrb[10].mxu1 %v2972_v18 }
 0x53e   :  { %2235 = vmatpush1.bf16.msra.mxu0 %v2479_v9  ;;  %2266 = vmatpush3.bf16.msra.mxu1 %v2538_v29 }
 0x53f   :  { %2237 = vmatprep.subr.bf16.mxu0 %v2481_v10  ;;  %2267 = vmatprep.subr.bf16.mxu1 %v2427_v3 }
 0x540   :  { %1163 = vmatprep.mubr.f32.mxu0 %v2428_v4  ;;  %1858 = vmatprep.mubr.msk.f32.mxu1 %vm2429_vm0, %v2428_v4 }
 0x542   :  { %2239 = vmatpush1.bf16.msra.mxu0 %v2497_v15  ;;  %2269 = vmatpush3.bf16.msra.mxu1 %v2562_v37 }
 0x543   :  { %2241 = vmatprep.subr.bf16.mxu0 %v2500_v16  ;;  %2270 = vmatprep.subr.bf16.mxu1 %v2427_v3 }
 0x546   :  { %2243 = vmatpush1.bf16.msra.mxu0 %v2515_v21  ;;  %2272 = vmatpush3.bf16.msra.mxu1 %v2590_v46 }
 0x547   :  { %2245 = vmatprep.subr.bf16.mxu0 %v2518_v22  ;;  %2273 = vmatprep.subr.bf16.mxu1 %v2427_v3 }
 0x54a   :  { %2247 = vmatpush1.bf16.msra.mxu0 %v2544_v31  ;;  %2275 = vmatpush3.bf16.msra.mxu1 %v2618_v55 }
 0x54b   :  { %2249 = vmatprep.subr.bf16.mxu0 %v2550_v33  ;;  %2276 = vmatprep.subr.bf16.mxu1 %v2427_v3 }
 0x54e   :  { %2251 = vmatpush1.bf16.msra.mxu0 %v2575_v41  ;;  %2278 = vmatpush3.bf16.msra.mxu1 %v2643_v63 }
 0x54f   :  { %2253 = vmatprep.subr.bf16.mxu0 %v2578_v42  ;;  %2279 = vmatprep.subr.bf16.mxu1 %v2427_v3 }
 0x552   :  { %2255 = vmatpush1.bf16.msra.mxu0 %v2603_v50  ;;  %2281 = vmatpush3.bf16.msra.mxu1 %v2657_v6 }
 0x553   :  { %2257 = vmatprep.subr.bf16.mxu0 %v2606_v51  ;;  %2282 = vmatprep.subr.bf16.mxu1 %v2427_v3 }
 0x556   :  { %2259 = vmatpush1.bf16.msra.mxu0 %v2631_v59  ;;  %2284 = vmatpush3.bf16.msra.mxu1 %v2673_v12 }
 0x557   :  { %2261 = vmatprep.subr.bf16.mxu0 %v2634_v60  ;;  %2285 = vmatprep.subr.bf16.mxu1 %v2427_v3 }
 0x55a   :  { %2263 = vmatpush1.bf16.msra.mxu0 %v2653_v2  ;;  %2287 = vmatpush3.bf16.msra.mxu1 %v2687_v17 }
 0x55b   :  { %2289 = vmatprep.subr.bf16.mxu0 %v2466_v5  ;;  %2320 = vmatprep.subr.bf16.mxu1 %v2427_v3 }
 0x610   :  { %v997_v20 = vpop.f32.mrb[10].mxu0  ;;  %v1068_v23 = vpop.f32.mrb[10].mxu1 }
 0x611   :  { %v998_v24 = vadd.f32 %v997_v20, %v2729_v25  ;;  %v999_v27 = vpop.f32.mrb[11].mxu0  ;;  %v1825_v28 = vpop.f32.mrb[11].mxu1  ;;  %v1069_v44 = vadd.f32 %v1068_v23, %v2741_v49  ;;  %v1475_v20 = vld [vmem:[%s3103_s0 + $0xb0] sm:$0xff] }
 0x612   :  { %v1000_v30 = vadd.f32 %v999_v27, %v2731_v26 }
 0x613   :  { %v1072_v32 = vadd.f32 %v1462_v19, %v998_v24 }
 0x614   :  { %v1079_v35 = vadd.f32 %v1463_v34, %v1000_v30 }
 0x615   :  { %v1465_v5 = vmul.f32 -1.442695, %v1072_v32 }
 0x616   :  { %v1466_v36 = vmul.f32 -1.442695, %v1079_v35 }
 0x617   :  { %2397 = vpow2.f32 %v1465_v5 }
 0x618   :  { %2399 = vpow2.f32 %v1466_v36 }
 0x621   :  { %v2398_v38 = vpop.eup %2397 }
 0x622   :  { %v1076_v39 = vadd.f32 1.0, %v2398_v38  ;;  %v2400_v40 = vpop.eup %2399 }
 0x623   :  { %v1083_v43 = vadd.f32 1.0, %v2400_v40 }
 0x624   :  { %2401 = vrcp.f32 %v1076_v39 }
 0x625   :  { %2403 = vrcp.f32 %v1083_v43 }
 0x62e   :  { %v2402_v45 = vpop.eup %2401 }
 0x62f   :  { %v1086_v48 = vmul.f32 %v2402_v45, %v1069_v44  ;;  %v2404_v53 = vpop.eup %2403 }
 0x630   :  { %v1089_v54 = vsub.f32 1.0, %v2404_v53  ;;  %v1091_v58 = vmul.f32 %v2404_v53, %v2972_v18 }
 0x631   :  { %v1087_v52 = vadd.f32 %v1464_v47, %v1086_v48 }
 0x633   :  { %2405 = vtanh.f32 %v1087_v52 }
 0x63d   :  { %v2406_v56 = vpop.eup %2405 }
 0x63e   :  { %v1090_v57 = vmul.f32 %v2406_v56, %v1089_v54 }
 0x640   :  { %v3028_v61 = vadd.f32 %v1091_v58, %v1090_v57 }
 0x642   :  { %1467 = vst [vmem:[%s3104_s4 + $0x28] sm:$0xff] %v3028_v61  ;;  %1164 = vmatmul.mubr.f32.vlgmr.msra.gmra.mrb[12].mxu0 %v3028_v61  ;;  %1859 = vmatmul.mubr.f32.vlgmr.msra.gmra.mrb[12].mxu1 %v3028_v61 }
 0x643   :  { %2291 = vmatpush1.bf16.msra.mxu0 %v2479_v9  ;;  %2322 = vmatpush3.bf16.msra.mxu1 %v2538_v29 }
 0x644   :  { %2293 = vmatprep.subr.bf16.mxu0 %v2481_v10  ;;  %2323 = vmatprep.subr.bf16.mxu1 %v2427_v3 }
 0x645   :  { %1331 = vmatprep.mubr.f32.mxu0 %v2428_v4  ;;  %1893 = vmatprep.mubr.msk.f32.mxu1 %vm2429_vm0, %v2428_v4  ;;  %v1468_v4 = vld [vmem:[%s3103_s0 + $0x90] sm:$0xff] }
 0x647   :  { %2295 = vmatpush1.bf16.msra.mxu0 %v2497_v15  ;;  %2325 = vmatpush3.bf16.msra.mxu1 %v2562_v37 }
 0x648   :  { %2297 = vmatprep.subr.bf16.mxu0 %v2500_v16  ;;  %2326 = vmatprep.subr.bf16.mxu1 %v2427_v3 }
 0x64b   :  { %2299 = vmatpush1.bf16.msra.mxu0 %v2515_v21  ;;  %2328 = vmatpush3.bf16.msra.mxu1 %v2590_v46 }
 0x64c   :  { %2301 = vmatprep.subr.bf16.mxu0 %v2518_v22  ;;  %2329 = vmatprep.subr.bf16.mxu1 %v2427_v3 }
 0x64f   :  { %2303 = vmatpush1.bf16.msra.mxu0 %v2544_v31  ;;  %2331 = vmatpush3.bf16.msra.mxu1 %v2618_v55 }
 0x650   :  { %2305 = vmatprep.subr.bf16.mxu0 %v2550_v33  ;;  %2332 = vmatprep.subr.bf16.mxu1 %v2427_v3 }
 0x653   :  { %2307 = vmatpush1.bf16.msra.mxu0 %v2575_v41  ;;  %2334 = vmatpush3.bf16.msra.mxu1 %v2643_v63 }
 0x654   :  { %2309 = vmatprep.subr.bf16.mxu0 %v2578_v42  ;;  %2335 = vmatprep.subr.bf16.mxu1 %v2427_v3 }
 0x657   :  { %2311 = vmatpush1.bf16.msra.mxu0 %v2603_v50  ;;  %2337 = vmatpush3.bf16.msra.mxu1 %v2657_v6 }
 0x658   :  { %2313 = vmatprep.subr.bf16.mxu0 %v2606_v51  ;;  %2338 = vmatprep.subr.bf16.mxu1 %v2427_v3 }
 0x65b   :  { %2315 = vmatpush1.bf16.msra.mxu0 %v2631_v59  ;;  %2340 = vmatpush3.bf16.msra.mxu1 %v2673_v12  ;;  %v1470_v59 = vld [vmem:[%s3103_s0 + $0xa0] sm:$0xff] }
 0x65c   :  { %2317 = vmatprep.subr.bf16.mxu0 %v2634_v60  ;;  %2341 = vmatprep.subr.bf16.mxu1 %v2427_v3  ;;  %v1469_v3 = vld [vmem:[%s3103_s0 + $0x98] sm:$0xff] }
 0x65f   :  { %2319 = vmatpush1.bf16.msra.mxu0 %v2653_v2  ;;  %2343 = vmatpush3.bf16.msra.mxu1 %v2687_v17 }
 0x715   :  { %v1165_v9 = vpop.f32.mrb[12].mxu0  ;;  %v1236_v10 = vpop.f32.mrb[12].mxu1 }
 0x716   :  { %v1166_v15 = vadd.f32 %v1165_v9, %v2729_v25  ;;  %v1167_v16 = vpop.f32.mrb[13].mxu0  ;;  %v1860_v21 = vpop.f32.mrb[13].mxu1  ;;  %v1237_v51 = vadd.f32 %v1236_v10, %v2741_v49 }
 0x717   :  { %v1168_v22 = vadd.f32 %v1167_v16, %v2731_v26 }
 0x718   :  { %v1240_v29 = vadd.f32 %v1468_v4, %v1166_v15 }
 0x719   :  { %v1247_v33 = vadd.f32 %v1469_v3, %v1168_v22 }
 0x71a   :  { %v1471_v31 = vmul.f32 -1.442695, %v1240_v29 }
 0x71b   :  { %v1472_v37 = vmul.f32 -1.442695, %v1247_v33 }
 0x71c   :  { %2407 = vpow2.f32 %v1471_v31 }
 0x71d   :  { %2409 = vpow2.f32 %v1472_v37 }
 0x726   :  { %v2408_v41 = vpop.eup %2407 }
 0x727   :  { %v1244_v42 = vadd.f32 1.0, %v2408_v41  ;;  %v2410_v46 = vpop.eup %2409 }
 0x728   :  { %v1251_v50 = vadd.f32 1.0, %v2410_v46 }
 0x729   :  { %2411 = vrcp.f32 %v1244_v42 }
 0x72a   :  { %2413 = vrcp.f32 %v1251_v50 }
 0x733   :  { %v2412_v55 = vpop.eup %2411 }
 0x734   :  { %v1254_v60 = vmul.f32 %v2412_v55, %v1237_v51  ;;  %v2414_v2 = vpop.eup %2413 }
 0x735   :  { %v1257_v6 = vsub.f32 1.0, %v2414_v2  ;;  %v1259_v62 = vmul.f32 %v2414_v2, %v3028_v61 }
 0x736   :  { %v1255_v63 = vadd.f32 %v1470_v59, %v1254_v60 }
 0x738   :  { %2415 = vtanh.f32 %v1255_v63 }
 0x742   :  { %v2416_v12 = vpop.eup %2415 }
 0x743   :  { %v1258_v17 = vmul.f32 %v2416_v12, %v1257_v6 }
 0x745   :  { %v1260_v0 = vadd.f32 %v1259_v62, %v1258_v17 }
 0x747   :  { %1473 = vst [vmem:[%s3104_s4 + $0x30] sm:$0xff] %v1260_v0  ;;  %1332 = vmatmul.mubr.f32.vlgmr.msra.gmra.mrb[14].mxu0 %v1260_v0  ;;  %1894 = vmatmul.mubr.f32.vlgmr.msra.gmra.mrb[14].mxu1 %v1260_v0 }
 0x81a   :  { %v1333_v7 = vpop.f32.mrb[14].mxu0  ;;  %v1404_v8 = vpop.f32.mrb[14].mxu1 }
 0x81b   :  { %v1334_v13 = vadd.f32 %v1333_v7, %v2729_v25  ;;  %v1335_v11 = vpop.f32.mrb[15].mxu0  ;;  %v1895_v14 = vpop.f32.mrb[15].mxu1  ;;  %v1405_v25 = vadd.f32 %v1404_v8, %v2741_v49 }
 0x81c   :  { %v1336_v18 = vadd.f32 %v1335_v11, %v2731_v26  ;;  %v1476_v26 = vld [vmem:[%s3103_s0 + $0xb8] sm:$0xff] }
 0x81d   :  { %v1408_v19 = vadd.f32 %v1474_v1, %v1334_v13 }
 0x81e   :  { %v1415_v24 = vadd.f32 %v1475_v20, %v1336_v18 }
 0x81f   :  { %v1477_v23 = vmul.f32 -1.442695, %v1408_v19 }
 0x820   :  { %v1478_v27 = vmul.f32 -1.442695, %v1415_v24 }
 0x821   :  { %2417 = vpow2.f32 %v1477_v23 }
 0x822   :  { %2419 = vpow2.f32 %v1478_v27 }
 0x82b   :  { %v2418_v28 = vpop.eup %2417 }
 0x82c   :  { %v1412_v30 = vadd.f32 1.0, %v2418_v28  ;;  %v2420_v32 = vpop.eup %2419 }
 0x82d   :  { %v1419_v34 = vadd.f32 1.0, %v2420_v32 }
 0x82e   :  { %2421 = vrcp.f32 %v1412_v30 }
 0x82f   :  { %2423 = vrcp.f32 %v1419_v34 }
 0x838   :  { %v2422_v5 = vpop.eup %2421 }
 0x839   :  { %v1422_v35 = vmul.f32 %v2422_v5, %v1405_v25  ;;  %v2424_v38 = vpop.eup %2423 }
 0x83a   :  { %v1425_v39 = vsub.f32 1.0, %v2424_v38  ;;  %v1427_v44 = vmul.f32 %v2424_v38, %v1260_v0 }
 0x83b   :  { %v1423_v36 = vadd.f32 %v1476_v26, %v1422_v35 }
 0x83d   :  { %2425 = vtanh.f32 %v1423_v36 }
 0x847   :  { %v2426_v40 = vpop.eup %2425 }
 0x848   :  { %v1426_v43 = vmul.f32 %v2426_v40, %v1425_v39 }
 0x84a   :  { %v1428_v45 = vadd.f32 %v1427_v44, %v1426_v43 }
 0x84c   :  { %1479 = vst [vmem:[%s3104_s4 + $0x38] sm:$0xff] %v1428_v45 }

</bundles_post_ra>
